<compile_context>
chip_gen: v7x
topology: tpu7x:2x2x1
jax: 0.10.0
libtpu: 0.0.40
codegen_flags: <defaults>
</compile_context>

<pallas_src>
import functools

import jax
import jax.numpy as jnp
from jax import lax
from jax.experimental import pallas as pl
from jax.experimental.pallas import tpu as pltpu


# ----------------------------- fused Pallas kernel -------------------------- #

def _fused_transformer_kernel(
        x_ref, enc_w_ref, enc_b_ref, cls_ref,
        w_in_ref, b_in_ref, w_out_ref, b_out_ref,
        ff1_w_ref, ff1_b_ref, ff2_w_ref, ff2_b_ref,
        ln1_g_ref, ln1_b_ref, ln2_g_ref, ln2_b_ref,
        dec_w_ref, dec_b_ref,
        o_ref,
        ctx_ref,
        *, num_layers, num_heads, n_batch, seq_plus1, d_model, eps=1e-5):
    T, B, dT, H = seq_plus1, n_batch, d_model, num_heads
    TB = T * B
    Dh = dT // H

    def layer_norm(v, g, b):
        # Two independent reductions (E[x], E[x^2]); var = E[x^2] - mu^2.
        mu = jnp.mean(v, axis=-1, keepdims=True)
        ms = jnp.mean(v * v, axis=-1, keepdims=True)
        var = jnp.maximum(ms - mu * mu, 0.0)
        return (v - mu) * lax.rsqrt(var + eps) * g + b

    # ---- encoder Linear + CLS prepend (rows [0, B) hold the CLS token) ----
    emb = jnp.dot(x_ref[...], enc_w_ref[...],
                  preferred_element_type=jnp.float32) + enc_b_ref[...]
    row = lax.broadcasted_iota(jnp.int32, (TB, dT), 0)
    h = jnp.where(row < B, jnp.broadcast_to(cls_ref[...], (TB, dT)), emb)

    # ---- additive cross-batch mask, built in-kernel (0 same batch, -1e30) ---
    ri = lax.broadcasted_iota(jnp.int32, (TB, TB), 0)
    ci = lax.broadcasted_iota(jnp.int32, (TB, TB), 1)
    bias = jnp.where((ri % B) == (ci % B), 0.0, -1e30).astype(jnp.float32)

    for l in range(num_layers):
        # ---- fused QKV projection: ONE matmul per layer ----
        # (1/sqrt(Dh) already folded into the Q columns/bias at pack time)
        qkv = jnp.dot(h, w_in_ref[l],
                      preferred_element_type=jnp.float32) + b_in_ref[l]

        # ---- per-head scores, softmax batched over all heads at once ----
        s_list = []
        for hd in range(H):
            q_h = qkv[:, hd * Dh:(hd + 1) * Dh]
            k_h = qkv[:, dT + hd * Dh:dT + (hd + 1) * Dh]
            s_list.append(lax.dot_general(
                q_h, k_h, (((1,), (1,)), ((), ())),
                preferred_element_type=jnp.float32))            # (TB, TB)
        s = jnp.stack(s_list) + bias                             # (H, TB, TB)
        m = jnp.max(s, axis=-1, keepdims=True)
        p = jnp.exp(s - m)
        denom = jnp.sum(p, axis=-1, keepdims=True)
        p = p * pl.reciprocal(denom, approx=True)                # EUP slot

        # ---- per-head context assembled into a lane-dense (TB, dT) scratch --
        for hd in range(H):
            v_h = qkv[:, 2 * dT + hd * Dh:2 * dT + (hd + 1) * Dh]
            ctx_ref[:, hd * Dh:(hd + 1) * Dh] = jnp.dot(
                p[hd], v_h, preferred_element_type=jnp.float32)  # (TB, Dh)

        # ---- fused output projection: ONE (TB,dT)x(dT,dT) matmul ----
        attn = jnp.dot(ctx_ref[...], w_out_ref[l],
                       preferred_element_type=jnp.float32) + b_out_ref[l]

        h1 = layer_norm(h + attn, ln1_g_ref[l], ln1_b_ref[l])

        # ---- feed-forward (ReLU, dim_feedforward = 4*dT) ----
        ff = jnp.dot(h1, ff1_w_ref[l],
                     preferred_element_type=jnp.float32) + ff1_b_ref[l]
        ff = jnp.maximum(ff, 0.0)
        ff = jnp.dot(ff, ff2_w_ref[l],
                     preferred_element_type=jnp.float32) + ff2_b_ref[l]
        h = layer_norm(h1 + ff, ln2_g_ref[l], ln2_b_ref[l])

    # ---- decoder applied to the CLS rows only ----
    o_ref[...] = jnp.dot(h[0:B, :], dec_w_ref[...],
                         preferred_element_type=jnp.float32) + dec_b_ref[...]


def _full_spec(shape):
    n = len(shape)
    return pl.BlockSpec(shape, lambda i, n=n: (0,) * n)


# --------------------------- model forward (wrapper) ------------------------ #

def in_context_model_forward(packed, x, *, num_heads):
    """x: (S, B, dx+dy) — same (seq, batch, feature) convention as the torch code."""
    S, B, dIn = x.shape
    dT = packed["enc_w"].shape[1]
    dOut = packed["dec_w"].shape[1]
    L = packed["ff1_w"].shape[0]
    T = S + 1
    TB = T * B

    # Token slab in (seq, batch) row-major order; rows [0, B) are reserved for
    # the CLS token (overwritten inside the kernel).
    x_pad = jnp.concatenate(
        [jnp.zeros((B, dIn), x.dtype), x.reshape(S * B, dIn)], axis=0)

    kernel = functools.partial(
        _fused_transformer_kernel,
        num_layers=int(L), num_heads=num_heads,
        n_batch=B, seq_plus1=T, d_model=dT)

    args = (x_pad,
            packed["enc_w"], packed["enc_b"], packed["cls"],
            packed["w_in"], packed["b_in"], packed["w_out"], packed["b_out"],
            packed["ff1_w"], packed["ff1_b"], packed["ff2_w"], packed["ff2_b"],
            packed["ln1_g"], packed["ln1_b"], packed["ln2_g"], packed["ln2_b"],
            packed["dec_w"], packed["dec_b"])

    return pl.pallas_call(
        kernel,
        grid=(1,),
        in_specs=[_full_spec(a.shape) for a in args],
        out_specs=_full_spec((B, dOut)),
        out_shape=jax.ShapeDtypeStruct((B, dOut), jnp.float32),
        scratch_shapes=[pltpu.VMEM((TB, dT), jnp.float32)],
        compiler_params=pltpu.CompilerParams(
            dimension_semantics=("parallel",)),
    )(*args)


# --------------------------- parameter construction ------------------------- #

def init_params(key, dx, dy, dT, dOut, num_layers):
    dIn = dx + dy
    keys = jax.random.split(key, 3 + num_layers)

    def lin_init(k, fan_in, fan_out):
        k1, k2 = jax.random.split(k)
        bound = 1.0 / (fan_in ** 0.5)
        w = jax.random.uniform(k1, (fan_in, fan_out), jnp.float32, -bound, bound)
        b = jax.random.uniform(k2, (fan_out,), jnp.float32, -bound, bound)
        return w, b

    params = {}
    params["enc_w"], params["enc_b"] = lin_init(keys[0], dIn, dT)
    params["dec_w"], params["dec_b"] = lin_init(keys[1], dT, dOut)
    # CLS: xavier_uniform on a (1, 1, dT) tensor -> bound sqrt(6 / (2*dT))
    cls_bound = (6.0 / (2.0 * dT)) ** 0.5
    params["cls"] = jax.random.uniform(keys[2], (dT,), jnp.float32,
                                       -cls_bound, cls_bound)

    layers = []
    for l in range(num_layers):
        lk = jax.random.split(keys[3 + l], 4)
        in_w, in_b = lin_init(lk[0], dT, 3 * dT)
        out_w, out_b = lin_init(lk[1], dT, dT)
        ff1_w, ff1_b = lin_init(lk[2], dT, 4 * dT)
        ff2_w, ff2_b = lin_init(lk[3], 4 * dT, dT)
        layers.append(dict(
            in_w=in_w, in_b=in_b, out_w=out_w, out_b=out_b,
            ff1_w=ff1_w, ff1_b=ff1_b, ff2_w=ff2_w, ff2_b=ff2_b,
            ln1_g=jnp.ones((dT,), jnp.float32), ln1_b=jnp.zeros((dT,), jnp.float32),
            ln2_g=jnp.ones((dT,), jnp.float32), ln2_b=jnp.zeros((dT,), jnp.float32)))
    params["layers"] = layers
    return params


def pack_params(params, num_heads):
    """Pack per-layer params into lane-dense stacked arrays for the fused kernel.

    The attention scale 1/sqrt(Dh) is folded into the Q columns of in_w/in_b.
    """
    dT = params["enc_w"].shape[1]
    Dh = dT // num_heads
    scale = 1.0 / (Dh ** 0.5)
    layers = params["layers"]

    def stk(name, shape):
        return jnp.stack([lp[name].reshape(shape) for lp in layers])

    w_in, b_in = [], []
    for lp in layers:
        w = lp["in_w"]                                 # (dT, 3dT), cols = [Q|K|V]
        b = lp["in_b"]                                 # (3dT,)
        w = jnp.concatenate([w[:, :dT] * scale, w[:, dT:]], axis=1)
        b = jnp.concatenate([b[:dT] * scale, b[dT:]], axis=0)
        w_in.append(w)
        b_in.append(b.reshape(1, 3 * dT))

    return dict(
        enc_w=params["enc_w"], enc_b=params["enc_b"].reshape(1, dT),
        dec_w=params["dec_w"], dec_b=params["dec_b"].reshape(1, -1),
        cls=params["cls"].reshape(1, dT),
        w_in=jnp.stack(w_in),                 # (L, dT, 3dT)   lane-dense
        b_in=jnp.stack(b_in),                 # (L, 1, 3dT)
        w_out=stk("out_w", (dT, dT)),         # (L, dT, dT)
        b_out=stk("out_b", (1, dT)),          # (L, 1, dT)
        ff1_w=stk("ff1_w", (dT, 4 * dT)),
        ff1_b=stk("ff1_b", (1, 4 * dT)),
        ff2_w=stk("ff2_w", (4 * dT, dT)),
        ff2_b=stk("ff2_b", (1, dT)),
        ln1_g=stk("ln1_g", (1, dT)), ln1_b=stk("ln1_b", (1, dT)),
        ln2_g=stk("ln2_g", (1, dT)), ln2_b=stk("ln2_b", (1, dT)),
    )


# ------------------------------ pure-JAX reference -------------------------- #

def reference_forward(params, x, num_heads):
    S, B, dIn = x.shape
    dT = params["enc_w"].shape[1]
    Dh = dT // num_heads
    emb = x.reshape(S * B, dIn) @ params["enc_w"] + params["enc_b"]
    emb = emb.reshape(S, B, dT)
    cls = jnp.broadcast_to(params["cls"].reshape(1, 1, dT), (1, B, dT))
    h = jnp.concatenate([cls, emb], axis=0)
    T = S + 1

    def ln(v, g, b, eps=1e-5):
        mu = jnp.mean(v, axis=-1, keepdims=True)
        var = jnp.mean((v - mu) ** 2, axis=-1, keepdims=True)
        return (v - mu) / jnp.sqrt(var + eps) * g + b

    for lp in params["layers"]:
        hf = h.reshape(T * B, dT)
        qkv = (hf @ lp["in_w"] + lp["in_b"]).reshape(T, B, 3, num_heads, Dh)
        qkv = jnp.transpose(qkv, (2, 1, 3, 0, 4))
        q, k, v = qkv[0], qkv[1], qkv[2]               # (B, H, T, Dh)
        s = jnp.einsum("bhqd,bhkd->bhqk", q, k) / (Dh ** 0.5)
        p = jax.nn.softmax(s, axis=-1)
        a = jnp.einsum("bhqk,bhkd->bhqd", p, v)        # (B, H, T, Dh)
        a = jnp.transpose(a, (2, 0, 1, 3)).reshape(T * B, dT)
        attn_out = a @ lp["out_w"] + lp["out_b"]
        h1 = ln(hf + attn_out, lp["ln1_g"], lp["ln1_b"])
        ff = jnp.maximum(h1 @ lp["ff1_w"] + lp["ff1_b"], 0.0)
        ff = ff @ lp["ff2_w"] + lp["ff2_b"]
        h = ln(h1 + ff, lp["ln2_g"], lp["ln2_b"]).reshape(T, B, dT)
    return h[0] @ params["dec_w"] + params["dec_b"]


# ----------------------------------- main ----------------------------------- #

if __name__ == "__main__":
    # config: dx=2, dy=1 -> dIn=3; dT=32; 4 heads; 2 layers.
    # dOut = eval_model.count_params() is external to the forward pass; fixed to 8.
    dx, dy, dT, num_heads, num_layers, dOut = 2, 1, 32, 4, 2, 8
    S, B = 8, 2   # seq length, batch (forward receives (seq, batch, dx+dy))

    key = jax.random.PRNGKey(0)
    kp, kx = jax.random.split(key)
    params = init_params(kp, dx, dy, dT, dOut, num_layers)
    x = jax.random.normal(kx, (S, B, dx + dy), jnp.float32)

    packed = pack_params(params, num_heads)
    fwd = jax.jit(functools.partial(in_context_model_forward, num_heads=num_heads))
    out = jax.block_until_ready(fwd(packed, x))
    assert out.shape == (B, dOut), out.shape

    ref = reference_forward(params, x, num_heads)
    max_diff = jnp.max(jnp.abs(out - ref))
    if not jnp.allclose(out, ref, atol=5e-3, rtol=5e-3):
        raise AssertionError(f"mismatch vs reference, max abs diff = {max_diff}")

    # TODO(synk): compute_loss / compute_forward / plot_eval depend on eval_model
    # and the loss configuration; they are training/eval utilities, not part of
    # InContextModel.forward, and are not implemented here.
    print("KERNEL_OK")
</pallas_src>

<mosaic_0001>
module attributes {stable_mosaic.version = 11 : i64} {
  func.func @_fused_transformer_kernel(%arg0: i32, %arg1: memref<18x3xf32, #tpu.memory_space<vmem>>, %arg2: memref<3x32xf32, #tpu.memory_space<vmem>>, %arg3: memref<1x32xf32, #tpu.memory_space<vmem>>, %arg4: memref<1x32xf32, #tpu.memory_space<vmem>>, %arg5: memref<2x32x96xf32, #tpu.memory_space<vmem>>, %arg6: memref<2x1x96xf32, #tpu.memory_space<vmem>>, %arg7: memref<2x32x32xf32, #tpu.memory_space<vmem>>, %arg8: memref<2x1x32xf32, #tpu.memory_space<vmem>>, %arg9: memref<2x32x128xf32, #tpu.memory_space<vmem>>, %arg10: memref<2x1x128xf32, #tpu.memory_space<vmem>>, %arg11: memref<2x128x32xf32, #tpu.memory_space<vmem>>, %arg12: memref<2x1x32xf32, #tpu.memory_space<vmem>>, %arg13: memref<2x1x32xf32, #tpu.memory_space<vmem>>, %arg14: memref<2x1x32xf32, #tpu.memory_space<vmem>>, %arg15: memref<2x1x32xf32, #tpu.memory_space<vmem>>, %arg16: memref<2x1x32xf32, #tpu.memory_space<vmem>>, %arg17: memref<32x8xf32, #tpu.memory_space<vmem>>, %arg18: memref<1x8xf32, #tpu.memory_space<vmem>>, %arg19: memref<2x8xf32, #tpu.memory_space<vmem>>, %arg20: memref<18x32xf32, #tpu.memory_space<vmem>>) attributes {dimension_semantics = [#tpu.dimension_semantics<parallel>], iteration_bounds = array<i64: 1>, scalar_prefetch = 0 : i64, scratch_operands = 1 : i64, tpu.core_type = #tpu.core_type<tc>, window_params = [{pipeline_mode = #tpu.pipeline_mode<synchronous>, transform_indices = @transform_0, window_bounds = array<i64: 18, 3>}, {pipeline_mode = #tpu.pipeline_mode<synchronous>, transform_indices = @transform_1, window_bounds = array<i64: 3, 32>}, {pipeline_mode = #tpu.pipeline_mode<synchronous>, transform_indices = @transform_2, window_bounds = array<i64: 1, 32>}, {pipeline_mode = #tpu.pipeline_mode<synchronous>, transform_indices = @transform_3, window_bounds = array<i64: 1, 32>}, {pipeline_mode = #tpu.pipeline_mode<synchronous>, transform_indices = @transform_4, window_bounds = array<i64: 2, 32, 96>}, {pipeline_mode = #tpu.pipeline_mode<synchronous>, transform_indices = @transform_5, window_bounds = array<i64: 2, 1, 96>}, {pipeline_mode = #tpu.pipeline_mode<synchronous>, transform_indices = @transform_6, window_bounds = array<i64: 2, 32, 32>}, {pipeline_mode = #tpu.pipeline_mode<synchronous>, transform_indices = @transform_7, window_bounds = array<i64: 2, 1, 32>}, {pipeline_mode = #tpu.pipeline_mode<synchronous>, transform_indices = @transform_8, window_bounds = array<i64: 2, 32, 128>}, {pipeline_mode = #tpu.pipeline_mode<synchronous>, transform_indices = @transform_9, window_bounds = array<i64: 2, 1, 128>}, {pipeline_mode = #tpu.pipeline_mode<synchronous>, transform_indices = @transform_10, window_bounds = array<i64: 2, 128, 32>}, {pipeline_mode = #tpu.pipeline_mode<synchronous>, transform_indices = @transform_11, window_bounds = array<i64: 2, 1, 32>}, {pipeline_mode = #tpu.pipeline_mode<synchronous>, transform_indices = @transform_12, window_bounds = array<i64: 2, 1, 32>}, {pipeline_mode = #tpu.pipeline_mode<synchronous>, transform_indices = @transform_13, window_bounds = array<i64: 2, 1, 32>}, {pipeline_mode = #tpu.pipeline_mode<synchronous>, transform_indices = @transform_14, window_bounds = array<i64: 2, 1, 32>}, {pipeline_mode = #tpu.pipeline_mode<synchronous>, transform_indices = @transform_15, window_bounds = array<i64: 2, 1, 32>}, {pipeline_mode = #tpu.pipeline_mode<synchronous>, transform_indices = @transform_16, window_bounds = array<i64: 32, 8>}, {pipeline_mode = #tpu.pipeline_mode<synchronous>, transform_indices = @transform_17, window_bounds = array<i64: 1, 8>}, {pipeline_mode = #tpu.pipeline_mode<synchronous>, transform_indices = @transform_18, window_bounds = array<i64: 2, 8>}]} {
    %c0 = arith.constant 0 : index
    %c0_0 = arith.constant 0 : index
    %0 = vector.load %arg1[%c0, %c0_0] : memref<18x3xf32, #tpu.memory_space<vmem>>, vector<18x3xf32>
    %c0_1 = arith.constant 0 : index
    %c0_2 = arith.constant 0 : index
    %1 = vector.load %arg2[%c0_1, %c0_2] : memref<3x32xf32, #tpu.memory_space<vmem>>, vector<3x32xf32>
    %cst = arith.constant dense<0.000000e+00> : vector<18x32xf32>
    %2 = tpu.matmul %0, %1, %cst {dimension_numbers = #tpu.dot_dimension_numbers<[1], [0], [0], [1], [0, 0, 1, 1], [], []>} : vector<18x3xf32>, vector<3x32xf32>, vector<18x32xf32> -> vector<18x32xf32>
    %c0_3 = arith.constant 0 : index
    %c0_4 = arith.constant 0 : index
    %3 = vector.load %arg3[%c0_3, %c0_4] : memref<1x32xf32, #tpu.memory_space<vmem>>, vector<1x32xf32>
    %4 = vector.broadcast %3 : vector<1x32xf32> to vector<18x32xf32>
    %5 = arith.addf %2, %4 : vector<18x32xf32>
    %6 = tpu.iota {dimensions = array<i32: 0>} : vector<18x32xi32>
    %c2_i32 = arith.constant 2 : i32
    %7 = vector.broadcast %c2_i32 : i32 to vector<18x32xi32>
    %8 = arith.cmpi slt, %6, %7 : vector<18x32xi32>
    %c0_5 = arith.constant 0 : index
    %c0_6 = arith.constant 0 : index
    %9 = vector.load %arg4[%c0_5, %c0_6] : memref<1x32xf32, #tpu.memory_space<vmem>>, vector<1x32xf32>
    %10 = vector.shape_cast %9 : vector<1x32xf32> to vector<1x32xf32>
    %11 = vector.broadcast %10 : vector<1x32xf32> to vector<18x32xf32>
    %12 = arith.select %8, %11, %5 : vector<18x32xi1>, vector<18x32xf32>
    %13 = tpu.iota {dimensions = array<i32: 0>} : vector<18x18xi32>
    %14 = tpu.iota {dimensions = array<i32: 1>} : vector<18x18xi32>
    %c2_i32_7 = arith.constant 2 : i32
    %c0_i32 = arith.constant 0 : i32
    %15 = arith.cmpi eq, %c2_i32_7, %c0_i32 : i32
    %c1_i32 = arith.constant 1 : i32
    %16 = arith.select %15, %c1_i32, %c2_i32_7 : i32
    %17 = vector.broadcast %16 : i32 to vector<18x18xi32>
    %18 = arith.remsi %13, %17 : vector<18x18xi32>
    %c0_i32_8 = arith.constant 0 : i32
    %19 = vector.broadcast %c0_i32_8 : i32 to vector<18x18xi32>
    %20 = arith.cmpi ne, %18, %19 : vector<18x18xi32>
    %c0_i32_9 = arith.constant 0 : i32
    %21 = vector.broadcast %c0_i32_9 : i32 to vector<18x18xi32>
    %22 = arith.cmpi slt, %18, %21 : vector<18x18xi32>
    %c0_i32_10 = arith.constant 0 : i32
    %23 = arith.cmpi slt, %16, %c0_i32_10 : i32
    %24 = vector.broadcast %23 : i1 to vector<18x18xi1>
    %25 = vector.broadcast %24 : vector<18x18xi1> to vector<18x18xi1>
    %26 = arith.xori %22, %25 : vector<18x18xi1>
    %27 = arith.andi %26, %20 : vector<18x18xi1>
    %28 = vector.broadcast %16 : i32 to vector<18x18xi32>
    %29 = arith.addi %18, %28 : vector<18x18xi32>
    %30 = arith.select %27, %29, %18 : vector<18x18xi1>, vector<18x18xi32>
    %c2_i32_11 = arith.constant 2 : i32
    %c0_i32_12 = arith.constant 0 : i32
    %31 = arith.cmpi eq, %c2_i32_11, %c0_i32_12 : i32
    %c1_i32_13 = arith.constant 1 : i32
    %32 = arith.select %31, %c1_i32_13, %c2_i32_11 : i32
    %33 = vector.broadcast %32 : i32 to vector<18x18xi32>
    %34 = arith.remsi %14, %33 : vector<18x18xi32>
    %c0_i32_14 = arith.constant 0 : i32
    %35 = vector.broadcast %c0_i32_14 : i32 to vector<18x18xi32>
    %36 = arith.cmpi ne, %34, %35 : vector<18x18xi32>
    %c0_i32_15 = arith.constant 0 : i32
    %37 = vector.broadcast %c0_i32_15 : i32 to vector<18x18xi32>
    %38 = arith.cmpi slt, %34, %37 : vector<18x18xi32>
    %c0_i32_16 = arith.constant 0 : i32
    %39 = arith.cmpi slt, %32, %c0_i32_16 : i32
    %40 = vector.broadcast %39 : i1 to vector<18x18xi1>
    %41 = vector.broadcast %40 : vector<18x18xi1> to vector<18x18xi1>
    %42 = arith.xori %38, %41 : vector<18x18xi1>
    %43 = arith.andi %42, %36 : vector<18x18xi1>
    %44 = vector.broadcast %32 : i32 to vector<18x18xi32>
    %45 = arith.addi %34, %44 : vector<18x18xi32>
    %46 = arith.select %43, %45, %34 : vector<18x18xi1>, vector<18x18xi32>
    %47 = arith.cmpi eq, %30, %46 : vector<18x18xi32>
    %cst_17 = arith.constant 0.000000e+00 : f32
    %cst_18 = arith.constant -1.000000e+30 : f32
    %48 = vector.broadcast %cst_17 : f32 to vector<18x18xf32>
    %49 = vector.broadcast %cst_18 : f32 to vector<18x18xf32>
    %50 = arith.select %47, %48, %49 : vector<18x18xi1>, vector<18x18xf32>
    %c0_19 = arith.constant 0 : index
    %c0_20 = arith.constant 0 : index
    %c0_21 = arith.constant 0 : index
    %51 = vector.load %arg5[%c0_19, %c0_20, %c0_21] : memref<2x32x96xf32, #tpu.memory_space<vmem>>, vector<1x32x96xf32>
    %52 = vector.shape_cast %51 : vector<1x32x96xf32> to vector<32x96xf32>
    %cst_22 = arith.constant dense<0.000000e+00> : vector<18x96xf32>
    %53 = tpu.matmul %12, %52, %cst_22 {dimension_numbers = #tpu.dot_dimension_numbers<[1], [0], [0], [1], [0, 0, 1, 1], [], []>} : vector<18x32xf32>, vector<32x96xf32>, vector<18x96xf32> -> vector<18x96xf32>
    %c0_23 = arith.constant 0 : index
    %c0_24 = arith.constant 0 : index
    %c0_25 = arith.constant 0 : index
    %54 = vector.load %arg6[%c0_23, %c0_24, %c0_25] : memref<2x1x96xf32, #tpu.memory_space<vmem>>, vector<1x1x96xf32>
    %55 = vector.shape_cast %54 : vector<1x1x96xf32> to vector<1x96xf32>
    %56 = vector.broadcast %55 : vector<1x96xf32> to vector<18x96xf32>
    %57 = arith.addf %53, %56 : vector<18x96xf32>
    %58 = vector.extract_strided_slice %57 {offsets = [0, 0], sizes = [18, 8], strides = [1, 1]} : vector<18x96xf32> to vector<18x8xf32>
    %59 = vector.extract_strided_slice %57 {offsets = [0, 32], sizes = [18, 8], strides = [1, 1]} : vector<18x96xf32> to vector<18x8xf32>
    %cst_26 = arith.constant dense<0.000000e+00> : vector<18x18xf32>
    %60 = tpu.matmul %58, %59, %cst_26 {dimension_numbers = #tpu.dot_dimension_numbers<[1], [1], [0], [0], [0, 0, 1, 0], [], []>} : vector<18x8xf32>, vector<18x8xf32>, vector<18x18xf32> -> vector<18x18xf32>
    %61 = vector.extract_strided_slice %57 {offsets = [0, 8], sizes = [18, 8], strides = [1, 1]} : vector<18x96xf32> to vector<18x8xf32>
    %62 = vector.extract_strided_slice %57 {offsets = [0, 40], sizes = [18, 8], strides = [1, 1]} : vector<18x96xf32> to vector<18x8xf32>
    %cst_27 = arith.constant dense<0.000000e+00> : vector<18x18xf32>
    %63 = tpu.matmul %61, %62, %cst_27 {dimension_numbers = #tpu.dot_dimension_numbers<[1], [1], [0], [0], [0, 0, 1, 0], [], []>} : vector<18x8xf32>, vector<18x8xf32>, vector<18x18xf32> -> vector<18x18xf32>
    %64 = vector.extract_strided_slice %57 {offsets = [0, 16], sizes = [18, 8], strides = [1, 1]} : vector<18x96xf32> to vector<18x8xf32>
    %65 = vector.extract_strided_slice %57 {offsets = [0, 48], sizes = [18, 8], strides = [1, 1]} : vector<18x96xf32> to vector<18x8xf32>
    %cst_28 = arith.constant dense<0.000000e+00> : vector<18x18xf32>
    %66 = tpu.matmul %64, %65, %cst_28 {dimension_numbers = #tpu.dot_dimension_numbers<[1], [1], [0], [0], [0, 0, 1, 0], [], []>} : vector<18x8xf32>, vector<18x8xf32>, vector<18x18xf32> -> vector<18x18xf32>
    %67 = vector.extract_strided_slice %57 {offsets = [0, 24], sizes = [18, 8], strides = [1, 1]} : vector<18x96xf32> to vector<18x8xf32>
    %68 = vector.extract_strided_slice %57 {offsets = [0, 56], sizes = [18, 8], strides = [1, 1]} : vector<18x96xf32> to vector<18x8xf32>
    %cst_29 = arith.constant dense<0.000000e+00> : vector<18x18xf32>
    %69 = tpu.matmul %67, %68, %cst_29 {dimension_numbers = #tpu.dot_dimension_numbers<[1], [1], [0], [0], [0, 0, 1, 0], [], []>} : vector<18x8xf32>, vector<18x8xf32>, vector<18x18xf32> -> vector<18x18xf32>
    %70 = vector.shape_cast %60 : vector<18x18xf32> to vector<1x18x18xf32>
    %71 = vector.shape_cast %63 : vector<18x18xf32> to vector<1x18x18xf32>
    %72 = vector.shape_cast %66 : vector<18x18xf32> to vector<1x18x18xf32>
    %73 = vector.shape_cast %69 : vector<18x18xf32> to vector<1x18x18xf32>
    %74 = tpu.concatenate %70, %71, %72, %73 in 0 : vector<1x18x18xf32>, vector<1x18x18xf32>, vector<1x18x18xf32>, vector<1x18x18xf32> -> vector<4x18x18xf32>
    %75 = vector.shape_cast %50 : vector<18x18xf32> to vector<1x18x18xf32>
    %76 = vector.broadcast %75 : vector<1x18x18xf32> to vector<4x18x18xf32>
    %77 = arith.addf %74, %76 : vector<4x18x18xf32>
    %cst_30 = arith.constant dense<0xFF800000> : vector<4x18xf32>
    %78 = vector.multi_reduction <maximumf>, %77, %cst_30 [2] : vector<4x18x18xf32> to vector<4x18xf32>
    %79 = vector.shape_cast %78 : vector<4x18xf32> to vector<4x18x1xf32>
    %80 = vector.broadcast %79 : vector<4x18x1xf32> to vector<4x18x18xf32>
    %81 = arith.subf %77, %80 : vector<4x18x18xf32>
    %82 = math.exp %81 : vector<4x18x18xf32>
    %cst_31 = arith.constant dense<0.000000e+00> : vector<4x18xf32>
    %83 = vector.multi_reduction <add>, %82, %cst_31 [2] : vector<4x18x18xf32> to vector<4x18xf32>
    %84 = vector.shape_cast %83 : vector<4x18xf32> to vector<4x18x1xf32>
    %85 = tpu.reciprocal %84 {approx = true} : vector<4x18x1xf32> -> vector<4x18x1xf32>
    %86 = vector.broadcast %85 : vector<4x18x1xf32> to vector<4x18x18xf32>
    %87 = arith.mulf %82, %86 : vector<4x18x18xf32>
    %88 = vector.extract_strided_slice %57 {offsets = [0, 64], sizes = [18, 8], strides = [1, 1]} : vector<18x96xf32> to vector<18x8xf32>
    %89 = vector.extract_strided_slice %87 {offsets = [0, 0, 0], sizes = [1, 18, 18], strides = [1, 1, 1]} : vector<4x18x18xf32> to vector<1x18x18xf32>
    %90 = vector.shape_cast %89 : vector<1x18x18xf32> to vector<18x18xf32>
    %cst_32 = arith.constant dense<0.000000e+00> : vector<18x8xf32>
    %91 = tpu.matmul %90, %88, %cst_32 {dimension_numbers = #tpu.dot_dimension_numbers<[1], [0], [0], [1], [0, 0, 1, 1], [], []>} : vector<18x18xf32>, vector<18x8xf32>, vector<18x8xf32> -> vector<18x8xf32>
    %c0_33 = arith.constant 0 : index
    %c0_34 = arith.constant 0 : index
    %92 = vector.load %arg20[%c0_33, %c0_34] : memref<18x32xf32, #tpu.memory_space<vmem>>, vector<18x8xf32>
    tpu.vector_store %arg20[%c0_33, %c0_34], %91 {strides = array<i32>} : memref<18x32xf32, #tpu.memory_space<vmem>>, vector<18x8xf32>,
    %93 = vector.extract_strided_slice %57 {offsets = [0, 72], sizes = [18, 8], strides = [1, 1]} : vector<18x96xf32> to vector<18x8xf32>
    %94 = vector.extract_strided_slice %87 {offsets = [1, 0, 0], sizes = [1, 18, 18], strides = [1, 1, 1]} : vector<4x18x18xf32> to vector<1x18x18xf32>
    %95 = vector.shape_cast %94 : vector<1x18x18xf32> to vector<18x18xf32>
    %cst_35 = arith.constant dense<0.000000e+00> : vector<18x8xf32>
    %96 = tpu.matmul %95, %93, %cst_35 {dimension_numbers = #tpu.dot_dimension_numbers<[1], [0], [0], [1], [0, 0, 1, 1], [], []>} : vector<18x18xf32>, vector<18x8xf32>, vector<18x8xf32> -> vector<18x8xf32>
    %c0_36 = arith.constant 0 : index
    %c8 = arith.constant 8 : index
    %97 = vector.load %arg20[%c0_36, %c8] : memref<18x32xf32, #tpu.memory_space<vmem>>, vector<18x8xf32>
    tpu.vector_store %arg20[%c0_36, %c8], %96 {strides = array<i32>} : memref<18x32xf32, #tpu.memory_space<vmem>>, vector<18x8xf32>,
    %98 = vector.extract_strided_slice %57 {offsets = [0, 80], sizes = [18, 8], strides = [1, 1]} : vector<18x96xf32> to vector<18x8xf32>
    %99 = vector.extract_strided_slice %87 {offsets = [2, 0, 0], sizes = [1, 18, 18], strides = [1, 1, 1]} : vector<4x18x18xf32> to vector<1x18x18xf32>
    %100 = vector.shape_cast %99 : vector<1x18x18xf32> to vector<18x18xf32>
    %cst_37 = arith.constant dense<0.000000e+00> : vector<18x8xf32>
    %101 = tpu.matmul %100, %98, %cst_37 {dimension_numbers = #tpu.dot_dimension_numbers<[1], [0], [0], [1], [0, 0, 1, 1], [], []>} : vector<18x18xf32>, vector<18x8xf32>, vector<18x8xf32> -> vector<18x8xf32>
    %c0_38 = arith.constant 0 : index
    %c16 = arith.constant 16 : index
    %102 = vector.load %arg20[%c0_38, %c16] : memref<18x32xf32, #tpu.memory_space<vmem>>, vector<18x8xf32>
    tpu.vector_store %arg20[%c0_38, %c16], %101 {strides = array<i32>} : memref<18x32xf32, #tpu.memory_space<vmem>>, vector<18x8xf32>,
    %103 = vector.extract_strided_slice %57 {offsets = [0, 88], sizes = [18, 8], strides = [1, 1]} : vector<18x96xf32> to vector<18x8xf32>
    %104 = vector.extract_strided_slice %87 {offsets = [3, 0, 0], sizes = [1, 18, 18], strides = [1, 1, 1]} : vector<4x18x18xf32> to vector<1x18x18xf32>
    %105 = vector.shape_cast %104 : vector<1x18x18xf32> to vector<18x18xf32>
    %cst_39 = arith.constant dense<0.000000e+00> : vector<18x8xf32>
    %106 = tpu.matmul %105, %103, %cst_39 {dimension_numbers = #tpu.dot_dimension_numbers<[1], [0], [0], [1], [0, 0, 1, 1], [], []>} : vector<18x18xf32>, vector<18x8xf32>, vector<18x8xf32> -> vector<18x8xf32>
    %c0_40 = arith.constant 0 : index
    %c24 = arith.constant 24 : index
    %107 = vector.load %arg20[%c0_40, %c24] : memref<18x32xf32, #tpu.memory_space<vmem>>, vector<18x8xf32>
    tpu.vector_store %arg20[%c0_40, %c24], %106 {strides = array<i32>} : memref<18x32xf32, #tpu.memory_space<vmem>>, vector<18x8xf32>,
    %c0_41 = arith.constant 0 : index
    %c0_42 = arith.constant 0 : index
    %108 = vector.load %arg20[%c0_41, %c0_42] : memref<18x32xf32, #tpu.memory_space<vmem>>, vector<18x32xf32>
    %c0_43 = arith.constant 0 : index
    %c0_44 = arith.constant 0 : index
    %c0_45 = arith.constant 0 : index
    %109 = vector.load %arg7[%c0_43, %c0_44, %c0_45] : memref<2x32x32xf32, #tpu.memory_space<vmem>>, vector<1x32x32xf32>
    %110 = vector.shape_cast %109 : vector<1x32x32xf32> to vector<32x32xf32>
    %cst_46 = arith.constant dense<0.000000e+00> : vector<18x32xf32>
    %111 = tpu.matmul %108, %110, %cst_46 {dimension_numbers = #tpu.dot_dimension_numbers<[1], [0], [0], [1], [0, 0, 1, 1], [], []>} : vector<18x32xf32>, vector<32x32xf32>, vector<18x32xf32> -> vector<18x32xf32>
    %c0_47 = arith.constant 0 : index
    %c0_48 = arith.constant 0 : index
    %c0_49 = arith.constant 0 : index
    %112 = vector.load %arg8[%c0_47, %c0_48, %c0_49] : memref<2x1x32xf32, #tpu.memory_space<vmem>>, vector<1x1x32xf32>
    %113 = vector.shape_cast %112 : vector<1x1x32xf32> to vector<1x32xf32>
    %114 = vector.broadcast %113 : vector<1x32xf32> to vector<18x32xf32>
    %115 = arith.addf %111, %114 : vector<18x32xf32>
    %116 = arith.addf %12, %115 : vector<18x32xf32>
    %c0_50 = arith.constant 0 : index
    %c0_51 = arith.constant 0 : index
    %c0_52 = arith.constant 0 : index
    %117 = vector.load %arg13[%c0_50, %c0_51, %c0_52] : memref<2x1x32xf32, #tpu.memory_space<vmem>>, vector<1x1x32xf32>
    %118 = vector.shape_cast %117 : vector<1x1x32xf32> to vector<1x32xf32>
    %c0_53 = arith.constant 0 : index
    %c0_54 = arith.constant 0 : index
    %c0_55 = arith.constant 0 : index
    %119 = vector.load %arg14[%c0_53, %c0_54, %c0_55] : memref<2x1x32xf32, #tpu.memory_space<vmem>>, vector<1x1x32xf32>
    %120 = vector.shape_cast %119 : vector<1x1x32xf32> to vector<1x32xf32>
    %cst_56 = arith.constant dense<0.000000e+00> : vector<18xf32>
    %121 = vector.multi_reduction <add>, %116, %cst_56 [1] : vector<18x32xf32> to vector<18xf32>
    %122 = vector.shape_cast %121 : vector<18xf32> to vector<18x1xf32>
    %cst_57 = arith.constant 3.200000e+01 : f32
    %123 = vector.broadcast %cst_57 : f32 to vector<18x1xf32>
    %124 = arith.divf %122, %123 : vector<18x1xf32>
    %125 = arith.mulf %116, %116 : vector<18x32xf32>
    %cst_58 = arith.constant dense<0.000000e+00> : vector<18xf32>
    %126 = vector.multi_reduction <add>, %125, %cst_58 [1] : vector<18x32xf32> to vector<18xf32>
    %127 = vector.shape_cast %126 : vector<18xf32> to vector<18x1xf32>
    %cst_59 = arith.constant 3.200000e+01 : f32
    %128 = vector.broadcast %cst_59 : f32 to vector<18x1xf32>
    %129 = arith.divf %127, %128 : vector<18x1xf32>
    %130 = arith.mulf %124, %124 : vector<18x1xf32>
    %131 = arith.subf %129, %130 : vector<18x1xf32>
    %cst_60 = arith.constant 0.000000e+00 : f32
    %132 = vector.broadcast %cst_60 : f32 to vector<18x1xf32>
    %133 = arith.maximumf %131, %132 : vector<18x1xf32>
    %134 = vector.broadcast %124 : vector<18x1xf32> to vector<18x32xf32>
    %135 = arith.subf %116, %134 : vector<18x32xf32>
    %cst_61 = arith.constant 9.99999974E-6 : f32
    %136 = vector.broadcast %cst_61 : f32 to vector<18x1xf32>
    %137 = arith.addf %133, %136 : vector<18x1xf32>
    %138 = math.rsqrt %137 : vector<18x1xf32>
    %139 = vector.broadcast %138 : vector<18x1xf32> to vector<18x32xf32>
    %140 = arith.mulf %135, %139 : vector<18x32xf32>
    %141 = vector.broadcast %118 : vector<1x32xf32> to vector<18x32xf32>
    %142 = arith.mulf %140, %141 : vector<18x32xf32>
    %143 = vector.broadcast %120 : vector<1x32xf32> to vector<18x32xf32>
    %144 = arith.addf %142, %143 : vector<18x32xf32>
    %c0_62 = arith.constant 0 : index
    %c0_63 = arith.constant 0 : index
    %c0_64 = arith.constant 0 : index
    %145 = vector.load %arg9[%c0_62, %c0_63, %c0_64] : memref<2x32x128xf32, #tpu.memory_space<vmem>>, vector<1x32x128xf32>
    %146 = vector.shape_cast %145 : vector<1x32x128xf32> to vector<32x128xf32>
    %cst_65 = arith.constant dense<0.000000e+00> : vector<18x128xf32>
    %147 = tpu.matmul %144, %146, %cst_65 {dimension_numbers = #tpu.dot_dimension_numbers<[1], [0], [0], [1], [0, 0, 1, 1], [], []>} : vector<18x32xf32>, vector<32x128xf32>, vector<18x128xf32> -> vector<18x128xf32>
    %c0_66 = arith.constant 0 : index
    %c0_67 = arith.constant 0 : index
    %c0_68 = arith.constant 0 : index
    %148 = vector.load %arg10[%c0_66, %c0_67, %c0_68] : memref<2x1x128xf32, #tpu.memory_space<vmem>>, vector<1x1x128xf32>
    %149 = vector.shape_cast %148 : vector<1x1x128xf32> to vector<1x128xf32>
    %150 = vector.broadcast %149 : vector<1x128xf32> to vector<18x128xf32>
    %151 = arith.addf %147, %150 : vector<18x128xf32>
    %cst_69 = arith.constant 0.000000e+00 : f32
    %152 = vector.broadcast %cst_69 : f32 to vector<18x128xf32>
    %153 = arith.maximumf %151, %152 : vector<18x128xf32>
    %c0_70 = arith.constant 0 : index
    %c0_71 = arith.constant 0 : index
    %c0_72 = arith.constant 0 : index
    %154 = vector.load %arg11[%c0_70, %c0_71, %c0_72] : memref<2x128x32xf32, #tpu.memory_space<vmem>>, vector<1x128x32xf32>
    %155 = vector.shape_cast %154 : vector<1x128x32xf32> to vector<128x32xf32>
    %cst_73 = arith.constant dense<0.000000e+00> : vector<18x32xf32>
    %156 = tpu.matmul %153, %155, %cst_73 {dimension_numbers = #tpu.dot_dimension_numbers<[1], [0], [0], [1], [0, 0, 1, 1], [], []>} : vector<18x128xf32>, vector<128x32xf32>, vector<18x32xf32> -> vector<18x32xf32>
    %c0_74 = arith.constant 0 : index
    %c0_75 = arith.constant 0 : index
    %c0_76 = arith.constant 0 : index
    %157 = vector.load %arg12[%c0_74, %c0_75, %c0_76] : memref<2x1x32xf32, #tpu.memory_space<vmem>>, vector<1x1x32xf32>
    %158 = vector.shape_cast %157 : vector<1x1x32xf32> to vector<1x32xf32>
    %159 = vector.broadcast %158 : vector<1x32xf32> to vector<18x32xf32>
    %160 = arith.addf %156, %159 : vector<18x32xf32>
    %161 = arith.addf %144, %160 : vector<18x32xf32>
    %c0_77 = arith.constant 0 : index
    %c0_78 = arith.constant 0 : index
    %c0_79 = arith.constant 0 : index
    %162 = vector.load %arg15[%c0_77, %c0_78, %c0_79] : memref<2x1x32xf32, #tpu.memory_space<vmem>>, vector<1x1x32xf32>
    %163 = vector.shape_cast %162 : vector<1x1x32xf32> to vector<1x32xf32>
    %c0_80 = arith.constant 0 : index
    %c0_81 = arith.constant 0 : index
    %c0_82 = arith.constant 0 : index
    %164 = vector.load %arg16[%c0_80, %c0_81, %c0_82] : memref<2x1x32xf32, #tpu.memory_space<vmem>>, vector<1x1x32xf32>
    %165 = vector.shape_cast %164 : vector<1x1x32xf32> to vector<1x32xf32>
    %cst_83 = arith.constant dense<0.000000e+00> : vector<18xf32>
    %166 = vector.multi_reduction <add>, %161, %cst_83 [1] : vector<18x32xf32> to vector<18xf32>
    %167 = vector.shape_cast %166 : vector<18xf32> to vector<18x1xf32>
    %cst_84 = arith.constant 3.200000e+01 : f32
    %168 = vector.broadcast %cst_84 : f32 to vector<18x1xf32>
    %169 = arith.divf %167, %168 : vector<18x1xf32>
    %170 = arith.mulf %161, %161 : vector<18x32xf32>
    %cst_85 = arith.constant dense<0.000000e+00> : vector<18xf32>
    %171 = vector.multi_reduction <add>, %170, %cst_85 [1] : vector<18x32xf32> to vector<18xf32>
    %172 = vector.shape_cast %171 : vector<18xf32> to vector<18x1xf32>
    %cst_86 = arith.constant 3.200000e+01 : f32
    %173 = vector.broadcast %cst_86 : f32 to vector<18x1xf32>
    %174 = arith.divf %172, %173 : vector<18x1xf32>
    %175 = arith.mulf %169, %169 : vector<18x1xf32>
    %176 = arith.subf %174, %175 : vector<18x1xf32>
    %cst_87 = arith.constant 0.000000e+00 : f32
    %177 = vector.broadcast %cst_87 : f32 to vector<18x1xf32>
    %178 = arith.maximumf %176, %177 : vector<18x1xf32>
    %179 = vector.broadcast %169 : vector<18x1xf32> to vector<18x32xf32>
    %180 = arith.subf %161, %179 : vector<18x32xf32>
    %cst_88 = arith.constant 9.99999974E-6 : f32
    %181 = vector.broadcast %cst_88 : f32 to vector<18x1xf32>
    %182 = arith.addf %178, %181 : vector<18x1xf32>
    %183 = math.rsqrt %182 : vector<18x1xf32>
    %184 = vector.broadcast %183 : vector<18x1xf32> to vector<18x32xf32>
    %185 = arith.mulf %180, %184 : vector<18x32xf32>
    %186 = vector.broadcast %163 : vector<1x32xf32> to vector<18x32xf32>
    %187 = arith.mulf %185, %186 : vector<18x32xf32>
    %188 = vector.broadcast %165 : vector<1x32xf32> to vector<18x32xf32>
    %189 = arith.addf %187, %188 : vector<18x32xf32>
    %c1 = arith.constant 1 : index
    %c0_89 = arith.constant 0 : index
    %c0_90 = arith.constant 0 : index
    %190 = vector.load %arg5[%c1, %c0_89, %c0_90] : memref<2x32x96xf32, #tpu.memory_space<vmem>>, vector<1x32x96xf32>
    %191 = vector.shape_cast %190 : vector<1x32x96xf32> to vector<32x96xf32>
    %cst_91 = arith.constant dense<0.000000e+00> : vector<18x96xf32>
    %192 = tpu.matmul %189, %191, %cst_91 {dimension_numbers = #tpu.dot_dimension_numbers<[1], [0], [0], [1], [0, 0, 1, 1], [], []>} : vector<18x32xf32>, vector<32x96xf32>, vector<18x96xf32> -> vector<18x96xf32>
    %c1_92 = arith.constant 1 : index
    %c0_93 = arith.constant 0 : index
    %c0_94 = arith.constant 0 : index
    %193 = vector.load %arg6[%c1_92, %c0_93, %c0_94] : memref<2x1x96xf32, #tpu.memory_space<vmem>>, vector<1x1x96xf32>
    %194 = vector.shape_cast %193 : vector<1x1x96xf32> to vector<1x96xf32>
    %195 = vector.broadcast %194 : vector<1x96xf32> to vector<18x96xf32>
    %196 = arith.addf %192, %195 : vector<18x96xf32>
    %197 = vector.extract_strided_slice %196 {offsets = [0, 0], sizes = [18, 8], strides = [1, 1]} : vector<18x96xf32> to vector<18x8xf32>
    %198 = vector.extract_strided_slice %196 {offsets = [0, 32], sizes = [18, 8], strides = [1, 1]} : vector<18x96xf32> to vector<18x8xf32>
    %cst_95 = arith.constant dense<0.000000e+00> : vector<18x18xf32>
    %199 = tpu.matmul %197, %198, %cst_95 {dimension_numbers = #tpu.dot_dimension_numbers<[1], [1], [0], [0], [0, 0, 1, 0], [], []>} : vector<18x8xf32>, vector<18x8xf32>, vector<18x18xf32> -> vector<18x18xf32>
    %200 = vector.extract_strided_slice %196 {offsets = [0, 8], sizes = [18, 8], strides = [1, 1]} : vector<18x96xf32> to vector<18x8xf32>
    %201 = vector.extract_strided_slice %196 {offsets = [0, 40], sizes = [18, 8], strides = [1, 1]} : vector<18x96xf32> to vector<18x8xf32>
    %cst_96 = arith.constant dense<0.000000e+00> : vector<18x18xf32>
    %202 = tpu.matmul %200, %201, %cst_96 {dimension_numbers = #tpu.dot_dimension_numbers<[1], [1], [0], [0], [0, 0, 1, 0], [], []>} : vector<18x8xf32>, vector<18x8xf32>, vector<18x18xf32> -> vector<18x18xf32>
    %203 = vector.extract_strided_slice %196 {offsets = [0, 16], sizes = [18, 8], strides = [1, 1]} : vector<18x96xf32> to vector<18x8xf32>
    %204 = vector.extract_strided_slice %196 {offsets = [0, 48], sizes = [18, 8], strides = [1, 1]} : vector<18x96xf32> to vector<18x8xf32>
    %cst_97 = arith.constant dense<0.000000e+00> : vector<18x18xf32>
    %205 = tpu.matmul %203, %204, %cst_97 {dimension_numbers = #tpu.dot_dimension_numbers<[1], [1], [0], [0], [0, 0, 1, 0], [], []>} : vector<18x8xf32>, vector<18x8xf32>, vector<18x18xf32> -> vector<18x18xf32>
    %206 = vector.extract_strided_slice %196 {offsets = [0, 24], sizes = [18, 8], strides = [1, 1]} : vector<18x96xf32> to vector<18x8xf32>
    %207 = vector.extract_strided_slice %196 {offsets = [0, 56], sizes = [18, 8], strides = [1, 1]} : vector<18x96xf32> to vector<18x8xf32>
    %cst_98 = arith.constant dense<0.000000e+00> : vector<18x18xf32>
    %208 = tpu.matmul %206, %207, %cst_98 {dimension_numbers = #tpu.dot_dimension_numbers<[1], [1], [0], [0], [0, 0, 1, 0], [], []>} : vector<18x8xf32>, vector<18x8xf32>, vector<18x18xf32> -> vector<18x18xf32>
    %209 = vector.shape_cast %199 : vector<18x18xf32> to vector<1x18x18xf32>
    %210 = vector.shape_cast %202 : vector<18x18xf32> to vector<1x18x18xf32>
    %211 = vector.shape_cast %205 : vector<18x18xf32> to vector<1x18x18xf32>
    %212 = vector.shape_cast %208 : vector<18x18xf32> to vector<1x18x18xf32>
    %213 = tpu.concatenate %209, %210, %211, %212 in 0 : vector<1x18x18xf32>, vector<1x18x18xf32>, vector<1x18x18xf32>, vector<1x18x18xf32> -> vector<4x18x18xf32>
    %214 = vector.shape_cast %50 : vector<18x18xf32> to vector<1x18x18xf32>
    %215 = vector.broadcast %214 : vector<1x18x18xf32> to vector<4x18x18xf32>
    %216 = arith.addf %213, %215 : vector<4x18x18xf32>
    %cst_99 = arith.constant dense<0xFF800000> : vector<4x18xf32>
    %217 = vector.multi_reduction <maximumf>, %216, %cst_99 [2] : vector<4x18x18xf32> to vector<4x18xf32>
    %218 = vector.shape_cast %217 : vector<4x18xf32> to vector<4x18x1xf32>
    %219 = vector.broadcast %218 : vector<4x18x1xf32> to vector<4x18x18xf32>
    %220 = arith.subf %216, %219 : vector<4x18x18xf32>
    %221 = math.exp %220 : vector<4x18x18xf32>
    %cst_100 = arith.constant dense<0.000000e+00> : vector<4x18xf32>
    %222 = vector.multi_reduction <add>, %221, %cst_100 [2] : vector<4x18x18xf32> to vector<4x18xf32>
    %223 = vector.shape_cast %222 : vector<4x18xf32> to vector<4x18x1xf32>
    %224 = tpu.reciprocal %223 {approx = true} : vector<4x18x1xf32> -> vector<4x18x1xf32>
    %225 = vector.broadcast %224 : vector<4x18x1xf32> to vector<4x18x18xf32>
    %226 = arith.mulf %221, %225 : vector<4x18x18xf32>
    %227 = vector.extract_strided_slice %196 {offsets = [0, 64], sizes = [18, 8], strides = [1, 1]} : vector<18x96xf32> to vector<18x8xf32>
    %228 = vector.extract_strided_slice %226 {offsets = [0, 0, 0], sizes = [1, 18, 18], strides = [1, 1, 1]} : vector<4x18x18xf32> to vector<1x18x18xf32>
    %229 = vector.shape_cast %228 : vector<1x18x18xf32> to vector<18x18xf32>
    %cst_101 = arith.constant dense<0.000000e+00> : vector<18x8xf32>
    %230 = tpu.matmul %229, %227, %cst_101 {dimension_numbers = #tpu.dot_dimension_numbers<[1], [0], [0], [1], [0, 0, 1, 1], [], []>} : vector<18x18xf32>, vector<18x8xf32>, vector<18x8xf32> -> vector<18x8xf32>
    %c0_102 = arith.constant 0 : index
    %c0_103 = arith.constant 0 : index
    %231 = vector.load %arg20[%c0_102, %c0_103] : memref<18x32xf32, #tpu.memory_space<vmem>>, vector<18x8xf32>
    tpu.vector_store %arg20[%c0_102, %c0_103], %230 {strides = array<i32>} : memref<18x32xf32, #tpu.memory_space<vmem>>, vector<18x8xf32>,
    %232 = vector.extract_strided_slice %196 {offsets = [0, 72], sizes = [18, 8], strides = [1, 1]} : vector<18x96xf32> to vector<18x8xf32>
    %233 = vector.extract_strided_slice %226 {offsets = [1, 0, 0], sizes = [1, 18, 18], strides = [1, 1, 1]} : vector<4x18x18xf32> to vector<1x18x18xf32>
    %234 = vector.shape_cast %233 : vector<1x18x18xf32> to vector<18x18xf32>
    %cst_104 = arith.constant dense<0.000000e+00> : vector<18x8xf32>
    %235 = tpu.matmul %234, %232, %cst_104 {dimension_numbers = #tpu.dot_dimension_numbers<[1], [0], [0], [1], [0, 0, 1, 1], [], []>} : vector<18x18xf32>, vector<18x8xf32>, vector<18x8xf32> -> vector<18x8xf32>
    %c0_105 = arith.constant 0 : index
    %c8_106 = arith.constant 8 : index
    %236 = vector.load %arg20[%c0_105, %c8_106] : memref<18x32xf32, #tpu.memory_space<vmem>>, vector<18x8xf32>
    tpu.vector_store %arg20[%c0_105, %c8_106], %235 {strides = array<i32>} : memref<18x32xf32, #tpu.memory_space<vmem>>, vector<18x8xf32>,
    %237 = vector.extract_strided_slice %196 {offsets = [0, 80], sizes = [18, 8], strides = [1, 1]} : vector<18x96xf32> to vector<18x8xf32>
    %238 = vector.extract_strided_slice %226 {offsets = [2, 0, 0], sizes = [1, 18, 18], strides = [1, 1, 1]} : vector<4x18x18xf32> to vector<1x18x18xf32>
    %239 = vector.shape_cast %238 : vector<1x18x18xf32> to vector<18x18xf32>
    %cst_107 = arith.constant dense<0.000000e+00> : vector<18x8xf32>
    %240 = tpu.matmul %239, %237, %cst_107 {dimension_numbers = #tpu.dot_dimension_numbers<[1], [0], [0], [1], [0, 0, 1, 1], [], []>} : vector<18x18xf32>, vector<18x8xf32>, vector<18x8xf32> -> vector<18x8xf32>
    %c0_108 = arith.constant 0 : index
    %c16_109 = arith.constant 16 : index
    %241 = vector.load %arg20[%c0_108, %c16_109] : memref<18x32xf32, #tpu.memory_space<vmem>>, vector<18x8xf32>
    tpu.vector_store %arg20[%c0_108, %c16_109], %240 {strides = array<i32>} : memref<18x32xf32, #tpu.memory_space<vmem>>, vector<18x8xf32>,
    %242 = vector.extract_strided_slice %196 {offsets = [0, 88], sizes = [18, 8], strides = [1, 1]} : vector<18x96xf32> to vector<18x8xf32>
    %243 = vector.extract_strided_slice %226 {offsets = [3, 0, 0], sizes = [1, 18, 18], strides = [1, 1, 1]} : vector<4x18x18xf32> to vector<1x18x18xf32>
    %244 = vector.shape_cast %243 : vector<1x18x18xf32> to vector<18x18xf32>
    %cst_110 = arith.constant dense<0.000000e+00> : vector<18x8xf32>
    %245 = tpu.matmul %244, %242, %cst_110 {dimension_numbers = #tpu.dot_dimension_numbers<[1], [0], [0], [1], [0, 0, 1, 1], [], []>} : vector<18x18xf32>, vector<18x8xf32>, vector<18x8xf32> -> vector<18x8xf32>
    %c0_111 = arith.constant 0 : index
    %c24_112 = arith.constant 24 : index
    %246 = vector.load %arg20[%c0_111, %c24_112] : memref<18x32xf32, #tpu.memory_space<vmem>>, vector<18x8xf32>
    tpu.vector_store %arg20[%c0_111, %c24_112], %245 {strides = array<i32>} : memref<18x32xf32, #tpu.memory_space<vmem>>, vector<18x8xf32>,
    %c0_113 = arith.constant 0 : index
    %c0_114 = arith.constant 0 : index
    %247 = vector.load %arg20[%c0_113, %c0_114] : memref<18x32xf32, #tpu.memory_space<vmem>>, vector<18x32xf32>
    %c1_115 = arith.constant 1 : index
    %c0_116 = arith.constant 0 : index
    %c0_117 = arith.constant 0 : index
    %248 = vector.load %arg7[%c1_115, %c0_116, %c0_117] : memref<2x32x32xf32, #tpu.memory_space<vmem>>, vector<1x32x32xf32>
    %249 = vector.shape_cast %248 : vector<1x32x32xf32> to vector<32x32xf32>
    %cst_118 = arith.constant dense<0.000000e+00> : vector<18x32xf32>
    %250 = tpu.matmul %247, %249, %cst_118 {dimension_numbers = #tpu.dot_dimension_numbers<[1], [0], [0], [1], [0, 0, 1, 1], [], []>} : vector<18x32xf32>, vector<32x32xf32>, vector<18x32xf32> -> vector<18x32xf32>
    %c1_119 = arith.constant 1 : index
    %c0_120 = arith.constant 0 : index
    %c0_121 = arith.constant 0 : index
    %251 = vector.load %arg8[%c1_119, %c0_120, %c0_121] : memref<2x1x32xf32, #tpu.memory_space<vmem>>, vector<1x1x32xf32>
    %252 = vector.shape_cast %251 : vector<1x1x32xf32> to vector<1x32xf32>
    %253 = vector.broadcast %252 : vector<1x32xf32> to vector<18x32xf32>
    %254 = arith.addf %250, %253 : vector<18x32xf32>
    %255 = arith.addf %189, %254 : vector<18x32xf32>
    %c1_122 = arith.constant 1 : index
    %c0_123 = arith.constant 0 : index
    %c0_124 = arith.constant 0 : index
    %256 = vector.load %arg13[%c1_122, %c0_123, %c0_124] : memref<2x1x32xf32, #tpu.memory_space<vmem>>, vector<1x1x32xf32>
    %257 = vector.shape_cast %256 : vector<1x1x32xf32> to vector<1x32xf32>
    %c1_125 = arith.constant 1 : index
    %c0_126 = arith.constant 0 : index
    %c0_127 = arith.constant 0 : index
    %258 = vector.load %arg14[%c1_125, %c0_126, %c0_127] : memref<2x1x32xf32, #tpu.memory_space<vmem>>, vector<1x1x32xf32>
    %259 = vector.shape_cast %258 : vector<1x1x32xf32> to vector<1x32xf32>
    %cst_128 = arith.constant dense<0.000000e+00> : vector<18xf32>
    %260 = vector.multi_reduction <add>, %255, %cst_128 [1] : vector<18x32xf32> to vector<18xf32>
    %261 = vector.shape_cast %260 : vector<18xf32> to vector<18x1xf32>
    %cst_129 = arith.constant 3.200000e+01 : f32
    %262 = vector.broadcast %cst_129 : f32 to vector<18x1xf32>
    %263 = arith.divf %261, %262 : vector<18x1xf32>
    %264 = arith.mulf %255, %255 : vector<18x32xf32>
    %cst_130 = arith.constant dense<0.000000e+00> : vector<18xf32>
    %265 = vector.multi_reduction <add>, %264, %cst_130 [1] : vector<18x32xf32> to vector<18xf32>
    %266 = vector.shape_cast %265 : vector<18xf32> to vector<18x1xf32>
    %cst_131 = arith.constant 3.200000e+01 : f32
    %267 = vector.broadcast %cst_131 : f32 to vector<18x1xf32>
    %268 = arith.divf %266, %267 : vector<18x1xf32>
    %269 = arith.mulf %263, %263 : vector<18x1xf32>
    %270 = arith.subf %268, %269 : vector<18x1xf32>
    %cst_132 = arith.constant 0.000000e+00 : f32
    %271 = vector.broadcast %cst_132 : f32 to vector<18x1xf32>
    %272 = arith.maximumf %270, %271 : vector<18x1xf32>
    %273 = vector.broadcast %263 : vector<18x1xf32> to vector<18x32xf32>
    %274 = arith.subf %255, %273 : vector<18x32xf32>
    %cst_133 = arith.constant 9.99999974E-6 : f32
    %275 = vector.broadcast %cst_133 : f32 to vector<18x1xf32>
    %276 = arith.addf %272, %275 : vector<18x1xf32>
    %277 = math.rsqrt %276 : vector<18x1xf32>
    %278 = vector.broadcast %277 : vector<18x1xf32> to vector<18x32xf32>
    %279 = arith.mulf %274, %278 : vector<18x32xf32>
    %280 = vector.broadcast %257 : vector<1x32xf32> to vector<18x32xf32>
    %281 = arith.mulf %279, %280 : vector<18x32xf32>
    %282 = vector.broadcast %259 : vector<1x32xf32> to vector<18x32xf32>
    %283 = arith.addf %281, %282 : vector<18x32xf32>
    %c1_134 = arith.constant 1 : index
    %c0_135 = arith.constant 0 : index
    %c0_136 = arith.constant 0 : index
    %284 = vector.load %arg9[%c1_134, %c0_135, %c0_136] : memref<2x32x128xf32, #tpu.memory_space<vmem>>, vector<1x32x128xf32>
    %285 = vector.shape_cast %284 : vector<1x32x128xf32> to vector<32x128xf32>
    %cst_137 = arith.constant dense<0.000000e+00> : vector<18x128xf32>
    %286 = tpu.matmul %283, %285, %cst_137 {dimension_numbers = #tpu.dot_dimension_numbers<[1], [0], [0], [1], [0, 0, 1, 1], [], []>} : vector<18x32xf32>, vector<32x128xf32>, vector<18x128xf32> -> vector<18x128xf32>
    %c1_138 = arith.constant 1 : index
    %c0_139 = arith.constant 0 : index
    %c0_140 = arith.constant 0 : index
    %287 = vector.load %arg10[%c1_138, %c0_139, %c0_140] : memref<2x1x128xf32, #tpu.memory_space<vmem>>, vector<1x1x128xf32>
    %288 = vector.shape_cast %287 : vector<1x1x128xf32> to vector<1x128xf32>
    %289 = vector.broadcast %288 : vector<1x128xf32> to vector<18x128xf32>
    %290 = arith.addf %286, %289 : vector<18x128xf32>
    %cst_141 = arith.constant 0.000000e+00 : f32
    %291 = vector.broadcast %cst_141 : f32 to vector<18x128xf32>
    %292 = arith.maximumf %290, %291 : vector<18x128xf32>
    %c1_142 = arith.constant 1 : index
    %c0_143 = arith.constant 0 : index
    %c0_144 = arith.constant 0 : index
    %293 = vector.load %arg11[%c1_142, %c0_143, %c0_144] : memref<2x128x32xf32, #tpu.memory_space<vmem>>, vector<1x128x32xf32>
    %294 = vector.shape_cast %293 : vector<1x128x32xf32> to vector<128x32xf32>
    %cst_145 = arith.constant dense<0.000000e+00> : vector<18x32xf32>
    %295 = tpu.matmul %292, %294, %cst_145 {dimension_numbers = #tpu.dot_dimension_numbers<[1], [0], [0], [1], [0, 0, 1, 1], [], []>} : vector<18x128xf32>, vector<128x32xf32>, vector<18x32xf32> -> vector<18x32xf32>
    %c1_146 = arith.constant 1 : index
    %c0_147 = arith.constant 0 : index
    %c0_148 = arith.constant 0 : index
    %296 = vector.load %arg12[%c1_146, %c0_147, %c0_148] : memref<2x1x32xf32, #tpu.memory_space<vmem>>, vector<1x1x32xf32>
    %297 = vector.shape_cast %296 : vector<1x1x32xf32> to vector<1x32xf32>
    %298 = vector.broadcast %297 : vector<1x32xf32> to vector<18x32xf32>
    %299 = arith.addf %295, %298 : vector<18x32xf32>
    %300 = arith.addf %283, %299 : vector<18x32xf32>
    %c1_149 = arith.constant 1 : index
    %c0_150 = arith.constant 0 : index
    %c0_151 = arith.constant 0 : index
    %301 = vector.load %arg15[%c1_149, %c0_150, %c0_151] : memref<2x1x32xf32, #tpu.memory_space<vmem>>, vector<1x1x32xf32>
    %302 = vector.shape_cast %301 : vector<1x1x32xf32> to vector<1x32xf32>
    %c1_152 = arith.constant 1 : index
    %c0_153 = arith.constant 0 : index
    %c0_154 = arith.constant 0 : index
    %303 = vector.load %arg16[%c1_152, %c0_153, %c0_154] : memref<2x1x32xf32, #tpu.memory_space<vmem>>, vector<1x1x32xf32>
    %304 = vector.shape_cast %303 : vector<1x1x32xf32> to vector<1x32xf32>
    %cst_155 = arith.constant dense<0.000000e+00> : vector<18xf32>
    %305 = vector.multi_reduction <add>, %300, %cst_155 [1] : vector<18x32xf32> to vector<18xf32>
    %306 = vector.shape_cast %305 : vector<18xf32> to vector<18x1xf32>
    %cst_156 = arith.constant 3.200000e+01 : f32
    %307 = vector.broadcast %cst_156 : f32 to vector<18x1xf32>
    %308 = arith.divf %306, %307 : vector<18x1xf32>
    %309 = arith.mulf %300, %300 : vector<18x32xf32>
    %cst_157 = arith.constant dense<0.000000e+00> : vector<18xf32>
    %310 = vector.multi_reduction <add>, %309, %cst_157 [1] : vector<18x32xf32> to vector<18xf32>
    %311 = vector.shape_cast %310 : vector<18xf32> to vector<18x1xf32>
    %cst_158 = arith.constant 3.200000e+01 : f32
    %312 = vector.broadcast %cst_158 : f32 to vector<18x1xf32>
    %313 = arith.divf %311, %312 : vector<18x1xf32>
    %314 = arith.mulf %308, %308 : vector<18x1xf32>
    %315 = arith.subf %313, %314 : vector<18x1xf32>
    %cst_159 = arith.constant 0.000000e+00 : f32
    %316 = vector.broadcast %cst_159 : f32 to vector<18x1xf32>
    %317 = arith.maximumf %315, %316 : vector<18x1xf32>
    %318 = vector.broadcast %308 : vector<18x1xf32> to vector<18x32xf32>
    %319 = arith.subf %300, %318 : vector<18x32xf32>
    %cst_160 = arith.constant 9.99999974E-6 : f32
    %320 = vector.broadcast %cst_160 : f32 to vector<18x1xf32>
    %321 = arith.addf %317, %320 : vector<18x1xf32>
    %322 = math.rsqrt %321 : vector<18x1xf32>
    %323 = vector.broadcast %322 : vector<18x1xf32> to vector<18x32xf32>
    %324 = arith.mulf %319, %323 : vector<18x32xf32>
    %325 = vector.broadcast %302 : vector<1x32xf32> to vector<18x32xf32>
    %326 = arith.mulf %324, %325 : vector<18x32xf32>
    %327 = vector.broadcast %304 : vector<1x32xf32> to vector<18x32xf32>
    %328 = arith.addf %326, %327 : vector<18x32xf32>
    %329 = vector.extract_strided_slice %328 {offsets = [0, 0], sizes = [2, 32], strides = [1, 1]} : vector<18x32xf32> to vector<2x32xf32>
    %c0_161 = arith.constant 0 : index
    %c0_162 = arith.constant 0 : index
    %330 = vector.load %arg17[%c0_161, %c0_162] : memref<32x8xf32, #tpu.memory_space<vmem>>, vector<32x8xf32>
    %cst_163 = arith.constant dense<0.000000e+00> : vector<2x8xf32>
    %331 = tpu.matmul %329, %330, %cst_163 {dimension_numbers = #tpu.dot_dimension_numbers<[1], [0], [0], [1], [0, 0, 1, 1], [], []>} : vector<2x32xf32>, vector<32x8xf32>, vector<2x8xf32> -> vector<2x8xf32>
    %c0_164 = arith.constant 0 : index
    %c0_165 = arith.constant 0 : index
    %332 = vector.load %arg18[%c0_164, %c0_165] : memref<1x8xf32, #tpu.memory_space<vmem>>, vector<1x8xf32>
    %333 = vector.broadcast %332 : vector<1x8xf32> to vector<2x8xf32>
    %334 = arith.addf %331, %333 : vector<2x8xf32>
    %c0_166 = arith.constant 0 : index
    %c0_167 = arith.constant 0 : index
    %335 = vector.load %arg19[%c0_166, %c0_167] : memref<2x8xf32, #tpu.memory_space<vmem>>, vector<2x8xf32>
    tpu.vector_store %arg19[%c0_166, %c0_167], %334 {strides = array<i32>} : memref<2x8xf32, #tpu.memory_space<vmem>>, vector<2x8xf32>,
    return
  }
  func.func @transform_0(%arg0: i32) -> (i32, i32) {
    %c0_i32 = arith.constant 0 : i32
    %c0_i32_0 = arith.constant 0 : i32
    %c0_i32_1 = arith.constant 0 : i32
    return %c0_i32, %c0_i32_0 : i32, i32
  }
  func.func @transform_1(%arg0: i32) -> (i32, i32) {
    %c0_i32 = arith.constant 0 : i32
    %c0_i32_0 = arith.constant 0 : i32
    %c0_i32_1 = arith.constant 0 : i32
    return %c0_i32, %c0_i32_0 : i32, i32
  }
  func.func @transform_2(%arg0: i32) -> (i32, i32) {
    %c0_i32 = arith.constant 0 : i32
    %c0_i32_0 = arith.constant 0 : i32
    %c0_i32_1 = arith.constant 0 : i32
    return %c0_i32, %c0_i32_0 : i32, i32
  }
  func.func @transform_3(%arg0: i32) -> (i32, i32) {
    %c0_i32 = arith.constant 0 : i32
    %c0_i32_0 = arith.constant 0 : i32
    %c0_i32_1 = arith.constant 0 : i32
    return %c0_i32, %c0_i32_0 : i32, i32
  }
  func.func @transform_4(%arg0: i32) -> (i32, i32, i32) {
    %c0_i32 = arith.constant 0 : i32
    %c0_i32_0 = arith.constant 0 : i32
    %c0_i32_1 = arith.constant 0 : i32
    %c0_i32_2 = arith.constant 0 : i32
    return %c0_i32, %c0_i32_0, %c0_i32_1 : i32, i32, i32
  }
  func.func @transform_5(%arg0: i32) -> (i32, i32, i32) {
    %c0_i32 = arith.constant 0 : i32
    %c0_i32_0 = arith.constant 0 : i32
    %c0_i32_1 = arith.constant 0 : i32
    %c0_i32_2 = arith.constant 0 : i32
    return %c0_i32, %c0_i32_0, %c0_i32_1 : i32, i32, i32
  }
  func.func @transform_6(%arg0: i32) -> (i32, i32, i32) {
    %c0_i32 = arith.constant 0 : i32
    %c0_i32_0 = arith.constant 0 : i32
    %c0_i32_1 = arith.constant 0 : i32
    %c0_i32_2 = arith.constant 0 : i32
    return %c0_i32, %c0_i32_0, %c0_i32_1 : i32, i32, i32
  }
  func.func @transform_7(%arg0: i32) -> (i32, i32, i32) {
    %c0_i32 = arith.constant 0 : i32
    %c0_i32_0 = arith.constant 0 : i32
    %c0_i32_1 = arith.constant 0 : i32
    %c0_i32_2 = arith.constant 0 : i32
    return %c0_i32, %c0_i32_0, %c0_i32_1 : i32, i32, i32
  }
  func.func @transform_8(%arg0: i32) -> (i32, i32, i32) {
    %c0_i32 = arith.constant 0 : i32
    %c0_i32_0 = arith.constant 0 : i32
    %c0_i32_1 = arith.constant 0 : i32
    %c0_i32_2 = arith.constant 0 : i32
    return %c0_i32, %c0_i32_0, %c0_i32_1 : i32, i32, i32
  }
  func.func @transform_9(%arg0: i32) -> (i32, i32, i32) {
    %c0_i32 = arith.constant 0 : i32
    %c0_i32_0 = arith.constant 0 : i32
    %c0_i32_1 = arith.constant 0 : i32
    %c0_i32_2 = arith.constant 0 : i32
    return %c0_i32, %c0_i32_0, %c0_i32_1 : i32, i32, i32
  }
  func.func @transform_10(%arg0: i32) -> (i32, i32, i32) {
    %c0_i32 = arith.constant 0 : i32
    %c0_i32_0 = arith.constant 0 : i32
    %c0_i32_1 = arith.constant 0 : i32
    %c0_i32_2 = arith.constant 0 : i32
    return %c0_i32, %c0_i32_0, %c0_i32_1 : i32, i32, i32
  }
  func.func @transform_11(%arg0: i32) -> (i32, i32, i32) {
    %c0_i32 = arith.constant 0 : i32
    %c0_i32_0 = arith.constant 0 : i32
    %c0_i32_1 = arith.constant 0 : i32
    %c0_i32_2 = arith.constant 0 : i32
    return %c0_i32, %c0_i32_0, %c0_i32_1 : i32, i32, i32
  }
  func.func @transform_12(%arg0: i32) -> (i32, i32, i32) {
    %c0_i32 = arith.constant 0 : i32
    %c0_i32_0 = arith.constant 0 : i32
    %c0_i32_1 = arith.constant 0 : i32
    %c0_i32_2 = arith.constant 0 : i32
    return %c0_i32, %c0_i32_0, %c0_i32_1 : i32, i32, i32
  }
  func.func @transform_13(%arg0: i32) -> (i32, i32, i32) {
    %c0_i32 = arith.constant 0 : i32
    %c0_i32_0 = arith.constant 0 : i32
    %c0_i32_1 = arith.constant 0 : i32
    %c0_i32_2 = arith.constant 0 : i32
    return %c0_i32, %c0_i32_0, %c0_i32_1 : i32, i32, i32
  }
  func.func @transform_14(%arg0: i32) -> (i32, i32, i32) {
    %c0_i32 = arith.constant 0 : i32
    %c0_i32_0 = arith.constant 0 : i32
    %c0_i32_1 = arith.constant 0 : i32
    %c0_i32_2 = arith.constant 0 : i32
    return %c0_i32, %c0_i32_0, %c0_i32_1 : i32, i32, i32
  }
  func.func @transform_15(%arg0: i32) -> (i32, i32, i32) {
    %c0_i32 = arith.constant 0 : i32
    %c0_i32_0 = arith.constant 0 : i32
    %c0_i32_1 = arith.constant 0 : i32
    %c0_i32_2 = arith.constant 0 : i32
    return %c0_i32, %c0_i32_0, %c0_i32_1 : i32, i32, i32
  }
  func.func @transform_16(%arg0: i32) -> (i32, i32) {
    %c0_i32 = arith.constant 0 : i32
    %c0_i32_0 = arith.constant 0 : i32
    %c0_i32_1 = arith.constant 0 : i32
    return %c0_i32, %c0_i32_0 : i32, i32
  }
  func.func @transform_17(%arg0: i32) -> (i32, i32) {
    %c0_i32 = arith.constant 0 : i32
    %c0_i32_0 = arith.constant 0 : i32
    %c0_i32_1 = arith.constant 0 : i32
    return %c0_i32, %c0_i32_0 : i32, i32
  }
  func.func @transform_18(%arg0: i32) -> (i32, i32) {
    %c0_i32 = arith.constant 0 : i32
    %c0_i32_0 = arith.constant 0 : i32
    %c0_i32_1 = arith.constant 0 : i32
    return %c0_i32, %c0_i32_0 : i32, i32
  }
}

</mosaic_0001>

<bundles_post_ra>
// kernel: in_context_model_forward.1
= control target key start
LH: loop header
LB: loop body
LE: loop exit
PB: predicated region body
PF: predicated region fallthrough
CT: control target
= control target key end

     0   :  { %s5775_s0 = inlined_call_operand.vmem [shape: f32[18,3], index: 0, kind: input, shape index: {}]   ;;  %s5776_s1 = inlined_call_operand.vmem [shape: f32[3,32], index: 1, kind: input, shape index: {}]   ;;  %s5777_s2 = inlined_call_operand.vmem [shape: f32[1,32], index: 2, kind: input, shape index: {}]   ;;  %s5778_s3 = inlined_call_operand.vmem [shape: f32[1,32], index: 3, kind: input, shape index: {}]   ;;  %s5779_s4 = inlined_call_operand.vmem [shape: f32[2,32,96], index: 4, kind: input, shape index: {}]   ;;  %s5780_s5 = inlined_call_operand.vmem [shape: f32[2,1,96], index: 5, kind: input, shape index: {}]   ;;  %s5781_s6 = inlined_call_operand.vmem [shape: f32[2,32,32], index: 6, kind: input, shape index: {}]   ;;  %s5782_s7 = inlined_call_operand.vmem [shape: f32[2,1,32], index: 7, kind: input, shape index: {}]   ;;  %s5783_s8 = inlined_call_operand.vmem [shape: f32[2,32,128], index: 8, kind: input, shape index: {}]   ;;  %s5784_s9 = inlined_call_operand.vmem [shape: f32[2,1,128], index: 9, kind: input, shape index: {}]   ;;  %s5785_s10 = inlined_call_operand.vmem [shape: f32[2,128,32], index: 10, kind: input, shape index: {}]   ;;  %s5786_s11 = inlined_call_operand.vmem [shape: f32[2,1,32], index: 11, kind: input, shape index: {}]   ;;  %s5787_s12 = inlined_call_operand.vmem [shape: f32[2,1,32], index: 12, kind: input, shape index: {}]   ;;  %s5788_s13 = inlined_call_operand.vmem [shape: f32[2,1,32], index: 13, kind: input, shape index: {}]   ;;  %s5789_s14 = inlined_call_operand.vmem [shape: f32[2,1,32], index: 14, kind: input, shape index: {}]   ;;  %s5790_s15 = inlined_call_operand.vmem [shape: f32[2,1,32], index: 15, kind: input, shape index: {}]   ;;  %s5791_s16 = inlined_call_operand.vmem [shape: f32[32,8], index: 16, kind: input, shape index: {}]   ;;  %s5792_s17 = inlined_call_operand.vmem [shape: f32[1,8], index: 17, kind: input, shape index: {}]   ;;  %s5793_s18 = inlined_call_operand.hbm [shape: f32[2,8], index: 18, kind: output, shape index: {}]  }
   0x1   :  { %5811 = sst [smem:[#allocation6_spill]] %s5775_s0 }
   0x2   :  { %5812 = sst [smem:[#allocation7_spill]] %s5776_s1 }
   0x3   :  { %5813 = sst [smem:[#allocation8_spill]] %s5777_s2 }
   0x4   :  { %s5814_s29 = sld [smem:[#allocation7_spill]]  ;;  %vm81_vm0 = vcmask 1042432   ;;  %s5815_s19 = sld [smem:[#allocation6_spill]]  ;;  %v4601_v2 = vmov 0.0   ;;  %vm4602_vm1 = vmmov 0   ;;  %vm71_vm2 = vcmask 23552  }
   0x5   :  { %3770 = vmatprep.subr.mxu0 %v4601_v2  ;;  %3772 = vmatprep.mubr.msk.f32.mxu0 %vm4602_vm1, %v4601_v2  ;;  %v238_v3 = vld [vmem:[%s5779_s4] sm:$0xff]  ;;  %v4603_v4 = vmov 0.0|0.0   ;;  %v239_v5 = vld [vmem:[%s5779_s4 + $0x8] sm:$0xff] }
   0x6   :  { %4216 = vmatprep.subr.bf16.mxu1 %v4603_v4 }
   0xa   :  { %v63_v0 = vld [vmem:[%s5814_s29] sm:$0x7] }
   0xb   :  { %v60_v1 = vld [vmem:[%s5815_s19] sm:$0xff]  ;;  %3771 = vmatpush3.msk.msra.mxu0 %vm81_vm0, %v63_v0 }
   0xc   :  { %23 = vsyncpa [#allocation4], 0  ;;  %3773 = vmatmul.mubr.msk.f32.vlgmr.msra.gmra.mrb[0].mxu0 %vm71_vm2, %v60_v1  ;;  %v4217_v6 = vpack.c.bf16 %v239_v5, %v238_v3  ;;  %3789 = vmatprep.mubr.msk.f32.mxu1 %vm4602_vm1, %v4601_v2  ;;  %v61_v7 = vld [vmem:[%s5815_s19 + $0x8] sm:$0xff]  ;;  %v62_v8 = vld [vmem:[%s5815_s19 + $0x10] sm:$0x3]  ;;  %v165_v12 = vlaneseq  ;;  %s5816_s19 = sld [smem:[#allocation8_spill]] }
   0xd   :  { %3775 = vmatprep.mubr.msk.f32.mxu0 %vm4602_vm1, %v4601_v2  ;;  %4230 = vmatprep.subr.bf16.mxu0 %v4603_v4  ;;  %v240_v9 = vld [vmem:[%s5779_s4 + $0x10] sm:$0xff]  ;;  %v241_v10 = vld [vmem:[%s5779_s4 + $0x18] sm:$0xff]  ;;  %v3432_v16 = vld [vmem:[%s5778_s3] ss:$0 sm:$0xff]  ;;  %vm249_vm4 = vcmask 261120   ;;  %s4604_s22 = smov 88  }
   0xe   :  { %4218 = vmatpush3.bf16.msra.mxu1 %v4217_v6  ;;  %v4220_v11 = vpack.c.bf16 %v241_v10, %v240_v9  ;;  %v4758_v13 = vshrl.u32 %v165_v12, 7  ;;  %v3433_v28 = vld [vmem:[%s5780_s5] ss:$0 sm:$0xff]  ;;  %s4605_s2 = smov 96   ;;  %s4606_s23 = smov 72   ;;  %vm348_vm5 = vcmask 64512  }
   0xf   :  { %4219 = vmatprep.subr.bf16.mxu1 %v4603_v4  ;;  %s4607_s24 = smov 80   ;;  %s4608_s25 = smov 120   ;;  %vm4822_vm6 = vmpackc.low %vm348_vm5, %vm348_vm5  ;;  %v183_v5 = vand.u32 127, %v165_v12  ;;  %v4611_v10 = vmov -1e+30   ;;  %vm765_vm9 = vcmask 146432  }
  0x10   :  { %3776 = vmatmul.mubr.msk.f32.gmra.mrb[2].mxu0 %vm71_vm2, %v61_v7  ;;  %vm169_vm3 = vcmp.lt.s32.totalorder %v4758_v13, 2  ;;  %s5809_s26 = smov 112   ;;  %s4610_s27 = smov 104   ;;  %v188_v7 = vand.u32 1, %v4758_v13  ;;  %vm772_vm11 = vcmask 140288   ;;  %vm916_vm12 = vcmask 1041408  }
  0x11   :  { %3778 = vmatprep.mubr.msk.f32.mxu0 %vm4602_vm1, %v4601_v2  ;;  %v224_v6 = vand.u32 1, %v183_v5  ;;  %s5801_s28 = smov 56   ;;  %s5799_s29 = smov 64   ;;  %vm1001_vm13 = vcmask 58368   ;;  %vm1114_vm14 = vcmask 130112   ;;  %vm1230_vm15 = vcmask 195712  }
  0x12   :  { %4221 = vmatpush3.bf16.msra.mxu1 %v4220_v11  ;;  %v3427_v14 = vld [vmem:[%s5816_s19] ss:$0 sm:$0xff]  ;;  %s5797_s30 = smov 48   ;;  %s5795_s0 = smov 40   ;;  %vm1346_vm0 = vcmask 261312  }
  0x13   :  { %4222 = vmatprep.subr.bf16.mxu1 %v4603_v4  ;;  %vm232_vm7 = vcmp.eq.s32.totalorder %v188_v7, %v224_v6  ;;  %s5807_s19 = smov 8   ;;  %s5805_s1 = smov 16  }
  0x14   :  { %3779 = vmatmul.mubr.msk.f32.gmra.mrb[4].mxu0 %vm71_vm2, %v62_v8  ;;  %v167_v8 = vadd.s32 8, %v4758_v13  ;;  %v4886_v11 = vsel %vm232_vm7, 0.0, %v4611_v10  ;;  %vm1117_vm2 = vcmask 123968   ;;  %vm1349_vm7 = vcmask 255168   ;;  %s4619_s3 = smov [#allocation3]  }
  0x15   :  { %3834 = vmatprep.mubr.msk.f32.mxu0 %vm4602_vm1, %v4601_v2 }
  0x16   :  { %v195_v9 = vand.u32 1, %v167_v8 }
  0x18   :  { %vm233_vm8 = vcmp.eq.s32.totalorder %v195_v9, %v224_v6 }
  0x19   :  { %v4892_v12 = vsel %vm233_vm8, 0.0, %v4611_v10  ;;  %vm1465_vm8 = vcmask 254976  }
  0xdf   :  { %v151_v15 = vpop.f32.mrb[0].mxu0 }
  0xe0   :  { %v152_v17 = vadd.f32 %v3427_v14, %v151_v15  ;;  %v3774_v18 = vpop.f32.mrb[1].mxu0 }
  0xe2   :  { %v4767_v19 = vsel %vm169_vm3, %v3432_v16, %v152_v17  ;;  %v168_v17 = vadd.s32 16, %v4758_v13  ;;  %vm1233_vm3 = vcmask 189568  }
  0xe3   :  { %v156_v20 = vpop.f32.mrb[2].mxu0  ;;  %3790 = vmatmul.mubr.msk.f32.vlgmr.msra.gmra.mrb[0].mxu1 %vm249_vm4, %v4767_v19 }
  0xe4   :  { %v4771_v21 = vadd.f32 %v3427_v14, %v156_v20  ;;  %v3777_v22 = vpop.f32.mrb[3].mxu0  ;;  %3792 = vmatprep.mubr.msk.f32.mxu1 %vm4602_vm1, %v4601_v2 }
  0xe7   :  { %3793 = vmatmul.mubr.msk.f32.gmra.mrb[2].mxu1 %vm249_vm4, %v4771_v21  ;;  %v161_v23 = vpop.f32.mrb[4].mxu0 }
  0xe8   :  { %v4777_v24 = vadd.f32 %v3427_v14, %v161_v23  ;;  %3795 = vmatprep.mubr.msk.f32.mxu1 %vm4602_vm1, %v4601_v2  ;;  %v3780_v25 = vpop.f32.mrb[5].mxu0 }
  0xe9   :  { %v202_v25 = vand.u32 1, %v168_v17 }
  0xeb   :  { %3796 = vmatmul.mubr.msk.f32.gmra.mrb[4].mxu1 %vm249_vm4, %v4777_v24  ;;  %vm234_vm10 = vcmp.eq.s32.totalorder %v202_v25, %v224_v6 }
  0xec   :  { %3804 = vmatprep.mubr.msk.f32.mxu1 %vm4602_vm1, %v4601_v2 }
 0x1b6   :  { %v325_v26 = vpop.f32.mrb[0].mxu1 }
 0x1b7   :  { %v3791_v27 = vpop.f32.mrb[1].mxu1  ;;  %v326_v30 = vadd.f32 %v3433_v28, %v325_v26 }
 0x1ba   :  { %v330_v29 = vpop.f32.mrb[2].mxu1 }
 0x1bb   :  { %v331_v31 = vadd.f32 %v3433_v28, %v330_v29  ;;  %v3794_v32 = vpop.f32.mrb[3].mxu1 }
 0x1bd   :  { %v4788_v33 = vpack.i.bf16 %v331_v31, %v326_v30 }
 0x1be   :  { %v335_v34 = vpop.f32.mrb[4].mxu1 }
 0x1bf   :  { %4387 = vrot.lane.b32.xlu1 %v4788_v33, %s4604_s22  ;;  %4382 = vrot.lane.b32.xlu0 %v4788_v33, %s4605_s2  ;;  %v4794_v35 = vadd.f32 %v3433_v28, %v335_v34  ;;  %v3797_v36 = vpop.f32.mrb[5].mxu1 }
 0x1c3   :  { %451 = vrot.lane.b32.xlu1 %v4794_v35, %s4604_s22  ;;  %346 = vrot.lane.b32.xlu0 %v4794_v35, %s4605_s2 }
 0x1c7   :  { %4397 = vrot.lane.b32.xlu1 %v4788_v33, %s4606_s23  ;;  %4392 = vrot.lane.b32.xlu0 %v4788_v33, %s4607_s24 }
 0x1cb   :  { %443 = vrot.lane.b32.xlu1 %v331_v31, %s4608_s25  ;;  %441 = vrot.lane.b32.xlu0 %v326_v30, %s4608_s25 }
 0x1cf   :  { %555 = vrot.lane.b32.xlu1 %v4794_v35, %s4607_s24  ;;  %445 = vrot.lane.b32.xlu0 %v4794_v35, %s4608_s25 }
 0x1d3   :  { %545 = vrot.lane.b32.xlu1 %v326_v30, %s5809_s26  ;;  %659 = vrot.lane.b32.xlu0 %v4794_v35, %s4606_s23 }
 0x1d7   :  { %547 = vrot.lane.b32.xlu1 %v331_v31, %s5809_s26  ;;  %649 = vrot.lane.b32.xlu0 %v326_v30, %s4610_s27 }
 0x1db   :  { %549 = vrot.lane.b32.xlu1 %v4794_v35, %s5809_s26  ;;  %651 = vrot.lane.b32.xlu0 %v331_v31, %s4610_s27 }
 0x1df   :  { %653 = vrot.lane.b32.xlu0 %v4794_v35, %s4610_s27 }
 0x231   :  { %v4388_v37 = vpop.permute.xlu1 %4387  ;;  %v4383_v38 = vpop.permute.xlu0 %4382 }
 0x232   :  { %v4385_v39 = vunpack.i.h.bf16 %v4383_v38  ;;  %v4384_v40 = vunpack.i.l.bf16 %v4383_v38  ;;  %v4390_v49 = vunpack.i.h.bf16 %v4388_v37  ;;  %v4389_v50 = vunpack.i.l.bf16 %v4388_v37 }
 0x234   :  { %v4223_v42 = vpack.c.bf16 %v4385_v39, %v4384_v40  ;;  %v4227_v53 = vpack.c.bf16 %v4390_v49, %v4389_v50 }
 0x235   :  { %v452_v43 = vpop.permute.xlu1 %451  ;;  %v347_v44 = vpop.permute.xlu0 %346 }
 0x236   :  { %4225 = vmatpush3.bf16.xpose.msk.msra.mxu1 %vm4822_vm6, %v4223_v42 }
 0x237   :  { %3802 = vmatprep.subr.mxu1 %v4601_v2 }
 0x239   :  { %v4398_v45 = vpop.permute.xlu1 %4397  ;;  %v4393_v46 = vpop.permute.xlu0 %4392 }
 0x23a   :  { %v4395_v47 = vunpack.i.h.bf16 %v4393_v46  ;;  %v4394_v48 = vunpack.i.l.bf16 %v4393_v46  ;;  %v4400_v57 = vunpack.i.h.bf16 %v4398_v45  ;;  %v4399_v58 = vunpack.i.l.bf16 %v4398_v45 }
 0x23c   :  { %v4231_v51 = vpack.c.bf16 %v4395_v47, %v4394_v48  ;;  %v4235_v61 = vpack.c.bf16 %v4400_v57, %v4399_v58 }
 0x23d   :  { %v444_v52 = vpop.permute.xlu1 %443  ;;  %v442_v55 = vpop.permute.xlu0 %441 }
 0x23e   :  { %3803 = vmatpush3.xpose.msk.msra.mxu1 %vm348_vm5, %v347_v44  ;;  %4233 = vmatpush3.bf16.xpose.msk.msra.mxu0 %vm4822_vm6, %v4231_v51 }
 0x23f   :  { %4226 = vmatprep.subr.bf16.mxu1 %v4603_v4  ;;  %3832 = vmatprep.subr.mxu0 %v4601_v2 }
 0x241   :  { %v556_v54 = vpop.permute.xlu1 %555  ;;  %3805 = vmatmul.mubr.msk.f32.vlgmr.msra.gmra.mrb[6].mxu1 %vm348_vm5, %v326_v30  ;;  %v446_v59 = vpop.permute.xlu0 %445  ;;  %v4901_v30 = vsel %vm234_vm10, 0.0, %v4611_v10 }
 0x242   :  { %4229 = vmatpush3.bf16.xpose.msk.msra.mxu1 %vm4822_vm6, %v4227_v53  ;;  %3807 = vmatprep.mubr.msk.f32.mxu1 %vm4602_vm1, %v4601_v2 }
 0x243   :  { %3817 = vmatprep.subr.mxu1 %v4601_v2 }
 0x245   :  { %v546_v56 = vpop.permute.xlu1 %545  ;;  %3808 = vmatmul.mubr.msk.f32.gmra.mrb[8].mxu1 %vm348_vm5, %v331_v31  ;;  %v660_v62 = vpop.permute.xlu0 %659 }
 0x246   :  { %3833 = vmatpush3.xpose.msk.msra.mxu0 %vm348_vm5, %v556_v54  ;;  %3810 = vmatprep.mubr.msk.f32.mxu1 %vm4602_vm1, %v4601_v2 }
 0x247   :  { %4238 = vmatprep.subr.bf16.mxu0 %v4603_v4 }
 0x249   :  { %3811 = vmatmul.mubr.msk.f32.gmra.mrb[10].mxu1 %vm348_vm5, %v4794_v35  ;;  %3835 = vmatmul.mubr.msk.f32.vlgmr.msra.gmra.mrb[6].mxu0 %vm348_vm5, %v546_v56  ;;  %v548_v60 = vpop.permute.xlu1 %547  ;;  %v650_v0 = vpop.permute.xlu0 %649 }
 0x24a   :  { %3818 = vmatpush3.xpose.msk.msra.mxu1 %vm348_vm5, %v452_v43  ;;  %3819 = vmatprep.mubr.msk.f32.mxu1 %vm4602_vm1, %v4601_v2 }
 0x24b   :  { %3837 = vmatprep.mubr.msk.f32.mxu0 %vm4602_vm1, %v4601_v2  ;;  %4234 = vmatprep.subr.bf16.mxu1 %v4603_v4 }
 0x24d   :  { %3820 = vmatmul.mubr.msk.f32.vlgmr.msra.gmra.mrb[12].mxu1 %vm348_vm5, %v442_v55  ;;  %3838 = vmatmul.mubr.msk.f32.gmra.mrb[8].mxu0 %vm348_vm5, %v548_v60  ;;  %v550_v63 = vpop.permute.xlu1 %549  ;;  %v652_v1 = vpop.permute.xlu0 %651 }
 0x24e   :  { %4237 = vmatpush3.bf16.xpose.msk.msra.mxu1 %vm4822_vm6, %v4235_v61  ;;  %3822 = vmatprep.mubr.msk.f32.mxu1 %vm4602_vm1, %v4601_v2 }
 0x24f   :  { %3840 = vmatprep.mubr.msk.f32.mxu0 %vm4602_vm1, %v4601_v2  ;;  %3847 = vmatprep.subr.mxu1 %v4601_v2 }
 0x251   :  { %3823 = vmatmul.mubr.msk.f32.gmra.mrb[14].mxu1 %vm348_vm5, %v444_v52  ;;  %3841 = vmatmul.mubr.msk.f32.gmra.mrb[10].mxu0 %vm348_vm5, %v550_v63  ;;  %v654_v3 = vpop.permute.xlu0 %653 }
 0x252   :  { %3825 = vmatprep.mubr.msk.f32.mxu1 %vm4602_vm1, %v4601_v2  ;;  %3864 = vmatprep.mubr.msk.f32.mxu0 %vm4602_vm1, %v4601_v2 }
 0x255   :  { %3826 = vmatmul.mubr.msk.f32.gmra.mrb[16].mxu1 %vm348_vm5, %v446_v59 }
 0x256   :  { %3848 = vmatpush3.xpose.msk.msra.mxu1 %vm348_vm5, %v660_v62  ;;  %3849 = vmatprep.mubr.msk.f32.mxu1 %vm4602_vm1, %v4601_v2 }
 0x257   :  { %4241 = vmatprep.subr.bf16.mxu1 %v4603_v4 }
 0x259   :  { %3850 = vmatmul.mubr.msk.f32.vlgmr.msra.gmra.mrb[18].mxu1 %vm348_vm5, %v650_v0 }
 0x25a   :  { %3852 = vmatprep.mubr.msk.f32.mxu1 %vm4602_vm1, %v4601_v2 }
 0x25d   :  { %3853 = vmatmul.mubr.msk.f32.gmra.mrb[20].mxu1 %vm348_vm5, %v652_v1 }
 0x25e   :  { %3855 = vmatprep.mubr.msk.f32.mxu1 %vm4602_vm1, %v4601_v2 }
 0x261   :  { %3856 = vmatmul.mubr.msk.f32.gmra.mrb[22].mxu1 %vm348_vm5, %v654_v3 }
 0x262   :  { %3879 = vmatprep.mubr.msk.f32.mxu1 %vm4602_vm1, %v4601_v2 }
 0x314   :  { %v427_v14 = vpop.f32.mrb[6].mxu1 }
 0x315   :  { %v4889_v15 = vadd.f32 %v427_v14, %v4886_v11  ;;  %v3806_v16 = vpop.f32.mrb[7].mxu1 }
 0x317   :  { %v766_v18 = vsel %vm765_vm9, %v4889_v15, -inf }
 0x318   :  { %767 = vmax.xlane.f32.xlu1 %v766_v18  ;;  %v432_v20 = vpop.f32.mrb[8].mxu1 }
 0x319   :  { %v4897_v22 = vadd.f32 %v432_v20, %v4892_v12  ;;  %v3809_v23 = vpop.f32.mrb[9].mxu1 }
 0x31b   :  { %v769_v26 = vsel %vm765_vm9, %v4897_v22, -inf }
 0x31c   :  { %770 = vmax.xlane.f32.xlu0 %v769_v26  ;;  %v437_v27 = vpop.f32.mrb[10].mxu1  ;;  %v635_v28 = vpop.f32.mrb[6].mxu0 }
 0x31d   :  { %v3812_v13 = vpop.f32.mrb[11].mxu1  ;;  %v3836_v29 = vpop.f32.mrb[7].mxu0  ;;  %v4907_v38 = vadd.f32 %v437_v27, %v4901_v30  ;;  %v4912_v45 = vadd.f32 %v635_v28, %v4886_v11 }
 0x31f   :  { %v773_v46 = vsel %vm772_vm11, %v4907_v38, -inf  ;;  %v785_v50 = vsel %vm765_vm9, %v4912_v45, -inf }
 0x320   :  { %v531_v31 = vpop.f32.mrb[12].mxu1  ;;  %v640_v32 = vpop.f32.mrb[8].mxu0 }
 0x321   :  { %v4904_v34 = vadd.f32 %v531_v31, %v4886_v11  ;;  %v3821_v36 = vpop.f32.mrb[13].mxu1  ;;  %v3839_v37 = vpop.f32.mrb[9].mxu0  ;;  %v4919_v49 = vadd.f32 %v640_v32, %v4892_v12 }
 0x323   :  { %v776_v39 = vsel %vm765_vm9, %v4904_v34, -inf  ;;  %v788_v54 = vsel %vm765_vm9, %v4919_v49, -inf }
 0x324   :  { %777 = vmax.xlane.f32.xlu0 %v776_v39  ;;  %v536_v40 = vpop.f32.mrb[14].mxu1  ;;  %v645_v42 = vpop.f32.mrb[10].mxu0 }
 0x325   :  { %v3824_v43 = vpop.f32.mrb[15].mxu1  ;;  %v3842_v44 = vpop.f32.mrb[11].mxu0  ;;  %v4926_v53 = vadd.f32 %v645_v42, %v4901_v30  ;;  %v4935_v60 = vadd.f32 %v536_v40, %v4892_v12 }
 0x327   :  { %v791_v57 = vsel %vm772_vm11, %v4926_v53, -inf  ;;  %v779_v62 = vsel %vm765_vm9, %v4935_v60, -inf }
 0x328   :  { %774 = vmax.xlane.f32.xlu0 %v773_v46  ;;  %v541_v47 = vpop.f32.mrb[16].mxu1 }
 0x329   :  { %4407 = vrot.lane.b32.xlu1 %v4788_v33, %s5801_s28  ;;  %v3827_v48 = vpop.f32.mrb[17].mxu1  ;;  %v4940_v61 = vadd.f32 %v541_v47, %v4901_v30 }
 0x32b   :  { %v782_v0 = vsel %vm772_vm11, %v4940_v61, -inf }
 0x32c   :  { %v739_v51 = vpop.f32.mrb[18].mxu1  ;;  %786 = vmax.xlane.f32.xlu0 %v785_v50 }
 0x32d   :  { %1007 = vrot.lane.b32.xlu1 %v4794_v35, %s5801_s28  ;;  %v3851_v52 = vpop.f32.mrb[19].mxu1  ;;  %v4947_v63 = vadd.f32 %v739_v51, %v4886_v11 }
 0x32f   :  { %v794_v3 = vsel %vm765_vm9, %v4947_v63, -inf }
 0x330   :  { %v744_v55 = vpop.f32.mrb[20].mxu1  ;;  %789 = vmax.xlane.f32.xlu0 %v788_v54 }
 0x331   :  { %v3854_v56 = vpop.f32.mrb[21].mxu1  ;;  %v4952_v1 = vadd.f32 %v744_v55, %v4892_v12 }
 0x333   :  { %v797_v6 = vsel %vm765_vm9, %v4952_v1, -inf }
 0x334   :  { %v749_v58 = vpop.f32.mrb[22].mxu1  ;;  %792 = vmax.xlane.f32.xlu0 %v791_v57 }
 0x335   :  { %v3857_v59 = vpop.f32.mrb[23].mxu1  ;;  %v4957_v5 = vadd.f32 %v749_v58, %v4901_v30 }
 0x337   :  { %v800_v7 = vsel %vm772_vm11, %v4957_v5, -inf }
 0x34a   :  { %4402 = vrot.lane.b32.xlu0 %v4788_v33, %s5799_s29 }
 0x34e   :  { %903 = vrot.lane.b32.xlu0 %v4794_v35, %s5799_s29  ;;  %s5825_s29 = smov 16  }
 0x351   :  { %780 = vmax.xlane.f32.xlu1 %v779_v62 }
 0x352   :  { %4412 = vrot.lane.b32.xlu0 %v4788_v33, %s5797_s30 }
 0x355   :  { %783 = vmax.xlane.f32.xlu1 %v782_v0 }
 0x359   :  { %795 = vmax.xlane.f32.xlu1 %v794_v3 }
 0x35d   :  { %798 = vmax.xlane.f32.xlu1 %v797_v6 }
 0x361   :  { %801 = vmax.xlane.f32.xlu1 %v800_v7 }
 0x372   :  { %4417 = vrot.lane.b32.xlu1 %v4788_v33, %s5795_s0 }
 0x3a5   :  { %v768_v8 = vpop.xlane.xlu1 %767 }
 0x3a6   :  { %v803_v9 = vsub.f32 %v4889_v15, %v768_v8 }
 0x3a8   :  { %v815_v10 = vmul.f32 1.442695, %v803_v9 }
 0x3a9   :  { %v4408_v14 = vpop.permute.xlu1 %4407  ;;  %v771_v20 = vpop.xlane.xlu0 %770 }
 0x3aa   :  { %4461 = vpow2.f32 %v815_v10  ;;  %v4410_v16 = vunpack.i.h.bf16 %v4408_v14  ;;  %v4409_v17 = vunpack.i.l.bf16 %v4408_v14  ;;  %v804_v27 = vsub.f32 %v4897_v22, %v771_v20 }
 0x3ac   :  { %v4242_v18 = vpack.c.bf16 %v4410_v16, %v4409_v17  ;;  %v817_v29 = vmul.f32 1.442695, %v804_v27 }
 0x3ad   :  { %v1008_v23 = vpop.permute.xlu1 %1007 }
 0x3ae   :  { %4243 = vmatpush3.bf16.msra.mxu1 %v4242_v18 }
 0x3af   :  { %3877 = vmatprep.subr.mxu1 %v4601_v2 }
 0x3b1   :  { %v778_v25 = vpop.xlane.xlu0 %777 }
 0x3b2   :  { %3878 = vmatpush3.msk.msra.mxu1 %vm916_vm12, %v1008_v23  ;;  %v806_v37 = vsub.f32 %v4904_v34, %v778_v25 }
 0x3b3   :  { %4247 = vmatprep.subr.bf16.mxu1 %v4603_v4 }
 0x3b4   :  { %v4969_v33 = vpop.eup %4461  ;;  %v821_v44 = vmul.f32 1.442695, %v806_v37 }
 0x3b5   :  { %v775_v15 = vpop.xlane.xlu0 %774  ;;  %v839_v26 = vsel %vm765_vm9, %v4969_v33, 0.0 }
 0x3b6   :  { %840 = vadd.xlane.f32.xlu0 %v839_v26  ;;  %v805_v39 = vsub.f32 %v4907_v38, %v775_v15 }
 0x3b8   :  { %v819_v22 = vmul.f32 1.442695, %v805_v39 }
 0x3b9   :  { %v787_v28 = vpop.xlane.xlu0 %786 }
 0x3ba   :  { %v809_v13 = vsub.f32 %v4912_v45, %v787_v28 }
 0x3bc   :  { %v827_v31 = vmul.f32 1.442695, %v809_v13 }
 0x3bd   :  { %v790_v32 = vpop.xlane.xlu0 %789 }
 0x3be   :  { %4463 = vpow2.f32 %v827_v31  ;;  %v810_v36 = vsub.f32 %v4919_v49, %v790_v32 }
 0x3bf   :  { %4465 = vpow2.f32 %v817_v29 }
 0x3c0   :  { %v829_v40 = vmul.f32 1.442695, %v810_v36 }
 0x3c1   :  { %v793_v42 = vpop.xlane.xlu0 %792 }
 0x3c2   :  { %v811_v43 = vsub.f32 %v4926_v53, %v793_v42  ;;  %4467 = vpow2.f32 %v829_v40 }
 0x3c4   :  { %v831_v46 = vmul.f32 1.442695, %v811_v43 }
 0x3c5   :  { %v4403_v45 = vpop.permute.xlu0 %4402 }
 0x3c6   :  { %4469 = vpow2.f32 %v831_v46  ;;  %v4405_v47 = vunpack.i.h.bf16 %v4403_v45  ;;  %v4404_v48 = vunpack.i.l.bf16 %v4403_v45 }
 0x3c7   :  { %4471 = vpow2.f32 %v821_v44 }
 0x3c8   :  { %v4979_v50 = vpop.eup %4463  ;;  %4473 = vpow2.f32 %v819_v22  ;;  %v4239_v34 = vpack.c.bf16 %v4405_v47, %v4404_v48 }
 0x3c9   :  { %v857_v38 = vsel %vm765_vm9, %v4979_v50, 0.0  ;;  %v4983_v49 = vpop.eup %4465  ;;  %v904_v51 = vpop.permute.xlu0 %903 }
 0x3ca   :  { %858 = vadd.xlane.f32.xlu0 %v857_v38  ;;  %4240 = vmatpush3.bf16.msra.mxu0 %v4239_v34  ;;  %v842_v52 = vsel %vm765_vm9, %v4983_v49, 0.0 }
 0x3cb   :  { %3862 = vmatprep.subr.mxu0 %v4601_v2 }
 0x3cc   :  { %v4988_v53 = vpop.eup %4467 }
 0x3cd   :  { %v860_v56 = vsel %vm765_vm9, %v4988_v53, 0.0  ;;  %v4413_v31 = vpop.permute.xlu0 %4412 }
 0x3ce   :  { %843 = vadd.xlane.f32.xlu0 %v842_v52  ;;  %3863 = vmatpush3.msk.msra.mxu0 %vm916_vm12, %v904_v51  ;;  %v4415_v36 = vunpack.i.h.bf16 %v4413_v31  ;;  %v4414_v37 = vunpack.i.l.bf16 %v4413_v31  ;;  %v1355_v31 = vld [vmem:[%s5781_s6 + $0x8] sm:$0xff] }
 0x3cf   :  { %4244 = vmatprep.subr.bf16.mxu0 %v4603_v4 }
 0x3d0   :  { %v4992_v54 = vpop.eup %4469  ;;  %v4245_v42 = vpack.c.bf16 %v4415_v36, %v4414_v37  ;;  %v1356_v36 = vld [vmem:[%s5781_s6 + $0x10] sm:$0xff]  ;;  %v1357_v37 = vld [vmem:[%s5781_s6 + $0x18] sm:$0xff] }
 0x3d1   :  { %v4994_v55 = vpop.eup %4471  ;;  %v863_v57 = vsel %vm772_vm11, %v4992_v54, 0.0 }
 0x3d2   :  { %v5000_v58 = vpop.eup %4473  ;;  %861 = vadd.xlane.f32.xlu0 %v860_v56  ;;  %864 = vadd.xlane.f32.xlu1 %v863_v57  ;;  %v848_v62 = vsel %vm765_vm9, %v4994_v55, 0.0 }
 0x3d3   :  { %v845_v59 = vsel %vm772_vm11, %v5000_v58, 0.0 }
 0x3d6   :  { %846 = vadd.xlane.f32.xlu0 %v845_v59  ;;  %849 = vadd.xlane.f32.xlu1 %v848_v62 }
 0x3de   :  { %v781_v0 = vpop.xlane.xlu1 %780 }
 0x3df   :  { %v807_v3 = vsub.f32 %v4935_v60, %v781_v0 }
 0x3e1   :  { %v823_v6 = vmul.f32 1.442695, %v807_v3 }
 0x3e2   :  { %v784_v7 = vpop.xlane.xlu1 %783 }
 0x3e3   :  { %4475 = vpow2.f32 %v823_v6  ;;  %v808_v8 = vsub.f32 %v4940_v61, %v784_v7 }
 0x3e5   :  { %v825_v9 = vmul.f32 1.442695, %v808_v8 }
 0x3e6   :  { %v796_v10 = vpop.xlane.xlu1 %795 }
 0x3e7   :  { %4477 = vpow2.f32 %v825_v9  ;;  %v812_v14 = vsub.f32 %v4947_v63, %v796_v10 }
 0x3e9   :  { %v833_v16 = vmul.f32 1.442695, %v812_v14 }
 0x3ea   :  { %v799_v17 = vpop.xlane.xlu1 %798 }
 0x3eb   :  { %4479 = vpow2.f32 %v833_v16  ;;  %v813_v18 = vsub.f32 %v4952_v1, %v799_v17 }
 0x3ed   :  { %v5010_v20 = vpop.eup %4475  ;;  %v835_v23 = vmul.f32 1.442695, %v813_v18 }
 0x3ee   :  { %v802_v25 = vpop.xlane.xlu1 %801  ;;  %v851_v60 = vsel %vm765_vm9, %v5010_v20, 0.0 }
 0x3ef   :  { %4481 = vpow2.f32 %v835_v23  ;;  %v814_v61 = vsub.f32 %v4957_v5, %v802_v25  ;;  %852 = vadd.xlane.f32.xlu1 %v851_v60 }
 0x3f1   :  { %v5015_v15 = vpop.eup %4477  ;;  %v837_v26 = vmul.f32 1.442695, %v814_v61 }
 0x3f2   :  { %v854_v63 = vsel %vm772_vm11, %v5015_v15, 0.0  ;;  %v4418_v44 = vpop.permute.xlu1 %4417 }
 0x3f3   :  { %4483 = vpow2.f32 %v837_v26  ;;  %855 = vadd.xlane.f32.xlu1 %v854_v63  ;;  %v4420_v34 = vunpack.i.h.bf16 %v4418_v44  ;;  %v4419_v38 = vunpack.i.l.bf16 %v4418_v44 }
 0x3f5   :  { %v5019_v1 = vpop.eup %4479  ;;  %v4248_v57 = vpack.c.bf16 %v4420_v34, %v4419_v38 }
 0x3f6   :  { %v866_v27 = vsel %vm765_vm9, %v5019_v1, 0.0 }
 0x3f7   :  { %867 = vadd.xlane.f32.xlu1 %v866_v27 }
 0x3f9   :  { %v5023_v28 = vpop.eup %4481 }
 0x3fa   :  { %v869_v5 = vsel %vm765_vm9, %v5023_v28, 0.0 }
 0x3fb   :  { %870 = vadd.xlane.f32.xlu1 %v869_v5 }
 0x3fd   :  { %v5027_v13 = vpop.eup %4483 }
 0x3fe   :  { %v872_v29 = vsel %vm772_vm11, %v5027_v13, 0.0 }
 0x3ff   :  { %873 = vadd.xlane.f32.xlu0 %v872_v29  ;;  %v1354_v29 = vld [vmem:[%s5781_s6] sm:$0xff] }
 0x40c   :  { %1123 = vrot.lane.b32.xlu1 %v4794_v35, %s5797_s30  ;;  %s5803_s30 = smov 24  }
 0x415   :  { %1239 = vrot.lane.b32.xlu0 %v4794_v35, %s5795_s0  ;;  %s5826_s0 = smov 24  }
 0x443   :  { %v841_v32 = vpop.xlane.xlu0 %840 }
 0x444   :  { %4485 = vrcp.f32 %v841_v32  ;;  %v4251_v32 = vpack.c.bf16 %v1355_v31, %v1354_v29  ;;  %v1529_v31 = vld [vmem:[%s5783_s8 + $0x10] sm:$0xff] }
 0x44e   :  { %v4486_v39 = vpop.eup %4485 }
 0x44f   :  { %v887_v40 = vmul.f32 %v4486_v39, %v4969_v33 }
 0x451   :  { %3865 = vmatmul.mubr.msk.f32.vlgmr.msra.gmra.mrb[12].mxu0 %vm765_vm9, %v887_v40  ;;  %v4254_v40 = vpack.c.bf16 %v1357_v37, %v1356_v36  ;;  %v1630_v37 = vld [vmem:[%s5785_s10] sm:$0xff] }
 0x452   :  { %4246 = vmatpush3.bf16.msra.mxu0 %v4245_v42  ;;  %3867 = vmatprep.mubr.msk.f32.mxu0 %vm4602_vm1, %v4601_v2 }
 0x453   :  { %3892 = vmatprep.subr.mxu0 %v4601_v2 }
 0x457   :  { %v859_v43 = vpop.xlane.xlu0 %858 }
 0x45b   :  { %v844_v35 = vpop.xlane.xlu0 %843 }
 0x45c   :  { %4487 = vrcp.f32 %v844_v35 }
 0x45f   :  { %v865_v22 = vpop.xlane.xlu1 %864  ;;  %v862_v46 = vpop.xlane.xlu0 %861 }
 0x463   :  { %v850_v45 = vpop.xlane.xlu1 %849  ;;  %v847_v47 = vpop.xlane.xlu0 %846 }
 0x464   :  { %4489 = vrcp.f32 %v850_v45 }
 0x465   :  { %4491 = vrcp.f32 %v847_v47 }
 0x466   :  { %v4488_v33 = vpop.eup %4487 }
 0x467   :  { %v888_v48 = vmul.f32 %v4488_v33, %v4983_v49 }
 0x469   :  { %3868 = vmatmul.mubr.msk.f32.gmra.mrb[14].mxu0 %vm765_vm9, %v888_v48 }
 0x46a   :  { %3870 = vmatprep.mubr.msk.f32.mxu0 %vm4602_vm1, %v4601_v2 }
 0x46e   :  { %v4490_v51 = vpop.eup %4489 }
 0x46f   :  { %v4492_v52 = vpop.eup %4491  ;;  %v890_v56 = vmul.f32 %v4490_v51, %v4994_v55 }
 0x470   :  { %v889_v59 = vmul.f32 %v4492_v52, %v5000_v58 }
 0x471   :  { %3880 = vmatmul.mubr.msk.f32.vlgmr.msra.gmra.mrb[24].mxu1 %vm765_vm9, %v890_v56 }
 0x472   :  { %3871 = vmatmul.mubr.msk.f32.gmra.mrb[16].mxu0 %vm765_vm9, %v889_v59  ;;  %4249 = vmatpush3.bf16.msra.mxu1 %v4248_v57 }
 0x473   :  { %3882 = vmatprep.mubr.msk.f32.mxu1 %vm4602_vm1, %v4601_v2  ;;  %3894 = vmatprep.mubr.msk.f32.mxu0 %vm4602_vm1, %v4601_v2 }
 0x474   :  { %3907 = vmatprep.subr.mxu1 %v4601_v2 }
 0x47c   :  { %v853_v49 = vpop.xlane.xlu1 %852 }
 0x47d   :  { %4493 = vrcp.f32 %v853_v49 }
 0x47e   :  { %4495 = vrcp.f32 %v859_v43 }
 0x480   :  { %v856_v55 = vpop.xlane.xlu1 %855 }
 0x481   :  { %4497 = vrcp.f32 %v856_v55 }
 0x482   :  { %4499 = vrcp.f32 %v862_v46 }
 0x484   :  { %v868_v58 = vpop.xlane.xlu1 %867 }
 0x485   :  { %4501 = vrcp.f32 %v868_v58 }
 0x486   :  { %4503 = vrcp.f32 %v865_v22 }
 0x487   :  { %v4494_v62 = vpop.eup %4493 }
 0x488   :  { %v871_v0 = vpop.xlane.xlu1 %870  ;;  %v891_v3 = vmul.f32 %v4494_v62, %v5010_v20  ;;  %v4496_v6 = vpop.eup %4495 }
 0x489   :  { %4505 = vrcp.f32 %v871_v0  ;;  %v893_v8 = vmul.f32 %v4496_v6, %v4979_v50 }
 0x48a   :  { %3883 = vmatmul.mubr.msk.f32.gmra.mrb[26].mxu1 %vm765_vm9, %v891_v3 }
 0x48b   :  { %v4498_v7 = vpop.eup %4497  ;;  %3885 = vmatprep.mubr.msk.f32.mxu1 %vm4602_vm1, %v4601_v2 }
 0x48c   :  { %v1124_v9 = vpop.permute.xlu1 %1123  ;;  %v874_v10 = vpop.xlane.xlu0 %873  ;;  %v892_v14 = vmul.f32 %v4498_v7, %v5015_v15 }
 0x48d   :  { %v4500_v16 = vpop.eup %4499  ;;  %4507 = vrcp.f32 %v874_v10  ;;  %3893 = vmatpush3.msk.msra.mxu0 %vm916_vm12, %v1124_v9  ;;  %v3477_v10 = vld [vmem:[%s5782_s7] ss:$0 sm:$0xff] }
 0x48e   :  { %3886 = vmatmul.mubr.msk.f32.gmra.mrb[28].mxu1 %vm765_vm9, %v892_v14  ;;  %3895 = vmatmul.mubr.msk.f32.vlgmr.msra.gmra.mrb[18].mxu0 %vm765_vm9, %v893_v8  ;;  %v894_v20 = vmul.f32 %v4500_v16, %v4988_v53 }
 0x48f   :  { %v4502_v17 = vpop.eup %4501  ;;  %3897 = vmatprep.mubr.msk.f32.mxu0 %vm4602_vm1, %v4601_v2  ;;  %3909 = vmatprep.mubr.msk.f32.mxu1 %vm4602_vm1, %v4601_v2 }
 0x490   :  { %v896_v50 = vmul.f32 %v4502_v17, %v5019_v1  ;;  %v1240_v18 = vpop.permute.xlu0 %1239  ;;  %4250 = vmatprep.subr.bf16.mxu0 %v4603_v4  ;;  %v4504_v23 = vpop.eup %4503 }
 0x491   :  { %3908 = vmatpush3.msk.msra.mxu1 %vm916_vm12, %v1240_v18  ;;  %v895_v60 = vmul.f32 %v4504_v23, %v4992_v54  ;;  %4252 = vmatpush3.bf16.msra.mxu0 %v4251_v32  ;;  %v1530_v32 = vld [vmem:[%s5783_s8 + $0x18] sm:$0xff] }
 0x492   :  { %3898 = vmatmul.mubr.msk.f32.gmra.mrb[20].mxu0 %vm765_vm9, %v894_v20  ;;  %3910 = vmatmul.mubr.msk.f32.vlgmr.msra.gmra.mrb[30].mxu1 %vm765_vm9, %v896_v50  ;;  %v4260_v36 = vpack.c.bf16 %v1530_v32, %v1529_v31 }
 0x493   :  { %v4506_v25 = vpop.eup %4505  ;;  %3900 = vmatprep.mubr.msk.f32.mxu0 %vm4602_vm1, %v4601_v2  ;;  %3912 = vmatprep.mubr.msk.f32.mxu1 %vm4602_vm1, %v4601_v2 }
 0x494   :  { %v897_v53 = vmul.f32 %v4506_v25, %v5023_v28  ;;  %4256 = vmatprep.subr.bf16.mxu1 %v4603_v4  ;;  %4253 = vmatprep.subr.bf16.mxu0 %v4603_v4 }
 0x495   :  { %4255 = vmatpush3.bf16.msra.mxu0 %v4254_v40  ;;  %v1632_v40 = vld [vmem:[%s5785_s10 + $0x10] sm:$0xff] }
 0x496   :  { %3901 = vmatmul.mubr.msk.f32.gmra.mrb[22].mxu0 %vm765_vm9, %v895_v60  ;;  %3913 = vmatmul.mubr.msk.f32.gmra.mrb[32].mxu1 %vm765_vm9, %v897_v53 }
 0x497   :  { %v4508_v61 = vpop.eup %4507  ;;  %3915 = vmatprep.mubr.msk.f32.mxu1 %vm4602_vm1, %v4601_v2  ;;  %3926 = vmatprep.mubr.msk.f32.mxu0 %vm4602_vm1, %v4601_v2 }
 0x498   :  { %v898_v15 = vmul.f32 %v4508_v61, %v5027_v13  ;;  %4262 = vmatprep.subr.bf16.mxu0 %v4603_v4 }
 0x49a   :  { %3916 = vmatmul.mubr.msk.f32.gmra.mrb[34].mxu1 %vm765_vm9, %v898_v15 }
 0x49b   :  { %3943 = vmatprep.mubr.msk.f32.mxu1 %vm4602_vm1, %v4601_v2 }
 0x524   :  { %v985_v54 = vpop.f32.mrb[12].mxu0 }
 0x525   :  { %999 = vst.msk [vmem:[#allocation2] sm:$0xff] %vm348_vm5, %v985_v54  ;;  %v3866_v26 = vpop.f32.mrb[13].mxu0 }
 0x53c   :  { %v990_v63 = vpop.f32.mrb[14].mxu0 }
 0x53d   :  { %1000 = vst.msk [vmem:[#allocation2 + $0x8] sm:$0xff] %vm348_vm5, %v990_v63  ;;  %v3869_v1 = vpop.f32.mrb[15].mxu0 }
 0x544   :  { %v1088_v27 = vpop.f32.mrb[24].mxu1 }
 0x545   :  { %v995_v28 = vpop.f32.mrb[16].mxu0  ;;  %1105 = vrot.lane.b32.xlu1 %v1088_v27, %s5807_s19  ;;  %v3881_v5 = vpop.f32.mrb[25].mxu1 }
 0x546   :  { %1002 = vst.msk [vmem:[#allocation2 + $0x10] sm:$0x3] %vm1001_vm13, %v995_v28  ;;  %v3872_v13 = vpop.f32.mrb[17].mxu0 }
 0x547   :  { %v1527_v13 = vld [vmem:[%s5783_s8] sm:$0xff] }
 0x55d   :  { %v1093_v39 = vpop.f32.mrb[26].mxu1 }
 0x55e   :  { %v3884_v42 = vpop.f32.mrb[27].mxu1 }
 0x561   :  { %v1098_v43 = vpop.f32.mrb[28].mxu1  ;;  %v1204_v44 = vpop.f32.mrb[18].mxu0 }
 0x562   :  { %v3887_v35 = vpop.f32.mrb[29].mxu1  ;;  %1221 = vrot.lane.b32.xlu0 %v1204_v44, %s5805_s1  ;;  %v3896_v22 = vpop.f32.mrb[19].mxu0 }
 0x563   :  { %v1634_v35 = vld [vmem:[%s5785_s10 + $0x20] sm:$0xff]  ;;  %v1635_v22 = vld [vmem:[%s5785_s10 + $0x28] sm:$0xff] }
 0x565   :  { %v1209_v46 = vpop.f32.mrb[20].mxu0  ;;  %v1320_v45 = vpop.f32.mrb[30].mxu1 }
 0x566   :  { %1337 = vrot.lane.b32.xlu1 %v1320_v45, %s5803_s30  ;;  %v3911_v47 = vpop.f32.mrb[31].mxu1  ;;  %1107 = vrot.lane.b32.xlu0 %v1093_v39, %s5807_s19  ;;  %v3899_v33 = vpop.f32.mrb[21].mxu0  ;;  %v1631_v39 = vld [vmem:[%s5785_s10 + $0x8] sm:$0xff]  ;;  %v1636_v45 = vld [vmem:[%s5785_s10 + $0x30] sm:$0xff] }
 0x567   :  { %v4263_v42 = vpack.c.bf16 %v1631_v39, %v1630_v37  ;;  %v1637_v47 = vld [vmem:[%s5785_s10 + $0x38] sm:$0xff] }
 0x568   :  { %v4272_v33 = vpack.c.bf16 %v1637_v47, %v1636_v45 }
 0x569   :  { %v1214_v48 = vpop.f32.mrb[22].mxu0  ;;  %v1325_v34 = vpop.f32.mrb[32].mxu1 }
 0x56a   :  { %v3914_v38 = vpop.f32.mrb[33].mxu1  ;;  %1339 = vrot.lane.b32.xlu0 %v1325_v34, %s5803_s30  ;;  %1223 = vrot.lane.b32.xlu1 %v1209_v46, %s5805_s1  ;;  %v3902_v51 = vpop.f32.mrb[23].mxu0  ;;  %v4269_v46 = vpack.c.bf16 %v1635_v22, %v1634_v35  ;;  %v1639_v34 = vld [vmem:[%s5785_s10 + $0x48] sm:$0xff]  ;;  %v3483_v22 = vld [vmem:[%s5784_s9] ss:$0 sm:$0xff] }
 0x56b   :  { %v1640_v51 = vld [vmem:[%s5785_s10 + $0x50] sm:$0xff] }
 0x56d   :  { %v1330_v52 = vpop.f32.mrb[34].mxu1 }
 0x56e   :  { %v3917_v56 = vpop.f32.mrb[35].mxu1  ;;  %1109 = vrot.lane.b32.xlu1 %v1098_v43, %s5807_s19  ;;  %1225 = vrot.lane.b32.xlu0 %v1214_v48, %s5805_s1  ;;  %v1633_v43 = vld [vmem:[%s5785_s10 + $0x18] sm:$0xff]  ;;  %v1638_v48 = vld [vmem:[%s5785_s10 + $0x40] sm:$0xff] }
 0x56f   :  { %v4266_v44 = vpack.c.bf16 %v1633_v43, %v1632_v40  ;;  %v4275_v38 = vpack.c.bf16 %v1639_v34, %v1638_v48 }
 0x572   :  { %1341 = vrot.lane.b32.xlu1 %v1330_v52, %s5803_s30  ;;  %v1641_v52 = vld [vmem:[%s5785_s10 + $0x58] sm:$0xff] }
 0x573   :  { %v4278_v56 = vpack.c.bf16 %v1641_v52, %v1640_v51 }
 0x5b7   :  { %v1106_v57 = vpop.permute.xlu1 %1105 }
 0x5b8   :  { %1115 = vst.msk [vmem:[#allocation2] sm:$0xff] %vm1114_vm14, %v1106_v57  ;;  %v1642_v57 = vld [vmem:[%s5785_s10 + $0x60] sm:$0xff] }
 0x5d4   :  { %v1222_v59 = vpop.permute.xlu0 %1221 }
 0x5d5   :  { %1231 = vst.msk [vmem:[#allocation2] sm:$0xff] %vm1230_vm15, %v1222_v59  ;;  %v1643_v59 = vld [vmem:[%s5785_s10 + $0x68] sm:$0xff] }
 0x5d8   :  { %v1338_v49 = vpop.permute.xlu1 %1337  ;;  %v1108_v55 = vpop.permute.xlu0 %1107 }
 0x5d9   :  { %1347 = vst.msk [vmem:[#allocation2] sm:$0xff] %vm1346_vm0, %v1338_v49  ;;  %v4281_v49 = vpack.c.bf16 %v1643_v59, %v1642_v57 }
 0x5da   :  { %1116 = vst.msk [vmem:[#allocation2 + $0x8] sm:$0xff] %vm1114_vm14, %v1108_v55 }
 0x5dc   :  { %v1340_v58 = vpop.permute.xlu0 %1339  ;;  %v1224_v62 = vpop.permute.xlu1 %1223 }
 0x5dd   :  { %1232 = vst.msk [vmem:[#allocation2 + $0x8] sm:$0xff] %vm1230_vm15, %v1224_v62 }
 0x5de   :  { %1348 = vst.msk [vmem:[#allocation2 + $0x8] sm:$0xff] %vm1346_vm0, %v1340_v58 }
 0x5e0   :  { %v1110_v0 = vpop.permute.xlu1 %1109  ;;  %v1226_v3 = vpop.permute.xlu0 %1225  ;;  %v1351_v6 = vld [vmem:[#allocation2] sm:$0xff] }
 0x5e1   :  { %1118 = vst.msk [vmem:[#allocation2 + $0x10] sm:$0x3] %vm1117_vm2, %v1110_v0  ;;  %3927 = vmatmul.mubr.msk.f32.vlgmr.msra.gmra.mrb[24].mxu0 %vm249_vm4, %v1351_v6 }
 0x5e2   :  { %1234 = vst.msk [vmem:[#allocation2 + $0x10] sm:$0x3] %vm1233_vm3, %v1226_v3  ;;  %3929 = vmatprep.mubr.msk.f32.mxu0 %vm4602_vm1, %v4601_v2  ;;  %4264 = vmatpush3.bf16.msra.mxu0 %v4263_v42 }
 0x5e3   :  { %4265 = vmatprep.subr.bf16.mxu0 %v4603_v4 }
 0x5e4   :  { %v1342_v7 = vpop.permute.xlu1 %1341 }
 0x5e5   :  { %1350 = vst.msk [vmem:[#allocation2 + $0x10] sm:$0x3] %vm1349_vm7, %v1342_v7  ;;  %v1352_v8 = vld [vmem:[#allocation2 + $0x8] sm:$0xff] }
 0x5e6   :  { %3930 = vmatmul.mubr.msk.f32.gmra.mrb[26].mxu0 %vm249_vm4, %v1352_v8 }
 0x5e7   :  { %3932 = vmatprep.mubr.msk.f32.mxu0 %vm4602_vm1, %v4601_v2  ;;  %4267 = vmatpush3.bf16.msra.mxu0 %v4266_v44  ;;  %v1644_v44 = vld [vmem:[%s5785_s10 + $0x70] sm:$0xff] }
 0x5e8   :  { %4268 = vmatprep.subr.bf16.mxu0 %v4603_v4 }
 0x5eb   :  { %4270 = vmatpush3.bf16.msra.mxu0 %v4269_v46 }
 0x5ec   :  { %v1353_v9 = vld [vmem:[#allocation2 + $0x10] sm:$0x3]  ;;  %4271 = vmatprep.subr.bf16.mxu0 %v4603_v4 }
 0x5ed   :  { %3933 = vmatmul.mubr.msk.f32.gmra.mrb[28].mxu0 %vm249_vm4, %v1353_v9 }
 0x5ee   :  { %3984 = vmatprep.mubr.msk.f32.mxu0 %vm4602_vm1, %v4601_v2 }
 0x5ef   :  { %4273 = vmatpush3.bf16.msra.mxu0 %v4272_v33 }
 0x5f0   :  { %4274 = vmatprep.subr.bf16.mxu0 %v4603_v4 }
 0x5f3   :  { %4276 = vmatpush3.bf16.msra.mxu0 %v4275_v38 }
 0x5f4   :  { %4277 = vmatprep.subr.bf16.mxu0 %v4603_v4 }
 0x5f7   :  { %4279 = vmatpush3.bf16.msra.mxu0 %v4278_v56 }
 0x5f8   :  { %4280 = vmatprep.subr.bf16.mxu0 %v4603_v4 }
 0x5fb   :  { %4282 = vmatpush3.bf16.msra.mxu0 %v4281_v49  ;;  %v3487_v49 = vld [vmem:[%s5786_s11] ss:$0 sm:$0xff] }
 0x5fc   :  { %4283 = vmatprep.subr.bf16.mxu0 %v4603_v4 }
 0x6b4   :  { %v1440_v14 = vpop.f32.mrb[24].mxu0 }
 0x6b5   :  { %v1441_v16 = vadd.f32 %v3477_v10, %v1440_v14  ;;  %v3928_v17 = vpop.f32.mrb[25].mxu0 }
 0x6b7   :  { %v5137_v50 = vadd.f32 %v1441_v16, %v4767_v19 }
 0x6b9   :  { %v1445_v18 = vpop.f32.mrb[26].mxu0  ;;  %v1459_v20 = vsel %vm249_vm4, %v5137_v50, 0.0  ;;  %v1473_v23 = vmul.f32 %v5137_v50, %v5137_v50 }
 0x6ba   :  { %v1446_v25 = vadd.f32 %v3477_v10, %v1445_v18  ;;  %1460 = vadd.xlane.f32.xlu0 %v1459_v20  ;;  %v3931_v60 = vpop.f32.mrb[27].mxu0 }
 0x6bb   :  { %v1476_v53 = vsel %vm249_vm4, %v1473_v23, 0.0 }
 0x6bc   :  { %v5145_v61 = vadd.f32 %v1446_v25, %v4771_v21  ;;  %1477 = vadd.xlane.f32.xlu1 %v1476_v53 }
 0x6be   :  { %v1462_v19 = vsel %vm249_vm4, %v5145_v61, 0.0  ;;  %v1474_v15 = vmul.f32 %v5145_v61, %v5145_v61 }
 0x6bf   :  { %1463 = vadd.xlane.f32.xlu0 %v1462_v19 }
 0x6c0   :  { %v1450_v54 = vpop.f32.mrb[28].mxu0  ;;  %v1479_v1 = vsel %vm249_vm4, %v1474_v15, 0.0 }
 0x6c1   :  { %v1451_v26 = vadd.f32 %v3477_v10, %v1450_v54  ;;  %v3934_v63 = vpop.f32.mrb[29].mxu0 }
 0x6c3   :  { %v5153_v27 = vadd.f32 %v1451_v26, %v4777_v24  ;;  %1480 = vadd.xlane.f32.xlu0 %v1479_v1  ;;  %v1528_v24 = vld [vmem:[%s5783_s8 + $0x8] sm:$0xff] }
 0x6c4   :  { %v4257_v29 = vpack.c.bf16 %v1528_v24, %v1527_v13  ;;  %v3482_v13 = vld [vmem:[%s5788_s13] ss:$0 sm:$0xff] }
 0x6c5   :  { %v1466_v21 = vsel %vm1465_vm8, %v5153_v27, 0.0  ;;  %v1475_v28 = vmul.f32 %v5153_v27, %v5153_v27 }
 0x6c6   :  { %1467 = vadd.xlane.f32.xlu1 %v1466_v21  ;;  %4258 = vmatpush3.bf16.msra.mxu1 %v4257_v29  ;;  %v3481_v21 = vld [vmem:[%s5787_s12] ss:$0 sm:$0xff] }
 0x6c7   :  { %v1482_v5 = vsel %vm1465_vm8, %v1475_v28, 0.0  ;;  %4259 = vmatprep.subr.bf16.mxu1 %v4603_v4 }
 0x6c8   :  { %1483 = vadd.xlane.f32.xlu0 %v1482_v5 }
 0x6ca   :  { %4261 = vmatpush3.bf16.msra.mxu1 %v4260_v36 }
 0x6cb   :  { %4286 = vmatprep.subr.bf16.mxu1 %v4603_v4 }
 0x747   :  { %v1461_v55 = vpop.xlane.xlu0 %1460 }
 0x748   :  { %v1470_v58 = vmul.f32 0.03125, %v1461_v55 }
 0x749   :  { %v1478_v62 = vpop.xlane.xlu1 %1477 }
 0x74a   :  { %v1488_v0 = vmul.f32 %v1470_v58, %v1470_v58  ;;  %v1485_v3 = vmul.f32 0.03125, %v1478_v62  ;;  %v1497_v63 = vsub.f32 %v5137_v50, %v1470_v58 }
 0x74c   :  { %v1491_v6 = vsub.f32 %v1485_v3, %v1488_v0  ;;  %v1464_v7 = vpop.xlane.xlu0 %1463 }
 0x74d   :  { %v1471_v8 = vmul.f32 0.03125, %v1464_v7 }
 0x74e   :  { %v1494_v9 = vmax.f32 %v1491_v6, 0.0 }
 0x74f   :  { %v1489_v16 = vmul.f32 %v1471_v8, %v1471_v8  ;;  %v1498_v31 = vsub.f32 %v5145_v61, %v1471_v8 }
 0x750   :  { %v1500_v10 = vadd.f32 1e-05, %v1494_v9  ;;  %v1481_v14 = vpop.xlane.xlu0 %1480 }
 0x751   :  { %v1486_v17 = vmul.f32 0.03125, %v1481_v14 }
 0x752   :  { %4509 = vrsqrt.f32 %v1500_v10 }
 0x753   :  { %v1492_v18 = vsub.f32 %v1486_v17, %v1489_v16  ;;  %v1468_v20 = vpop.xlane.xlu1 %1467 }
 0x754   :  { %v1472_v23 = vmul.f32 0.03125, %v1468_v20 }
 0x755   :  { %v1495_v25 = vmax.f32 %v1492_v18, 0.0  ;;  %v1484_v60 = vpop.xlane.xlu0 %1483 }
 0x756   :  { %v1490_v53 = vmul.f32 %v1472_v23, %v1472_v23  ;;  %v1487_v19 = vmul.f32 0.03125, %v1484_v60  ;;  %v1499_v37 = vsub.f32 %v5153_v27, %v1472_v23  ;;  %v1645_v27 = vld [vmem:[%s5785_s10 + $0x78] sm:$0xff] }
 0x757   :  { %v1501_v15 = vadd.f32 1e-05, %v1495_v25  ;;  %v4284_v35 = vpack.c.bf16 %v1645_v27, %v1644_v44 }
 0x758   :  { %v1493_v54 = vsub.f32 %v1487_v19, %v1490_v53 }
 0x759   :  { %4511 = vrsqrt.f32 %v1501_v15  ;;  %4285 = vmatpush3.bf16.msra.mxu0 %v4284_v35 }
 0x75a   :  { %v1496_v26 = vmax.f32 %v1493_v54, 0.0  ;;  %4300 = vmatprep.subr.bf16.mxu0 %v4603_v4  ;;  %v3490_v54 = vld [vmem:[%s5779_s4 + $0x20] sm:$0xff] }
 0x75c   :  { %v4510_v1 = vpop.eup %4509  ;;  %v1502_v28 = vadd.f32 1e-05, %v1496_v26  ;;  %v3491_v26 = vld [vmem:[%s5779_s4 + $0x28] sm:$0xff] }
 0x75d   :  { %v1506_v5 = vmul.f32 %v4510_v1, %v1497_v63  ;;  %v4287_v63 = vpack.c.bf16 %v3491_v26, %v3490_v54  ;;  %v3492_v1 = vld [vmem:[%s5779_s4 + $0x30] sm:$0xff] }
 0x75e   :  { %4513 = vrsqrt.f32 %v1502_v28 }
 0x75f   :  { %v1515_v24 = vmul.f32 %v3481_v21, %v1506_v5 }
 0x761   :  { %v1524_v29 = vadd.f32 %v3482_v13, %v1515_v24 }
 0x763   :  { %v4512_v32 = vpop.eup %4511  ;;  %3944 = vmatmul.mubr.msk.f32.vlgmr.msra.gmra.mrb[36].mxu1 %vm249_vm4, %v1524_v29 }
 0x764   :  { %3946 = vmatprep.mubr.msk.f32.mxu1 %vm4602_vm1, %v4601_v2  ;;  %v1507_v50 = vmul.f32 %v4512_v32, %v1498_v31  ;;  %4288 = vmatpush3.bf16.msra.mxu1 %v4287_v63 }
 0x765   :  { %4289 = vmatprep.subr.bf16.mxu1 %v4603_v4 }
 0x766   :  { %v1516_v36 = vmul.f32 %v3481_v21, %v1507_v50 }
 0x768   :  { %v4514_v39 = vpop.eup %4513  ;;  %v1525_v40 = vadd.f32 %v3482_v13, %v1516_v36 }
 0x769   :  { %v1508_v42 = vmul.f32 %v4514_v39, %v1499_v37 }
 0x76a   :  { %3947 = vmatmul.mubr.msk.f32.gmra.mrb[38].mxu1 %vm249_vm4, %v1525_v40 }
 0x76b   :  { %3949 = vmatprep.mubr.msk.f32.mxu1 %vm4602_vm1, %v4601_v2  ;;  %v1517_v43 = vmul.f32 %v3481_v21, %v1508_v42  ;;  %v3493_v21 = vld [vmem:[%s5779_s4 + $0x38] sm:$0xff] }
 0x76c   :  { %v4290_v28 = vpack.c.bf16 %v3493_v21, %v3492_v1 }
 0x76d   :  { %v1526_v61 = vadd.f32 %v3482_v13, %v1517_v43 }
 0x76e   :  { %4291 = vmatpush3.bf16.msra.mxu1 %v4290_v28 }
 0x76f   :  { %3950 = vmatmul.mubr.msk.f32.gmra.mrb[40].mxu1 %vm249_vm4, %v1526_v61  ;;  %4292 = vmatprep.subr.bf16.mxu1 %v4603_v4 }
 0x770   :  { %4001 = vmatprep.mubr.msk.f32.mxu1 %vm4602_vm1, %v4601_v2 }
 0x836   :  { %v1613_v46 = vpop.f32.mrb[36].mxu1 }
 0x837   :  { %v1614_v45 = vadd.f32 %v3483_v22, %v1613_v46  ;;  %v3945_v47 = vpop.f32.mrb[37].mxu1 }
 0x839   :  { %v1627_v33 = vmax.f32 %v1614_v45, 0.0 }
 0x83b   :  { %3985 = vmatmul.mubr.f32.vlgmr.msra.gmra.mrb[30].mxu0 %v1627_v33 }
 0x83c   :  { %3987 = vmatprep.mubr.msk.f32.mxu0 %vm4602_vm1, %v4601_v2 }
 0x83d   :  { %v1618_v48 = vpop.f32.mrb[38].mxu1 }
 0x83e   :  { %v1619_v34 = vadd.f32 %v3483_v22, %v1618_v48  ;;  %v3948_v38 = vpop.f32.mrb[39].mxu1 }
 0x840   :  { %v1628_v51 = vmax.f32 %v1619_v34, 0.0 }
 0x842   :  { %v1623_v52 = vpop.f32.mrb[40].mxu1  ;;  %3988 = vmatmul.mubr.f32.gmra.mrb[32].mxu0 %v1628_v51  ;;  %v3488_v51 = vld [vmem:[%s5789_s14] ss:$0 sm:$0xff] }
 0x843   :  { %v1624_v56 = vadd.f32 %v3483_v22, %v1623_v52  ;;  %v3951_v57 = vpop.f32.mrb[41].mxu1  ;;  %3990 = vmatprep.mubr.msk.f32.mxu0 %vm4602_vm1, %v4601_v2 }
 0x844   :  { %v3489_v57 = vld [vmem:[%s5790_s15] ss:$0 sm:$0xff] }
 0x845   :  { %v1629_v59 = vmax.f32 %v1624_v56, 0.0 }
 0x847   :  { %3991 = vmatmul.mubr.f32.gmra.mrb[34].mxu0 %v1629_v59 }
 0x848   :  { %4046 = vmatprep.mubr.msk.f32.mxu0 %vm4602_vm1, %v4601_v2 }
 0x90e   :  { %v1719_v55 = vpop.f32.mrb[30].mxu0 }
 0x90f   :  { %v1720_v58 = vadd.f32 %v3487_v49, %v1719_v55  ;;  %v3986_v62 = vpop.f32.mrb[31].mxu0 }
 0x911   :  { %v5260_v0 = vadd.f32 %v1720_v58, %v1524_v29 }
 0x913   :  { %v1738_v3 = vsel %vm249_vm4, %v5260_v0, 0.0  ;;  %v1750_v6 = vmul.f32 %v5260_v0, %v5260_v0 }
 0x914   :  { %1739 = vadd.xlane.f32.xlu1 %v1738_v3 }
 0x915   :  { %v1724_v7 = vpop.f32.mrb[32].mxu0  ;;  %v1753_v8 = vsel %vm249_vm4, %v1750_v6, 0.0 }
 0x916   :  { %v1725_v9 = vadd.f32 %v3487_v49, %v1724_v7  ;;  %1754 = vadd.xlane.f32.xlu0 %v1753_v8  ;;  %v3989_v10 = vpop.f32.mrb[33].mxu0 }
 0x918   :  { %v5267_v14 = vadd.f32 %v1725_v9, %v1525_v40 }
 0x91a   :  { %v1729_v16 = vpop.f32.mrb[34].mxu0  ;;  %v1741_v17 = vsel %vm249_vm4, %v5267_v14, 0.0  ;;  %v1751_v18 = vmul.f32 %v5267_v14, %v5267_v14 }
 0x91b   :  { %v1730_v20 = vadd.f32 %v3487_v49, %v1729_v16  ;;  %1742 = vadd.xlane.f32.xlu1 %v1741_v17  ;;  %v3992_v23 = vpop.f32.mrb[35].mxu0  ;;  %v3495_v17 = vld [vmem:[%s5780_s5 + $0x1] ss:$0 sm:$0xff]  ;;  %s5819_s5 = smov 112  }
 0x91c   :  { %v1756_v25 = vsel %vm249_vm4, %v1751_v18, 0.0 }
 0x91d   :  { %v1735_v60 = vadd.f32 %v1730_v20, %v1526_v61  ;;  %1757 = vadd.xlane.f32.xlu0 %v1756_v25 }
 0x91f   :  { %v1744_v53 = vsel %vm1465_vm8, %v1735_v60, 0.0  ;;  %v1752_v19 = vmul.f32 %v1735_v60, %v1735_v60 }
 0x920   :  { %1745 = vadd.xlane.f32.xlu1 %v1744_v53 }
 0x921   :  { %v1759_v15 = vsel %vm1465_vm8, %v1752_v19, 0.0 }
 0x922   :  { %1760 = vadd.xlane.f32.xlu0 %v1759_v15 }
 0x9a1   :  { %v1740_v5 = vpop.xlane.xlu1 %1739 }
 0x9a2   :  { %v1747_v13 = vmul.f32 0.03125, %v1740_v5 }
 0x9a3   :  { %v1755_v24 = vpop.xlane.xlu0 %1754 }
 0x9a4   :  { %v1765_v29 = vmul.f32 %v1747_v13, %v1747_v13  ;;  %v1762_v31 = vmul.f32 0.03125, %v1755_v24  ;;  %v1774_v34 = vsub.f32 %v5260_v0, %v1747_v13 }
 0x9a6   :  { %v1768_v32 = vsub.f32 %v1762_v31, %v1765_v29 }
 0x9a8   :  { %v1771_v50 = vmax.f32 %v1768_v32, 0.0  ;;  %v1743_v36 = vpop.xlane.xlu1 %1742 }
 0x9a9   :  { %v1748_v37 = vmul.f32 0.03125, %v1743_v36 }
 0x9aa   :  { %v1777_v39 = vadd.f32 1e-05, %v1771_v50  ;;  %v1758_v40 = vpop.xlane.xlu0 %1757 }
 0x9ab   :  { %v1766_v42 = vmul.f32 %v1748_v37, %v1748_v37  ;;  %v1763_v43 = vmul.f32 0.03125, %v1758_v40  ;;  %v1775_v55 = vsub.f32 %v5267_v14, %v1748_v37 }
 0x9ac   :  { %4515 = vrsqrt.f32 %v1777_v39 }
 0x9ad   :  { %v1769_v61 = vsub.f32 %v1763_v43, %v1766_v42  ;;  %v1746_v44 = vpop.xlane.xlu1 %1745 }
 0x9ae   :  { %v1749_v27 = vmul.f32 0.03125, %v1746_v44 }
 0x9af   :  { %v1772_v35 = vmax.f32 %v1769_v61, 0.0  ;;  %v1761_v22 = vpop.xlane.xlu0 %1760 }
 0x9b0   :  { %v1767_v46 = vmul.f32 %v1749_v27, %v1749_v27  ;;  %v1764_v45 = vmul.f32 0.03125, %v1761_v22  ;;  %v1776_v3 = vsub.f32 %v1735_v60, %v1749_v27 }
 0x9b1   :  { %v1778_v47 = vadd.f32 1e-05, %v1772_v35 }
 0x9b2   :  { %v1770_v33 = vsub.f32 %v1764_v45, %v1767_v46 }
 0x9b3   :  { %4517 = vrsqrt.f32 %v1778_v47 }
 0x9b4   :  { %v1773_v48 = vmax.f32 %v1770_v33, 0.0 }
 0x9b6   :  { %v4516_v38 = vpop.eup %4515  ;;  %v1779_v52 = vadd.f32 1e-05, %v1773_v48 }
 0x9b7   :  { %v1783_v56 = vmul.f32 %v4516_v38, %v1774_v34 }
 0x9b8   :  { %4519 = vrsqrt.f32 %v1779_v52 }
 0x9b9   :  { %v1792_v59 = vmul.f32 %v3488_v51, %v1783_v56 }
 0x9bb   :  { %v5297_v49 = vadd.f32 %v3489_v57, %v1792_v59 }
 0x9bd   :  { %v4518_v58 = vpop.eup %4517  ;;  %4002 = vmatmul.mubr.msk.f32.vlgmr.msra.gmra.mrb[42].mxu1 %vm249_vm4, %v5297_v49 }
 0x9be   :  { %4004 = vmatprep.mubr.msk.f32.mxu1 %vm4602_vm1, %v4601_v2  ;;  %v1784_v62 = vmul.f32 %v4518_v58, %v1775_v55 }
 0x9c0   :  { %v1793_v0 = vmul.f32 %v3488_v51, %v1784_v62 }
 0x9c2   :  { %v4520_v6 = vpop.eup %4519  ;;  %v5304_v7 = vadd.f32 %v3489_v57, %v1793_v0 }
 0x9c3   :  { %v1785_v8 = vmul.f32 %v4520_v6, %v1776_v3 }
 0x9c4   :  { %4005 = vmatmul.mubr.msk.f32.gmra.mrb[44].mxu1 %vm249_vm4, %v5304_v7 }
 0x9c5   :  { %4007 = vmatprep.mubr.msk.f32.mxu1 %vm4602_vm1, %v4601_v2  ;;  %v1794_v9 = vmul.f32 %v3488_v51, %v1785_v8 }
 0x9c7   :  { %v5310_v10 = vadd.f32 %v3489_v57, %v1794_v9 }
 0x9c9   :  { %4008 = vmatmul.mubr.msk.f32.gmra.mrb[46].mxu1 %vm249_vm4, %v5310_v10 }
 0x9ca   :  { %4016 = vmatprep.mubr.msk.f32.mxu1 %vm4602_vm1, %v4601_v2 }
 0xa90   :  { %v1892_v14 = vpop.f32.mrb[42].mxu1 }
 0xa91   :  { %v4003_v16 = vpop.f32.mrb[43].mxu1  ;;  %v1893_v20 = vadd.f32 %v3495_v17, %v1892_v14 }
 0xa97   :  { %v1897_v18 = vpop.f32.mrb[44].mxu1 }
 0xa98   :  { %v5319_v23 = vadd.f32 %v3495_v17, %v1897_v18  ;;  %v4006_v25 = vpop.f32.mrb[45].mxu1 }
 0xa9a   :  { %v5322_v60 = vpack.i.bf16 %v5319_v23, %v1893_v20 }
 0xa9c   :  { %4422 = vrot.lane.b32.xlu1 %v5322_v60, %s4605_s2  ;;  %v1902_v53 = vpop.f32.mrb[46].mxu1 }
 0xa9d   :  { %v5326_v19 = vadd.f32 %v3495_v17, %v1902_v53  ;;  %v4009_v15 = vpop.f32.mrb[47].mxu1 }
 0xa9f   :  { %1913 = vrot.lane.b32.xlu0 %v5326_v19, %s4605_s2  ;;  %s5821_s2 = smov 64  }
 0xaa0   :  { %4427 = vrot.lane.b32.xlu1 %v5322_v60, %s4604_s22 }
 0xaa3   :  { %4432 = vrot.lane.b32.xlu0 %v5322_v60, %s4607_s24 }
 0xaa4   :  { %2017 = vrot.lane.b32.xlu1 %v5326_v19, %s4604_s22  ;;  %s5820_s22 = smov 56  }
 0xaa7   :  { %2007 = vrot.lane.b32.xlu0 %v1893_v20, %s4608_s25 }
 0xaa8   :  { %4437 = vrot.lane.b32.xlu1 %v5322_v60, %s4606_s23 }
 0xaab   :  { %2011 = vrot.lane.b32.xlu0 %v5326_v19, %s4608_s25 }
 0xaac   :  { %2009 = vrot.lane.b32.xlu1 %v5319_v23, %s4608_s25  ;;  %s5824_s25 = smov 8  }
 0xaaf   :  { %2225 = vrot.lane.b32.xlu0 %v5326_v19, %s4606_s23  ;;  %s5822_s23 = smov 48  }
 0xab0   :  { %2121 = vrot.lane.b32.xlu1 %v5326_v19, %s4607_s24  ;;  %s5823_s24 = smov 40  }
 0xab3   :  { %2215 = vrot.lane.b32.xlu0 %v1893_v20, %s4610_s27 }
 0xab4   :  { %2111 = vrot.lane.b32.xlu1 %v1893_v20, %s5819_s5 }
 0xb0e   :  { %v4423_v54 = vpop.permute.xlu1 %4422 }
 0xb0f   :  { %v4425_v26 = vunpack.i.h.bf16 %v4423_v54  ;;  %v4424_v63 = vunpack.i.l.bf16 %v4423_v54 }
 0xb11   :  { %v4293_v1 = vpack.c.bf16 %v4425_v26, %v4424_v63  ;;  %v1914_v21 = vpop.permute.xlu0 %1913 }
 0xb12   :  { %v4428_v28 = vpop.permute.xlu1 %4427 }
 0xb13   :  { %4295 = vmatpush3.bf16.xpose.msk.msra.mxu1 %vm4822_vm6, %v4293_v1  ;;  %v4430_v32 = vunpack.i.h.bf16 %v4428_v28  ;;  %v4429_v50 = vunpack.i.l.bf16 %v4428_v28 }
 0xb14   :  { %4014 = vmatprep.subr.mxu1 %v4601_v2 }
 0xb15   :  { %v4433_v5 = vpop.permute.xlu0 %4432  ;;  %v4297_v37 = vpack.c.bf16 %v4430_v32, %v4429_v50 }
 0xb16   :  { %v4435_v13 = vunpack.i.h.bf16 %v4433_v5  ;;  %v4434_v24 = vunpack.i.l.bf16 %v4433_v5  ;;  %v2018_v29 = vpop.permute.xlu1 %2017 }
 0xb18   :  { %v4301_v31 = vpack.c.bf16 %v4435_v13, %v4434_v24 }
 0xb19   :  { %v2008_v42 = vpop.permute.xlu0 %2007 }
 0xb1a   :  { %4303 = vmatpush3.bf16.xpose.msk.msra.mxu0 %vm4822_vm6, %v4301_v31  ;;  %v4438_v36 = vpop.permute.xlu1 %4437 }
 0xb1b   :  { %4015 = vmatpush3.xpose.msk.msra.mxu1 %vm348_vm5, %v1914_v21  ;;  %4044 = vmatprep.subr.mxu0 %v4601_v2  ;;  %v4440_v43 = vunpack.i.h.bf16 %v4438_v36  ;;  %v4439_v61 = vunpack.i.l.bf16 %v4438_v36 }
 0xb1c   :  { %4296 = vmatprep.subr.bf16.mxu1 %v4603_v4 }
 0xb1d   :  { %v4305_v27 = vpack.c.bf16 %v4440_v43, %v4439_v61  ;;  %v2012_v35 = vpop.permute.xlu0 %2011 }
 0xb1e   :  { %v2010_v39 = vpop.permute.xlu1 %2009  ;;  %4017 = vmatmul.mubr.msk.f32.vlgmr.msra.gmra.mrb[48].mxu1 %vm348_vm5, %v1893_v20 }
 0xb1f   :  { %4299 = vmatpush3.bf16.xpose.msk.msra.mxu1 %vm4822_vm6, %v4297_v37  ;;  %4019 = vmatprep.mubr.msk.f32.mxu1 %vm4602_vm1, %v4601_v2 }
 0xb20   :  { %4029 = vmatprep.subr.mxu1 %v4601_v2 }
 0xb21   :  { %v2226_v22 = vpop.permute.xlu0 %2225 }
 0xb22   :  { %v2122_v40 = vpop.permute.xlu1 %2121  ;;  %4020 = vmatmul.mubr.msk.f32.gmra.mrb[50].mxu1 %vm348_vm5, %v5319_v23 }
 0xb23   :  { %4045 = vmatpush3.xpose.msk.msra.mxu0 %vm348_vm5, %v2122_v40  ;;  %4022 = vmatprep.mubr.msk.f32.mxu1 %vm4602_vm1, %v4601_v2 }
 0xb24   :  { %4308 = vmatprep.subr.bf16.mxu0 %v4603_v4 }
 0xb25   :  { %v2216_v41 = vpop.permute.xlu0 %2215 }
 0xb26   :  { %v2112_v44 = vpop.permute.xlu1 %2111  ;;  %4023 = vmatmul.mubr.msk.f32.gmra.mrb[52].mxu1 %vm348_vm5, %v5326_v19 }
 0xb27   :  { %4030 = vmatpush3.xpose.msk.msra.mxu1 %vm348_vm5, %v2018_v29  ;;  %4047 = vmatmul.mubr.msk.f32.vlgmr.msra.gmra.mrb[36].mxu0 %vm348_vm5, %v2112_v44 }
 0xb28   :  { %4031 = vmatprep.mubr.msk.f32.mxu1 %vm4602_vm1, %v4601_v2  ;;  %4304 = vmatprep.subr.bf16.mxu1 %v4603_v4 }
 0xb29   :  { %4049 = vmatprep.mubr.msk.f32.mxu0 %vm4602_vm1, %v4601_v2 }
 0xb2a   :  { %4032 = vmatmul.mubr.msk.f32.vlgmr.msra.gmra.mrb[54].mxu1 %vm348_vm5, %v2008_v42 }
 0xb2b   :  { %4307 = vmatpush3.bf16.xpose.msk.msra.mxu1 %vm4822_vm6, %v4305_v27  ;;  %4034 = vmatprep.mubr.msk.f32.mxu1 %vm4602_vm1, %v4601_v2 }
 0xb2c   :  { %4059 = vmatprep.subr.mxu1 %v4601_v2 }
 0xb2e   :  { %4035 = vmatmul.mubr.msk.f32.gmra.mrb[56].mxu1 %vm348_vm5, %v2010_v39 }
 0xb2f   :  { %4037 = vmatprep.mubr.msk.f32.mxu1 %vm4602_vm1, %v4601_v2 }
 0xb32   :  { %4038 = vmatmul.mubr.msk.f32.gmra.mrb[58].mxu1 %vm348_vm5, %v2012_v35 }
 0xb33   :  { %4060 = vmatpush3.xpose.msk.msra.mxu1 %vm348_vm5, %v2226_v22  ;;  %4061 = vmatprep.mubr.msk.f32.mxu1 %vm4602_vm1, %v4601_v2 }
 0xb34   :  { %4311 = vmatprep.subr.bf16.mxu1 %v4603_v4 }
 0xb36   :  { %4062 = vmatmul.mubr.msk.f32.vlgmr.msra.gmra.mrb[60].mxu1 %vm348_vm5, %v2216_v41 }
 0xb37   :  { %4064 = vmatprep.mubr.msk.f32.mxu1 %vm4602_vm1, %v4601_v2 }
 0xbf1   :  { %v1993_v46 = vpop.f32.mrb[48].mxu1 }
 0xbf2   :  { %v2319_v45 = vadd.f32 %v1993_v46, %v4886_v11  ;;  %v4018_v47 = vpop.f32.mrb[49].mxu1 }
 0xbf4   :  { %v2331_v33 = vsel %vm765_vm9, %v2319_v45, -inf }
 0xbf5   :  { %2332 = vmax.xlane.f32.xlu1 %v2331_v33  ;;  %v1998_v48 = vpop.f32.mrb[50].mxu1 }
 0xbf6   :  { %v2320_v34 = vadd.f32 %v1998_v48, %v4892_v12  ;;  %v4021_v38 = vpop.f32.mrb[51].mxu1 }
 0xbf8   :  { %v2334_v51 = vsel %vm765_vm9, %v2320_v34, -inf }
 0xbf9   :  { %2335 = vmax.xlane.f32.xlu0 %v2334_v51  ;;  %v2003_v52 = vpop.f32.mrb[52].mxu1 }
 0xbfa   :  { %v2321_v56 = vadd.f32 %v2003_v52, %v4901_v30  ;;  %v4024_v57 = vpop.f32.mrb[53].mxu1  ;;  %v2201_v59 = vpop.f32.mrb[36].mxu0 }
 0xbfb   :  { %v2325_v55 = vadd.f32 %v2201_v59, %v4886_v11  ;;  %v4048_v58 = vpop.f32.mrb[37].mxu0 }
 0xbfc   :  { %v2337_v62 = vsel %vm772_vm11, %v2321_v56, -inf }
 0xbfd   :  { %2338 = vmax.xlane.f32.xlu0 %v2337_v62  ;;  %v2097_v0 = vpop.f32.mrb[54].mxu1  ;;  %v2349_v3 = vsel %vm765_vm9, %v2325_v55, -inf }
 0xbfe   :  { %v2322_v6 = vadd.f32 %v2097_v0, %v4886_v11  ;;  %v4033_v8 = vpop.f32.mrb[55].mxu1  ;;  %2350 = vmax.xlane.f32.xlu1 %v2349_v3 }
 0xc00   :  { %v2340_v9 = vsel %vm765_vm9, %v2322_v6, -inf }
 0xc01   :  { %2341 = vmax.xlane.f32.xlu0 %v2340_v9  ;;  %v2102_v14 = vpop.f32.mrb[56].mxu1 }
 0xc02   :  { %v4036_v16 = vpop.f32.mrb[57].mxu1  ;;  %v5418_v53 = vadd.f32 %v2102_v14, %v4892_v12 }
 0xc04   :  { %v2343_v54 = vsel %vm765_vm9, %v5418_v53, -inf }
 0xc05   :  { %v2107_v17 = vpop.f32.mrb[58].mxu1 }
 0xc06   :  { %v4039_v18 = vpop.f32.mrb[59].mxu1  ;;  %v5421_v15 = vadd.f32 %v2107_v17, %v4901_v30 }
 0xc09   :  { %v2305_v20 = vpop.f32.mrb[60].mxu1 }
 0xc0a   :  { %v4063_v25 = vpop.f32.mrb[61].mxu1  ;;  %v5426_v26 = vadd.f32 %v2305_v20, %v4886_v11 }
 0xc0c   :  { %v2358_v63 = vsel %vm765_vm9, %v5426_v26, -inf }
 0xc0f   :  { %2115 = vrot.lane.b32.xlu1 %v5326_v19, %s5819_s5 }
 0xc13   :  { %4447 = vrot.lane.b32.xlu1 %v5322_v60, %s5820_s22 }
 0xc17   :  { %2113 = vrot.lane.b32.xlu0 %v5319_v23, %s5819_s5 }
 0xc1b   :  { %2217 = vrot.lane.b32.xlu0 %v5319_v23, %s4610_s27  ;;  %v2346_v23 = vsel %vm772_vm11, %v5421_v15, -inf }
 0xc1f   :  { %2219 = vrot.lane.b32.xlu0 %v5326_v19, %s4610_s27 }
 0xc23   :  { %4442 = vrot.lane.b32.xlu0 %v5322_v60, %s5821_s2 }
 0xc37   :  { %2344 = vmax.xlane.f32.xlu1 %v2343_v54 }
 0xc3b   :  { %2347 = vmax.xlane.f32.xlu1 %v2346_v23 }
 0xc3f   :  { %2359 = vmax.xlane.f32.xlu1 %v2358_v63 }
 0xc50   :  { %2467 = vrot.lane.b32.xlu1 %v5326_v19, %s5821_s2 }
 0xc82   :  { %v2333_v1 = vpop.xlane.xlu1 %2332 }
 0xc83   :  { %v2367_v21 = vsub.f32 %v2319_v45, %v2333_v1 }
 0xc85   :  { %v2379_v28 = vmul.f32 1.442695, %v2367_v21 }
 0xc86   :  { %v2336_v5 = vpop.xlane.xlu0 %2335 }
 0xc87   :  { %4521 = vpow2.f32 %v2379_v28  ;;  %v2368_v13 = vsub.f32 %v2320_v34, %v2336_v5 }
 0xc89   :  { %v2381_v31 = vmul.f32 1.442695, %v2368_v13 }
 0xc8a   :  { %v2339_v24 = vpop.xlane.xlu0 %2338 }
 0xc8b   :  { %v2351_v11 = vpop.xlane.xlu1 %2350  ;;  %v2369_v32 = vsub.f32 %v2321_v56, %v2339_v24 }
 0xc8c   :  { %v2373_v29 = vsub.f32 %v2325_v55, %v2351_v11 }
 0xc8d   :  { %v2383_v40 = vmul.f32 1.442695, %v2369_v32 }
 0xc8e   :  { %v2391_v50 = vmul.f32 1.442695, %v2373_v29  ;;  %v2342_v36 = vpop.xlane.xlu0 %2341 }
 0xc8f   :  { %v2116_v37 = vpop.permute.xlu1 %2115  ;;  %v2370_v42 = vsub.f32 %v2322_v6, %v2342_v36 }
 0xc90   :  { %4523 = vpow2.f32 %v2391_v50 }
 0xc91   :  { %v5434_v39 = vpop.eup %4521  ;;  %4525 = vpow2.f32 %v2381_v31  ;;  %v2385_v22 = vmul.f32 1.442695, %v2370_v42 }
 0xc92   :  { %v2114_v43 = vpop.permute.xlu0 %2113  ;;  %v2403_v61 = vsel %vm765_vm9, %v5434_v39, 0.0  ;;  %4527 = vpow2.f32 %v2383_v40 }
 0xc93   :  { %4050 = vmatmul.mubr.msk.f32.gmra.mrb[38].mxu0 %vm348_vm5, %v2114_v43  ;;  %2404 = vadd.xlane.f32.xlu1 %v2403_v61  ;;  %v4448_v44 = vpop.permute.xlu1 %4447  ;;  %4529 = vpow2.f32 %v2385_v22 }
 0xc94   :  { %v4450_v27 = vunpack.i.h.bf16 %v4448_v44  ;;  %v4449_v35 = vunpack.i.l.bf16 %v4448_v44  ;;  %4052 = vmatprep.mubr.msk.f32.mxu0 %vm4602_vm1, %v4601_v2 }
 0xc96   :  { %v4312_v41 = vpack.c.bf16 %v4450_v27, %v4449_v35  ;;  %v2218_v46 = vpop.permute.xlu0 %2217 }
 0xc97   :  { %4053 = vmatmul.mubr.msk.f32.gmra.mrb[40].mxu0 %vm348_vm5, %v2116_v37  ;;  %4065 = vmatmul.mubr.msk.f32.gmra.mrb[62].mxu1 %vm348_vm5, %v2218_v46 }
 0xc98   :  { %4313 = vmatpush3.bf16.msra.mxu1 %v4312_v41  ;;  %4067 = vmatprep.mubr.msk.f32.mxu1 %vm4602_vm1, %v4601_v2 }
 0xc99   :  { %4076 = vmatprep.mubr.msk.f32.mxu0 %vm4602_vm1, %v4601_v2  ;;  %4089 = vmatprep.subr.mxu1 %v4601_v2 }
 0xc9a   :  { %v5448_v45 = vpop.eup %4523  ;;  %v2220_v47 = vpop.permute.xlu0 %2219 }
 0xc9b   :  { %4068 = vmatmul.mubr.msk.f32.gmra.mrb[64].mxu1 %vm348_vm5, %v2220_v47  ;;  %v2421_v33 = vsel %vm765_vm9, %v5448_v45, 0.0  ;;  %v5453_v48 = vpop.eup %4525 }
 0xc9c   :  { %2422 = vadd.xlane.f32.xlu0 %v2421_v33  ;;  %4091 = vmatprep.mubr.msk.f32.mxu1 %vm4602_vm1, %v4601_v2  ;;  %v2406_v52 = vsel %vm765_vm9, %v5453_v48, 0.0  ;;  %v5459_v56 = vpop.eup %4527 }
 0xc9d   :  { %v2409_v59 = vsel %vm772_vm11, %v5459_v56, 0.0  ;;  %v5463_v55 = vpop.eup %4529 }
 0xc9e   :  { %v4443_v34 = vpop.permute.xlu0 %4442  ;;  %v2412_v58 = vsel %vm765_vm9, %v5463_v55, 0.0 }
 0xc9f   :  { %v4445_v38 = vunpack.i.h.bf16 %v4443_v34  ;;  %v4444_v51 = vunpack.i.l.bf16 %v4443_v34 }
 0xca0   :  { %2407 = vadd.xlane.f32.xlu0 %v2406_v52 }
 0xca1   :  { %v4309_v57 = vpack.c.bf16 %v4445_v38, %v4444_v51 }
 0xca3   :  { %4310 = vmatpush3.bf16.msra.mxu0 %v4309_v57 }
 0xca4   :  { %4452 = vrot.lane.b32.xlu1 %v5322_v60, %s5822_s23  ;;  %2410 = vadd.xlane.f32.xlu0 %v2409_v59 }
 0xca5   :  { %4074 = vmatprep.subr.mxu0 %v4601_v2 }
 0xca8   :  { %2413 = vadd.xlane.f32.xlu0 %v2412_v58 }
 0xcbe   :  { %2569 = vrot.lane.b32.xlu0 %v5326_v19, %s5820_s22 }
 0xcc2   :  { %4457 = vrot.lane.b32.xlu0 %v5322_v60, %s5823_s24 }
 0xcc4   :  { %v2345_v62 = vpop.xlane.xlu1 %2344 }
 0xcc5   :  { %v2371_v0 = vsub.f32 %v5418_v53, %v2345_v62 }
 0xcc6   :  { %2797 = vrot.lane.b32.xlu0 %v5326_v19, %s5823_s24 }
 0xcc7   :  { %v2387_v3 = vmul.f32 1.442695, %v2371_v0 }
 0xcc8   :  { %v2348_v6 = vpop.xlane.xlu1 %2347 }
 0xcc9   :  { %4531 = vpow2.f32 %v2387_v3  ;;  %v2372_v8 = vsub.f32 %v5421_v15, %v2348_v6 }
 0xccb   :  { %v2389_v9 = vmul.f32 1.442695, %v2372_v8 }
 0xccc   :  { %v2360_v14 = vpop.xlane.xlu1 %2359 }
 0xccd   :  { %4533 = vpow2.f32 %v2389_v9  ;;  %v2376_v16 = vsub.f32 %v5426_v26, %v2360_v14 }
 0xccf   :  { %v2397_v17 = vmul.f32 1.442695, %v2376_v16 }
 0xcd0   :  { %v2468_v18 = vpop.permute.xlu1 %2467 }
 0xcd1   :  { %4535 = vpow2.f32 %v2397_v17  ;;  %4075 = vmatpush3.msk.msra.mxu0 %vm916_vm12, %v2468_v18 }
 0xcd2   :  { %4314 = vmatprep.subr.bf16.mxu0 %v4603_v4 }
 0xcd3   :  { %v5481_v60 = vpop.eup %4531 }
 0xcd4   :  { %v2415_v20 = vsel %vm765_vm9, %v5481_v60, 0.0 }
 0xcd5   :  { %2416 = vadd.xlane.f32.xlu1 %v2415_v20 }
 0xcd7   :  { %v5485_v25 = vpop.eup %4533 }
 0xcd8   :  { %v2418_v53 = vsel %vm772_vm11, %v5485_v25, 0.0 }
 0xcd9   :  { %2419 = vadd.xlane.f32.xlu1 %v2418_v53 }
 0xcdb   :  { %v5489_v15 = vpop.eup %4535 }
 0xcdc   :  { %v2430_v54 = vsel %vm765_vm9, %v5489_v15, 0.0 }
 0xcdd   :  { %2431 = vadd.xlane.f32.xlu1 %v2430_v54 }
 0xcee   :  { %2683 = vrot.lane.b32.xlu1 %v5326_v19, %s5822_s23 }
 0xd20   :  { %v2405_v26 = vpop.xlane.xlu1 %2404 }
 0xd21   :  { %4537 = vrcp.f32 %v2405_v26 }
 0xd24   :  { %v4453_v23 = vpop.permute.xlu1 %4452 }
 0xd25   :  { %v4455_v63 = vunpack.i.h.bf16 %v4453_v23  ;;  %v4454_v1 = vunpack.i.l.bf16 %v4453_v23 }
 0xd27   :  { %v4315_v13 = vpack.c.bf16 %v4455_v63, %v4454_v1 }
 0xd29   :  { %v2423_v21 = vpop.xlane.xlu0 %2422 }
 0xd2b   :  { %v4538_v28 = vpop.eup %4537 }
 0xd2c   :  { %v2451_v5 = vmul.f32 %v4538_v28, %v5434_v39 }
 0xd2d   :  { %v2408_v24 = vpop.xlane.xlu0 %2407 }
 0xd2e   :  { %4539 = vrcp.f32 %v2408_v24  ;;  %4077 = vmatmul.mubr.msk.f32.vlgmr.msra.gmra.mrb[42].mxu0 %vm765_vm9, %v2451_v5 }
 0xd2f   :  { %4316 = vmatpush3.bf16.msra.mxu0 %v4315_v13  ;;  %4079 = vmatprep.mubr.msk.f32.mxu0 %vm4602_vm1, %v4601_v2 }
 0xd30   :  { %4104 = vmatprep.subr.mxu0 %v4601_v2 }
 0xd31   :  { %v2411_v19 = vpop.xlane.xlu0 %2410 }
 0xd32   :  { %4541 = vrcp.f32 %v2411_v19 }
 0xd35   :  { %v2414_v11 = vpop.xlane.xlu0 %2413 }
 0xd36   :  { %4543 = vrcp.f32 %v2414_v11 }
 0xd37   :  { %4545 = vrcp.f32 %v2423_v21 }
 0xd38   :  { %v4540_v29 = vpop.eup %4539 }
 0xd39   :  { %v2570_v31 = vpop.permute.xlu0 %2569  ;;  %v2452_v32 = vmul.f32 %v4540_v29, %v5453_v48 }
 0xd3a   :  { %4090 = vmatpush3.msk.msra.mxu1 %vm916_vm12, %v2570_v31 }
 0xd3b   :  { %4080 = vmatmul.mubr.msk.f32.gmra.mrb[44].mxu0 %vm765_vm9, %v2452_v32  ;;  %4317 = vmatprep.subr.bf16.mxu1 %v4603_v4 }
 0xd3c   :  { %v4542_v50 = vpop.eup %4541  ;;  %4082 = vmatprep.mubr.msk.f32.mxu0 %vm4602_vm1, %v4601_v2 }
 0xd3d   :  { %v4458_v36 = vpop.permute.xlu0 %4457  ;;  %v2453_v37 = vmul.f32 %v4542_v50, %v5459_v56 }
 0xd3e   :  { %v4460_v39 = vunpack.i.h.bf16 %v4458_v36  ;;  %v4459_v40 = vunpack.i.l.bf16 %v4458_v36  ;;  %v3539_v36 = vld [vmem:[%s5781_s6 + $0x20] sm:$0xff] }
 0xd3f   :  { %4083 = vmatmul.mubr.msk.f32.gmra.mrb[46].mxu0 %vm765_vm9, %v2453_v37  ;;  %v3540_v37 = vld [vmem:[%s5781_s6 + $0x28] sm:$0xff] }
 0xd40   :  { %v4544_v42 = vpop.eup %4543  ;;  %v4318_v43 = vpack.c.bf16 %v4460_v39, %v4459_v40  ;;  %4106 = vmatprep.mubr.msk.f32.mxu0 %vm4602_vm1, %v4601_v2  ;;  %v4321_v39 = vpack.c.bf16 %v3540_v37, %v3539_v36  ;;  %v3541_v40 = vld [vmem:[%s5781_s6 + $0x30] sm:$0xff] }
 0xd41   :  { %v2454_v61 = vmul.f32 %v4544_v42, %v5463_v55  ;;  %v2798_v44 = vpop.permute.xlu0 %2797  ;;  %v4546_v34 = vpop.eup %4545  ;;  %v3542_v42 = vld [vmem:[%s5781_s6 + $0x38] sm:$0xff] }
 0xd42   :  { %v2457_v59 = vmul.f32 %v4546_v34, %v5448_v45 }
 0xd43   :  { %4092 = vmatmul.mubr.msk.f32.vlgmr.msra.gmra.mrb[66].mxu1 %vm765_vm9, %v2454_v61 }
 0xd44   :  { %4319 = vmatpush3.bf16.msra.mxu1 %v4318_v43  ;;  %4094 = vmatprep.mubr.msk.f32.mxu1 %vm4602_vm1, %v4601_v2  ;;  %v4324_v43 = vpack.c.bf16 %v3542_v42, %v3541_v40 }
 0xd45   :  { %4119 = vmatprep.subr.mxu1 %v4601_v2 }
 0xd48   :  { %4120 = vmatpush3.msk.msra.mxu1 %vm916_vm12, %v2798_v44 }
 0xd49   :  { %4326 = vmatprep.subr.bf16.mxu1 %v4603_v4 }
 0xd62   :  { %v2417_v27 = vpop.xlane.xlu1 %2416 }
 0xd63   :  { %4547 = vrcp.f32 %v2417_v27 }
 0xd66   :  { %v2420_v35 = vpop.xlane.xlu1 %2419  ;;  %v2206_v22 = vpop.f32.mrb[38].mxu0 }
 0xd67   :  { %4549 = vrcp.f32 %v2420_v35  ;;  %v2326_v41 = vadd.f32 %v2206_v22, %v4892_v12  ;;  %v4051_v46 = vpop.f32.mrb[39].mxu0 }
 0xd69   :  { %v2352_v47 = vsel %vm765_vm9, %v2326_v41, -inf }
 0xd6a   :  { %v2310_v33 = vpop.f32.mrb[62].mxu1  ;;  %v2432_v48 = vpop.xlane.xlu1 %2431  ;;  %2353 = vmax.xlane.f32.xlu1 %v2352_v47 }
 0xd6b   :  { %4551 = vrcp.f32 %v2432_v48  ;;  %v2211_v38 = vpop.f32.mrb[40].mxu0  ;;  %v4066_v51 = vpop.f32.mrb[63].mxu1  ;;  %v2329_v55 = vadd.f32 %v2310_v33, %v4892_v12 }
 0xd6c   :  { %v2327_v52 = vadd.f32 %v2211_v38, %v4901_v30  ;;  %v4054_v56 = vpop.f32.mrb[41].mxu0 }
 0xd6d   :  { %v4548_v57 = vpop.eup %4547 }
 0xd6e   :  { %v2315_v58 = vpop.f32.mrb[64].mxu1  ;;  %v2684_v62 = vpop.permute.xlu1 %2683  ;;  %v2355_v0 = vsel %vm772_vm11, %v2327_v52, -inf  ;;  %v2455_v3 = vmul.f32 %v4548_v57, %v5481_v60 }
 0xd6f   :  { %v5525_v6 = vadd.f32 %v2315_v58, %v4901_v30  ;;  %2356 = vmax.xlane.f32.xlu0 %v2355_v0  ;;  %v4069_v8 = vpop.f32.mrb[65].mxu1  ;;  %4105 = vmatpush3.msk.msra.mxu0 %vm916_vm12, %v2684_v62  ;;  %v2361_v30 = vsel %vm765_vm9, %v2329_v55, -inf }
 0xd70   :  { %4095 = vmatmul.mubr.msk.f32.gmra.mrb[68].mxu1 %vm765_vm9, %v2455_v3  ;;  %4107 = vmatmul.mubr.msk.f32.vlgmr.msra.gmra.mrb[48].mxu0 %vm765_vm9, %v2457_v59 }
 0xd71   :  { %v4550_v45 = vpop.eup %4549  ;;  %v2364_v12 = vsel %vm772_vm11, %v5525_v6, -inf  ;;  %4097 = vmatprep.mubr.msk.f32.mxu1 %vm4602_vm1, %v4601_v2  ;;  %4109 = vmatprep.mubr.msk.f32.mxu0 %vm4602_vm1, %v4601_v2 }
 0xd72   :  { %2365 = vmax.xlane.f32.xlu1 %v2364_v12  ;;  %v2456_v9 = vmul.f32 %v4550_v45, %v5485_v25  ;;  %4320 = vmatprep.subr.bf16.mxu0 %v4603_v4 }
 0xd73   :  { %2362 = vmax.xlane.f32.xlu0 %v2361_v30  ;;  %4322 = vmatpush3.bf16.msra.mxu0 %v4321_v39 }
 0xd74   :  { %4098 = vmatmul.mubr.msk.f32.gmra.mrb[70].mxu1 %vm765_vm9, %v2456_v9  ;;  %4323 = vmatprep.subr.bf16.mxu0 %v4603_v4 }
 0xd75   :  { %v4552_v14 = vpop.eup %4551  ;;  %4121 = vmatprep.mubr.msk.f32.mxu1 %vm4602_vm1, %v4601_v2 }
 0xd76   :  { %v2460_v16 = vmul.f32 %v4552_v14, %v5489_v15 }
 0xd77   :  { %4325 = vmatpush3.bf16.msra.mxu0 %v4324_v43 }
 0xd78   :  { %4122 = vmatmul.mubr.msk.f32.vlgmr.msra.gmra.mrb[72].mxu1 %vm765_vm9, %v2460_v16  ;;  %4332 = vmatprep.subr.bf16.mxu0 %v4603_v4 }
 0xd79   :  { %4124 = vmatprep.mubr.msk.f32.mxu1 %vm4602_vm1, %v4601_v2 }
 0xdf7   :  { %v2354_v17 = vpop.xlane.xlu1 %2353 }
 0xdf8   :  { %v2374_v18 = vsub.f32 %v2326_v41, %v2354_v17 }
 0xdfa   :  { %v2393_v60 = vmul.f32 1.442695, %v2374_v18 }
 0xdfc   :  { %4553 = vpow2.f32 %v2393_v60  ;;  %v2357_v20 = vpop.xlane.xlu0 %2356 }
 0xdfd   :  { %v2375_v25 = vsub.f32 %v2327_v52, %v2357_v20 }
 0xdff   :  { %v2395_v53 = vmul.f32 1.442695, %v2375_v25  ;;  %v2366_v33 = vpop.xlane.xlu1 %2365 }
 0xe00   :  { %v2363_v11 = vpop.xlane.xlu0 %2362  ;;  %v2378_v48 = vsub.f32 %v5525_v6, %v2366_v33 }
 0xe01   :  { %4555 = vpow2.f32 %v2395_v53  ;;  %v2548_v54 = vpop.f32.mrb[42].mxu0  ;;  %v2377_v29 = vsub.f32 %v2329_v55, %v2363_v11  ;;  %v5597_v53 = vld [vmem:[%s5782_s7 + $0x1] ss:$0 sm:$0xff]  ;;  %v3555_v11 = vld [vmem:[%s5783_s8 + $0x38] sm:$0xff] }
 0xe02   :  { %2562 = vst.msk [vmem:[#allocation2] sm:$0xff] %vm348_vm5, %v2548_v54  ;;  %v4078_v26 = vpop.f32.mrb[43].mxu0  ;;  %v2401_v34 = vmul.f32 1.442695, %v2378_v48  ;;  %v5633_v48 = vld [vmem:[%s5788_s13 + $0x1] ss:$0 sm:$0xff] }
 0xe03   :  { %v2399_v31 = vmul.f32 1.442695, %v2377_v29 }
 0xe05   :  { %4557 = vpow2.f32 %v2399_v31 }
 0xe06   :  { %v4554_v23 = vpop.eup %4553  ;;  %4559 = vpow2.f32 %v2401_v34 }
 0xe07   :  { %v2424_v15 = vsel %vm765_vm9, %v4554_v23, 0.0 }
 0xe08   :  { %2425 = vadd.xlane.f32.xlu0 %v2424_v15 }
 0xe0b   :  { %v4556_v63 = vpop.eup %4555 }
 0xe0c   :  { %v2427_v1 = vsel %vm772_vm11, %v4556_v63, 0.0 }
 0xe0d   :  { %2428 = vadd.xlane.f32.xlu1 %v2427_v1 }
 0xe0e   :  { %v2553_v21 = vpop.f32.mrb[44].mxu0 }
 0xe0f   :  { %2563 = vst.msk [vmem:[#allocation2 + $0x8] sm:$0xff] %vm348_vm5, %v2553_v21  ;;  %v4081_v28 = vpop.f32.mrb[45].mxu0  ;;  %v4558_v32 = vpop.eup %4557 }
 0xe10   :  { %v2433_v50 = vsel %vm765_vm9, %v4558_v32, 0.0  ;;  %v4560_v38 = vpop.eup %4559 }
 0xe11   :  { %v2436_v51 = vsel %vm772_vm11, %v4560_v38, 0.0 }
 0xe12   :  { %v2558_v5 = vpop.f32.mrb[46].mxu0 }
 0xe13   :  { %2564 = vst.msk [vmem:[#allocation2 + $0x10] sm:$0x3] %vm1001_vm13, %v2558_v5  ;;  %v4084_v13 = vpop.f32.mrb[47].mxu0 }
 0xe14   :  { %v3552_v13 = vld [vmem:[%s5783_s8 + $0x20] sm:$0xff] }
 0xe16   :  { %v2650_v24 = vpop.f32.mrb[66].mxu1 }
 0xe17   :  { %v4093_v19 = vpop.f32.mrb[67].mxu1 }
 0xe18   :  { %v3554_v19 = vld [vmem:[%s5783_s8 + $0x30] sm:$0xff] }
 0xe19   :  { %v4330_v29 = vpack.c.bf16 %v3555_v11, %v3554_v19 }
 0xe1e   :  { %2667 = vrot.lane.b32.xlu0 %v2650_v24, %s5824_s25 }
 0xe3d   :  { %2434 = vadd.xlane.f32.xlu0 %v2433_v50 }
 0xe43   :  { %v2655_v61 = vpop.f32.mrb[68].mxu1  ;;  %v2764_v44 = vpop.f32.mrb[48].mxu0 }
 0xe44   :  { %v4096_v27 = vpop.f32.mrb[69].mxu1  ;;  %2781 = vrot.lane.b32.xlu1 %v2764_v44, %s5825_s29  ;;  %v4108_v35 = vpop.f32.mrb[49].mxu0 }
 0xe47   :  { %v2660_v22 = vpop.f32.mrb[70].mxu1 }
 0xe48   :  { %v4099_v41 = vpop.f32.mrb[71].mxu1 }
 0xe4b   :  { %v2878_v46 = vpop.f32.mrb[72].mxu1 }
 0xe4c   :  { %v4123_v47 = vpop.f32.mrb[73].mxu1  ;;  %2895 = vrot.lane.b32.xlu1 %v2878_v46, %s5826_s0 }
 0xe4d   :  { %v5628_v47 = vld [vmem:[%s5787_s12 + $0x1] ss:$0 sm:$0xff]  ;;  %s3419_s12 = sshll.u32 %s4619_s3, 4  ;;  %s3420_s12 = int_to_ptr.vmem [resolvable:$true] %s3419_s12 }
 0xe4e   :  { %p4582_p1 = scmp.lt.s32.totalorder %s3420_s12, %s3420_s12 }
 0xe70   :  { %2437 = vadd.xlane.f32.xlu1 %v2436_v51 }
 0xe81   :  { %2669 = vrot.lane.b32.xlu1 %v2655_v61, %s5824_s25 }
 0xe85   :  { %2671 = vrot.lane.b32.xlu1 %v2660_v22, %s5824_s25 }
 0xe95   :  { %v2426_v52 = vpop.xlane.xlu0 %2425 }
 0xe96   :  { %4561 = vrcp.f32 %v2426_v52 }
 0xe99   :  { %v2668_v56 = vpop.permute.xlu0 %2667 }
 0xe9a   :  { %v2429_v57 = vpop.xlane.xlu1 %2428  ;;  %2676 = vst.msk [vmem:[#allocation2] sm:$0xff] %vm1114_vm14, %v2668_v56  ;;  %v3561_v56 = vld [vmem:[%s5785_s10 + $0x80] sm:$0xff] }
 0xe9b   :  { %4563 = vrcp.f32 %v2429_v57  ;;  %v3562_v57 = vld [vmem:[%s5785_s10 + $0x88] sm:$0xff] }
 0xea0   :  { %v4562_v59 = vpop.eup %4561 }
 0xea1   :  { %v2458_v55 = vmul.f32 %v4562_v59, %v4554_v23  ;;  %v3563_v59 = vld [vmem:[%s5785_s10 + $0x90] sm:$0xff] }
 0xea3   :  { %4110 = vmatmul.mubr.msk.f32.gmra.mrb[50].mxu0 %vm765_vm9, %v2458_v55  ;;  %v4333_v55 = vpack.c.bf16 %v3562_v57, %v3561_v56 }
 0xea4   :  { %4112 = vmatprep.mubr.msk.f32.mxu0 %vm4602_vm1, %v4601_v2 }
 0xea5   :  { %v4564_v58 = vpop.eup %4563 }
 0xea6   :  { %v2459_v62 = vmul.f32 %v4564_v58, %v4556_v63  ;;  %v3564_v58 = vld [vmem:[%s5785_s10 + $0x98] sm:$0xff] }
 0xea8   :  { %4113 = vmatmul.mubr.msk.f32.gmra.mrb[52].mxu0 %vm765_vm9, %v2459_v62  ;;  %v4336_v62 = vpack.c.bf16 %v3564_v58, %v3563_v59 }
 0xea9   :  { %4138 = vmatprep.mubr.msk.f32.mxu0 %vm4602_vm1, %v4601_v2 }
 0xeb6   :  { %v2782_v0 = vpop.permute.xlu1 %2781 }
 0xeb7   :  { %2790 = vst.msk [vmem:[#allocation2] sm:$0xff] %vm1230_vm15, %v2782_v0  ;;  %v3565_v0 = vld [vmem:[%s5785_s10 + $0xa0] sm:$0xff] }
 0xebe   :  { %v2896_v3 = vpop.permute.xlu1 %2895 }
 0xebf   :  { %2904 = vst.msk [vmem:[#allocation2] sm:$0xff] %vm1346_vm0, %v2896_v3  ;;  %v3566_v3 = vld [vmem:[%s5785_s10 + $0xa8] sm:$0xff] }
 0xec6   :  { %v2907_v6 = vld [vmem:[#allocation2] sm:$0xff] }
 0xec7   :  { %4139 = vmatmul.mubr.msk.f32.vlgmr.msra.gmra.mrb[54].mxu0 %vm249_vm4, %v2907_v6  ;;  %v4339_v6 = vpack.c.bf16 %v3566_v3, %v3565_v0 }
 0xec8   :  { %4141 = vmatprep.mubr.msk.f32.mxu0 %vm4602_vm1, %v4601_v2  ;;  %4334 = vmatpush3.bf16.msra.mxu0 %v4333_v55 }
 0xec9   :  { %4335 = vmatprep.subr.bf16.mxu0 %v4603_v4 }
 0xeca   :  { %v2435_v8 = vpop.xlane.xlu0 %2434 }
 0xecb   :  { %4565 = vrcp.f32 %v2435_v8  ;;  %v3567_v8 = vld [vmem:[%s5785_s10 + $0xb0] sm:$0xff] }
 0xecc   :  { %4337 = vmatpush3.bf16.msra.mxu0 %v4336_v62 }
 0xecd   :  { %4338 = vmatprep.subr.bf16.mxu0 %v4603_v4 }
 0xed0   :  { %4340 = vmatpush3.bf16.msra.mxu0 %v4339_v6 }
 0xed1   :  { %4341 = vmatprep.subr.bf16.mxu0 %v4603_v4 }
 0xed5   :  { %v4566_v45 = vpop.eup %4565 }
 0xed6   :  { %v2461_v12 = vmul.f32 %v4566_v45, %v4558_v32  ;;  %v3568_v45 = vld [vmem:[%s5785_s10 + $0xb8] sm:$0xff] }
 0xed8   :  { %4125 = vmatmul.mubr.msk.f32.gmra.mrb[74].mxu1 %vm765_vm9, %v2461_v12  ;;  %v4342_v12 = vpack.c.bf16 %v3568_v45, %v3567_v8  ;;  %v3578_v45 = vld [vmem:[%s5786_s11 + $0x1] ss:$0 sm:$0xff] }
 0xed9   :  { %4127 = vmatprep.mubr.msk.f32.mxu1 %vm4602_vm1, %v4601_v2 }
 0xeda   :  { %4343 = vmatpush3.bf16.msra.mxu0 %v4342_v12 }
 0xedb   :  { %4344 = vmatprep.subr.bf16.mxu0 %v4603_v4 }
 0xefd   :  { %v2438_v30 = vpop.xlane.xlu1 %2437 }
 0xefe   :  { %4567 = vrcp.f32 %v2438_v30  ;;  %v3569_v30 = vld [vmem:[%s5785_s10 + $0xc0] sm:$0xff] }
 0xf01   :  { %v2670_v9 = vpop.permute.xlu1 %2669 }
 0xf02   :  { %2677 = vst.msk [vmem:[#allocation2 + $0x8] sm:$0xff] %vm1114_vm14, %v2670_v9  ;;  %v3570_v9 = vld [vmem:[%s5785_s10 + $0xc8] sm:$0xff] }
 0xf05   :  { %v2672_v14 = vpop.permute.xlu1 %2671 }
 0xf06   :  { %2678 = vst.msk [vmem:[#allocation2 + $0x10] sm:$0x3] %vm1117_vm2, %v2672_v14  ;;  %v4345_v14 = vpack.c.bf16 %v3570_v9, %v3569_v30 }
 0xf08   :  { %v4568_v16 = vpop.eup %4567  ;;  %4346 = vmatpush3.bf16.msra.mxu0 %v4345_v14 }
 0xf09   :  { %v2462_v17 = vmul.f32 %v4568_v16, %v4560_v38  ;;  %v3571_v16 = vld [vmem:[%s5785_s10 + $0xd0] sm:$0xff]  ;;  %4347 = vmatprep.subr.bf16.mxu0 %v4603_v4 }
 0xf0b   :  { %4128 = vmatmul.mubr.msk.f32.gmra.mrb[76].mxu1 %vm765_vm9, %v2462_v17  ;;  %v3572_v17 = vld [vmem:[%s5785_s10 + $0xd8] sm:$0xff] }
 0xf0c   :  { %4155 = vmatprep.mubr.msk.f32.mxu1 %vm4602_vm1, %v4601_v2 }
 0xf76   :  { %v2769_v18 = vpop.f32.mrb[50].mxu0 }
 0xf77   :  { %2783 = vrot.lane.b32.xlu0 %v2769_v18, %s5825_s29  ;;  %v4111_v60 = vpop.f32.mrb[51].mxu0  ;;  %v4348_v18 = vpack.c.bf16 %v3572_v17, %v3571_v16 }
 0xf78   :  { %v3573_v60 = vld [vmem:[%s5785_s10 + $0xe0] sm:$0xff] }
 0xf79   :  { %4349 = vmatpush3.bf16.msra.mxu0 %v4348_v18 }
 0xf7a   :  { %4350 = vmatprep.subr.bf16.mxu0 %v4603_v4 }
 0xf7b   :  { %v2774_v20 = vpop.f32.mrb[52].mxu0 }
 0xf7c   :  { %v4114_v25 = vpop.f32.mrb[53].mxu0 }
 0xf9a   :  { %v2998_v54 = vpop.f32.mrb[54].mxu0 }
 0xf9b   :  { %v2999_v26 = vadd.f32 %v5597_v53, %v2998_v54  ;;  %v4140_v23 = vpop.f32.mrb[55].mxu0  ;;  %v3575_v54 = vld [vmem:[%s5785_s10 + $0xf0] sm:$0xff] }
 0xf9d   :  { %v3012_v15 = vadd.f32 %v2999_v26, %v5297_v49  ;;  %v3553_v49 = vld [vmem:[%s5783_s8 + $0x28] sm:$0xff]  ;;  %v3576_v26 = vld [vmem:[%s5785_s10 + $0xf8] sm:$0xff] }
 0xf9e   :  { %v4327_v24 = vpack.c.bf16 %v3553_v49, %v3552_v13  ;;  %v4354_v23 = vpack.c.bf16 %v3576_v26, %v3575_v54  ;;  %v5710_v49 = vld [vmem:[%s5784_s9 + $0x1] ss:$0 sm:$0xff] }
 0xf9f   :  { %v3019_v63 = vsel %vm249_vm4, %v3012_v15, 0.0  ;;  %v3031_v1 = vmul.f32 %v3012_v15, %v3012_v15 }
 0xfa0   :  { %3020 = vadd.xlane.f32.xlu0 %v3019_v63  ;;  %4328 = vmatpush3.bf16.msra.mxu1 %v4327_v24 }
 0xfa1   :  { %v3034_v21 = vsel %vm249_vm4, %v3031_v1, 0.0  ;;  %4329 = vmatprep.subr.bf16.mxu1 %v4603_v4 }
 0xfa4   :  { %3035 = vadd.xlane.f32.xlu0 %v3034_v21  ;;  %4331 = vmatpush3.bf16.msra.mxu1 %v4330_v29 }
 0xfab   :  { %v2883_v28 = vpop.f32.mrb[74].mxu1 }
 0xfac   :  { %v4126_v5 = vpop.f32.mrb[75].mxu1  ;;  %2897 = vrot.lane.b32.xlu1 %v2883_v28, %s5826_s0 }
 0xfba   :  { %2785 = vrot.lane.b32.xlu0 %v2774_v20, %s5825_s29  ;;  %v3574_v20 = vld [vmem:[%s5785_s10 + $0xe8] sm:$0xff] }
 0xfbb   :  { %v4351_v25 = vpack.c.bf16 %v3574_v20, %v3573_v60  ;;  %v3331_v20 = vld [vmem:[%s5791_s16 + $0x18] sm:$0xff] }
 0xfbd   :  { %4352 = vmatpush3.bf16.msra.mxu0 %v4351_v25 }
 0xfbe   :  { %4353 = vmatprep.subr.bf16.mxu0 %v4603_v4 }
 0xfc1   :  { %4355 = vmatpush3.bf16.msra.mxu0 %v4354_v23 }
 0xfc2   :  { %4356 = vmatprep.subr.bf16.mxu0 %v4603_v4 }
 0xfde   :  { %v2888_v31 = vpop.f32.mrb[76].mxu1 }
 0xfdf   :  { %2899 = vrot.lane.b32.xlu1 %v2888_v31, %s5826_s0  ;;  %v4129_v32 = vpop.f32.mrb[77].mxu1 }
 0xfe9   :  { %v2784_v50 = vpop.permute.xlu0 %2783 }
 0xfea   :  { %2791 = vst.msk [vmem:[#allocation2 + $0x8] sm:$0xff] %vm1230_vm15, %v2784_v50 }
0x101e   :  { %v2898_v36 = vpop.permute.xlu1 %2897 }
0x101f   :  { %2905 = vst.msk [vmem:[#allocation2 + $0x8] sm:$0xff] %vm1346_vm0, %v2898_v36 }
0x1026   :  { %v2908_v37 = vld [vmem:[#allocation2 + $0x8] sm:$0xff] }
0x1027   :  { %4142 = vmatmul.mubr.msk.f32.gmra.mrb[56].mxu0 %vm249_vm4, %v2908_v37 }
0x1028   :  { %4144 = vmatprep.mubr.msk.f32.mxu0 %vm4602_vm1, %v4601_v2 }
0x102d   :  { %v3021_v39 = vpop.xlane.xlu0 %3020 }
0x102e   :  { %v3028_v40 = vmul.f32 0.03125, %v3021_v39 }
0x1030   :  { %v3046_v43 = vmul.f32 %v3028_v40, %v3028_v40  ;;  %v3055_v41 = vsub.f32 %v3012_v15, %v3028_v40 }
0x1031   :  { %v3036_v42 = vpop.xlane.xlu0 %3035 }
0x1032   :  { %v3043_v61 = vmul.f32 0.03125, %v3036_v42 }
0x1034   :  { %v3049_v44 = vsub.f32 %v3043_v61, %v3046_v43 }
0x1035   :  { %v2786_v27 = vpop.permute.xlu0 %2785 }
0x1036   :  { %v3052_v35 = vmax.f32 %v3049_v44, 0.0  ;;  %2792 = vst.msk [vmem:[#allocation2 + $0x10] sm:$0x3] %vm1233_vm3, %v2786_v27 }
0x1038   :  { %v3058_v22 = vadd.f32 1e-05, %v3052_v35 }
0x103a   :  { %4569 = vrsqrt.f32 %v3058_v22 }
0x1044   :  { %v4570_v46 = vpop.eup %4569 }
0x1045   :  { %v3064_v33 = vmul.f32 %v4570_v46, %v3055_v41 }
0x1047   :  { %v3073_v34 = vmul.f32 %v5628_v47, %v3064_v33 }
0x1049   :  { %v5637_v38 = vadd.f32 %v5633_v48, %v3073_v34 }
0x104b   :  { %4156 = vmatmul.mubr.msk.f32.vlgmr.msra.gmra.mrb[78].mxu1 %vm249_vm4, %v5637_v38 }
0x104c   :  { %4158 = vmatprep.mubr.msk.f32.mxu1 %vm4602_vm1, %v4601_v2 }
0x1051   :  { %v2900_v51 = vpop.permute.xlu1 %2899 }
0x1052   :  { %2906 = vst.msk [vmem:[#allocation2 + $0x10] sm:$0x3] %vm1349_vm7, %v2900_v51 }
0x1059   :  { %v2909_v52 = vld [vmem:[#allocation2 + $0x10] sm:$0x3] }
0x105a   :  { %4145 = vmatmul.mubr.msk.f32.gmra.mrb[58].mxu0 %vm249_vm4, %v2909_v52 }
0x105b   :  { %4196 = vmatprep.mubr.msk.f32.mxu0 %vm4602_vm1, %v4601_v2 }
0x10fa   :  { %v3003_v15 = vpop.f32.mrb[56].mxu0 }
0x10fb   :  { %v3004_v63 = vadd.f32 %v5597_v53, %v3003_v15  ;;  %v4143_v1 = vpop.f32.mrb[57].mxu0 }
0x10fd   :  { %v3013_v21 = vadd.f32 %v3004_v63, %v5304_v7 }
0x10ff   :  { %v3022_v28 = vsel %vm249_vm4, %v3013_v21, 0.0  ;;  %v3032_v5 = vmul.f32 %v3013_v21, %v3013_v21 }
0x1100   :  { %3023 = vadd.xlane.f32.xlu0 %v3022_v28 }
0x1101   :  { %v3037_v13 = vsel %vm249_vm4, %v3032_v5, 0.0 }
0x1102   :  { %3038 = vadd.xlane.f32.xlu1 %v3037_v13 }
0x111e   :  { %v3173_v24 = vpop.f32.mrb[78].mxu1 }
0x111f   :  { %v3174_v19 = vadd.f32 %v5710_v49, %v3173_v24  ;;  %v4157_v11 = vpop.f32.mrb[79].mxu1 }
0x1121   :  { %v3187_v29 = vmax.f32 %v3174_v19, 0.0 }
0x1123   :  { %4197 = vmatmul.mubr.f32.vlgmr.msra.gmra.mrb[60].mxu0 %v3187_v29 }
0x1124   :  { %4199 = vmatprep.mubr.msk.f32.mxu0 %vm4602_vm1, %v4601_v2 }
0x112d   :  { %v3008_v7 = vpop.f32.mrb[58].mxu0 }
0x112e   :  { %v3009_v31 = vadd.f32 %v5597_v53, %v3008_v7  ;;  %v4146_v32 = vpop.f32.mrb[59].mxu0  ;;  %v3581_v7 = vld [vmem:[%s5789_s14 + $0x1] ss:$0 sm:$0xff] }
0x1130   :  { %v3014_v50 = vadd.f32 %v3009_v31, %v5310_v10 }
0x1132   :  { %v3025_v36 = vsel %vm1465_vm8, %v3014_v50, 0.0  ;;  %v3033_v37 = vmul.f32 %v3014_v50, %v3014_v50 }
0x1133   :  { %3026 = vadd.xlane.f32.xlu0 %v3025_v36 }
0x1134   :  { %v3040_v39 = vsel %vm1465_vm8, %v3033_v37, 0.0 }
0x1137   :  { %3041 = vadd.xlane.f32.xlu0 %v3040_v39  ;;  %v3582_v39 = vld [vmem:[%s5790_s15 + $0x1] ss:$0 sm:$0xff]  ;;  %s4577_s15 = scalar_lea.vmem %s3420_s12, 32 }
0x1138   :  { %p4578_p0 = scmp.ne.s32.totalorder %s3420_s12, %s4577_s15  ;;  %p4583_p2 = scmp.lt.s32.totalorder %s4577_s15, %s4577_s15 }
0x113a   :  { %p4584_p3 = por %p4583_p2, %p4582_p1 }
0x113c   :  { %p4585_p4 = pnand %p4584_p3, %p4578_p0 }
0x118d   :  { %v3024_v40 = vpop.xlane.xlu0 %3023 }
0x118e   :  { %v3029_v42 = vmul.f32 0.03125, %v3024_v40 }
0x118f   :  { %v3039_v43 = vpop.xlane.xlu1 %3038 }
0x1190   :  { %v3047_v61 = vmul.f32 %v3029_v42, %v3029_v42  ;;  %v3044_v44 = vmul.f32 0.03125, %v3039_v43  ;;  %v3056_v53 = vsub.f32 %v3013_v21, %v3029_v42 }
0x1192   :  { %v3050_v27 = vsub.f32 %v3044_v44, %v3047_v61 }
0x1194   :  { %v3053_v35 = vmax.f32 %v3050_v27, 0.0 }
0x1196   :  { %v3059_v22 = vadd.f32 1e-05, %v3053_v35 }
0x1198   :  { %4571 = vrsqrt.f32 %v3059_v22 }
0x11a2   :  { %v4572_v41 = vpop.eup %4571 }
0x11a3   :  { %v3065_v46 = vmul.f32 %v4572_v41, %v3056_v53 }
0x11a5   :  { %v3074_v10 = vmul.f32 %v5628_v47, %v3065_v46 }
0x11a7   :  { %v3083_v33 = vadd.f32 %v5633_v48, %v3074_v10 }
0x11a9   :  { %4159 = vmatmul.mubr.msk.f32.gmra.mrb[80].mxu1 %vm249_vm4, %v3083_v33 }
0x11aa   :  { %4161 = vmatprep.mubr.msk.f32.mxu1 %vm4602_vm1, %v4601_v2 }
0x11c0   :  { %v3027_v34 = vpop.xlane.xlu0 %3026 }
0x11c1   :  { %v3030_v51 = vmul.f32 0.03125, %v3027_v34 }
0x11c3   :  { %v3048_v56 = vmul.f32 %v3030_v51, %v3030_v51  ;;  %v3057_v62 = vsub.f32 %v3014_v50, %v3030_v51 }
0x11c4   :  { %v3042_v52 = vpop.xlane.xlu0 %3041 }
0x11c5   :  { %v3045_v57 = vmul.f32 0.03125, %v3042_v52 }
0x11c7   :  { %v3051_v59 = vsub.f32 %v3045_v57, %v3048_v56 }
0x11c9   :  { %v3054_v55 = vmax.f32 %v3051_v59, 0.0 }
0x11cb   :  { %v3060_v58 = vadd.f32 1e-05, %v3054_v55 }
0x11cd   :  { %4573 = vrsqrt.f32 %v3060_v58 }
0x11d7   :  { %v4574_v0 = vpop.eup %4573 }
0x11d8   :  { %v3066_v3 = vmul.f32 %v4574_v0, %v3057_v62 }
0x11da   :  { %v3075_v6 = vmul.f32 %v5628_v47, %v3066_v3  ;;  %v3328_v47 = vld [vmem:[%s5791_s16] sm:$0xff] }
0x11dc   :  { %v3084_v8 = vadd.f32 %v5633_v48, %v3075_v6  ;;  %v3329_v48 = vld [vmem:[%s5791_s16 + $0x8] sm:$0xff] }
0x11dd   :  { %v4357_v60 = vpack.c.bf16 %v3329_v48, %v3328_v47 }
0x11de   :  { %4162 = vmatmul.mubr.msk.f32.gmra.mrb[82].mxu1 %vm249_vm4, %v3084_v8 }
0x11df   :  { %4358 = vmatpush3.bf16.msra.mxu0 %v4357_v60 }
0x11e0   :  { %4359 = vmatprep.subr.bf16.mxu0 %v4603_v4 }
0x11f6   :  { %v3281_v12 = vpop.f32.mrb[60].mxu0 }
0x11f7   :  { %v3282_v30 = vadd.f32 %v3578_v45, %v3281_v12  ;;  %v4198_v9 = vpop.f32.mrb[61].mxu0 }
0x11f9   :  { %v3293_v14 = vadd.f32 %v3282_v30, %v5637_v38  ;;  %v3330_v38 = vld [vmem:[%s5791_s16 + $0x10] sm:$0xff] }
0x11fa   :  { %v4360_v25 = vpack.c.bf16 %v3331_v20, %v3330_v38 }
0x11fb   :  { %v3298_v16 = vsel %vm249_vm4, %v3293_v14, 0.0  ;;  %v3302_v17 = vmul.f32 %v3293_v14, %v3293_v14 }
0x11fc   :  { %3299 = vadd.xlane.f32.xlu1 %v3298_v16  ;;  %4361 = vmatpush3.bf16.msra.mxu0 %v4360_v25 }
0x11fd   :  { %v3303_v18 = vsel %vm249_vm4, %v3302_v17, 0.0 }
0x11fe   :  { %3304 = vadd.xlane.f32.xlu0 %v3303_v18 }
0x127c   :  { %v3178_v54 = vpop.f32.mrb[80].mxu1 }
0x127d   :  { %v3179_v26 = vadd.f32 %v5710_v49, %v3178_v54  ;;  %v4160_v23 = vpop.f32.mrb[81].mxu1 }
0x127f   :  { %v3188_v15 = vmax.f32 %v3179_v26, 0.0 }
0x1281   :  { %4200 = vmatmul.mubr.f32.gmra.mrb[62].mxu0 %v3188_v15 }
0x1282   :  { %4202 = vmatprep.mubr.msk.f32.mxu0 %vm4602_vm1, %v4601_v2 }
0x1289   :  { %v3300_v4 = vpop.xlane.xlu1 %3299 }
0x128a   :  { %v3301_v63 = vmul.f32 0.03125, %v3300_v4 }
0x128b   :  { %v3305_v1 = vpop.xlane.xlu0 %3304 }
0x128c   :  { %v3307_v21 = vmul.f32 %v3301_v63, %v3301_v63  ;;  %v3306_v28 = vmul.f32 0.03125, %v3305_v1  ;;  %v3310_v11 = vsub.f32 %v3293_v14, %v3301_v63 }
0x128e   :  { %v3308_v5 = vsub.f32 %v3306_v28, %v3307_v21 }
0x1290   :  { %v3309_v13 = vmax.f32 %v3308_v5, 0.0 }
0x1292   :  { %v3311_v24 = vadd.f32 1e-05, %v3309_v13 }
0x1294   :  { %4575 = vrsqrt.f32 %v3311_v24 }
0x129e   :  { %v4576_v19 = vpop.eup %4575 }
0x129f   :  { %v3313_v29 = vmul.f32 %v4576_v19, %v3310_v11 }
0x12a1   :  { %v3320_v36 = vmul.f32 %v3581_v7, %v3313_v29 }
0x12a3   :  { %v3327_v40 = vadd.f32 %v3582_v39, %v3320_v36 }
0x12b1   :  { %v3183_v31 = vpop.f32.mrb[82].mxu1 }
0x12b2   :  { %v3184_v32 = vadd.f32 %v5710_v49, %v3183_v31  ;;  %v4163_v50 = vpop.f32.mrb[83].mxu1  ;;  %v3583_v49 = vld [vmem:[%s5792_s17] ss:$0 sm:$0xff] }
0x12b4   :  { %v3189_v37 = vmax.f32 %v3184_v32, 0.0 }
0x12b6   :  { %4203 = vmatmul.mubr.f32.gmra.mrb[64].mxu0 %v3189_v37 }
0x12b7   :  { %4213 = vmatprep.mubr.msk.f32.mxu0 %vm4602_vm1, %v4601_v2 }
0x12ba   :  { %4214 = vmatmul.mubr.msk.f32.vlgmr.msra.gmra.mrb[66].mxu0 %vm249_vm4, %v3327_v40 }
0x1354   :  { %v3286_v42 = vpop.f32.mrb[62].mxu0 }
0x1355   :  { %v4201_v43 = vpop.f32.mrb[63].mxu0 }
0x1389   :  { %v3290_v61 = vpop.f32.mrb[64].mxu0 }
0x138a   :  { %v4204_v44 = vpop.f32.mrb[65].mxu0 }
0x138d   :  { %v3408_v27 = vpop.f32.mrb[66].mxu0 }
0x138e   :  { %v3409_v35 = vadd.f32 %v3583_v49, %v3408_v27  ;;  %v4215_v22 = vpop.f32.mrb[67].mxu0 }
0x1390   :  { %3412 = vst.msk [vmem:[#allocation3] sm:$0x3] %vm1001_vm13, %v3409_v35 }
0x1391   :  { %4588 = shalt.err (!%p4585_p4)
}
0x1392   :  { %s4589_s28 = scalar_lea.hbm %s5793_s18, 32 }
0x1393   :  { %p4590_p5 = scmp.ne.s32.totalorder %s5793_s18, %s4589_s28  ;;  %p4593_p6 = scmp.lt.u32.totalorder %s4589_s28, %s5793_s18 }
0x1395   :  { %p4595_p7 = pnand %p4593_p6, %p4590_p5 }
0x1397   :  { %4598 = shalt.err (!%p4595_p7)
}
0x1398   :  { %3422 = dma.vmem_to_hbm [thread:$0]  %s3420_s12, 32, %s5793_s18, [#allocation4]  }
0x1399   :  { %4599 = dma.done.wait [#allocation4], 32  }
0x139a   :  { %4600 = vsyncadd [#allocation4], 4294967264 }
0x139b   :  { %3426 = vsyncpa [#allocation4], 1 }

</bundles_post_ra>
